<compile_context>
chip_gen: v5e
topology: v5e:2x2
jax: 0.10.0
libtpu: 0.0.40
codegen_flags: <defaults>
</compile_context>

<pallas_src>
import functools

import jax
import jax.numpy as jnp
from jax.experimental import pallas as pl
from jax.experimental.pallas import tpu as pltpu

NEG_INF = jnp.float32(-1e30)   # bias for padded vocab columns (never wins argmax)


# ----------------------------------------------------------------------------
# GRU step (PyTorch gate order r, z, n) with packed gates and folded biases:
#   gx = x @ [Wir|Wiz|Win] + [bir+bhr | biz+bhz | bin]   (precomputed / gathered)
#   gh = h @ [Whr|Whz|Whn]                               (no bias)
#   r  = sigmoid(gx_r + gh_r); z = sigmoid(gx_z + gh_z)
#   n  = tanh(gx_n + r * (gh_n + bhn)); h' = (1-z)*n + z*h
# ----------------------------------------------------------------------------
def _gru_step(gx, gh, bhn, h):
    hp = h.shape[1]
    r = jax.nn.sigmoid(gx[:, :hp] + gh[:, :hp])
    z = jax.nn.sigmoid(gx[:, hp:2 * hp] + gh[:, hp:2 * hp])
    n = jnp.tanh(gx[:, 2 * hp:] + r * (gh[:, 2 * hp:] + bhn))
    return (1.0 - z) * n + z * h


def _first_argmax_onehot(logits, lane):
    """First-max (torch.argmax-style) one-hot using an int32 iota."""
    vp = logits.shape[1]
    m = jnp.max(logits, axis=1, keepdims=True)
    first = jnp.min(jnp.where(logits == m, lane, jnp.int32(vp)),
                    axis=1, keepdims=True)
    return (lane == first).astype(jnp.float32)


# ----------------------------------------------------------------------------
# Fused encoder + decoder kernel (single grid step).
# ----------------------------------------------------------------------------
def seq2seq_kernel(batch,                                  # static: real batch
                   tf_ref, trg_ref,                        # SMEM scalar prefetch
                   enc_gx_ref, enc_wh_ref, enc_bhn_ref,
                   gate_tab_ref, dec_wh_ref, dec_bhn_ref,
                   wout_ref, bout_ref,
                   logits_ref):
    src_len, bp, _ = enc_gx_ref.shape
    hp = enc_wh_ref.shape[0]
    vp = wout_ref.shape[1]
    n_dec = logits_ref.shape[0]

    # ---------------- Encoder: h carried in vregs across an unrolled loop ----
    enc_bhn = enc_bhn_ref[...]                             # (1, Hp)

    def enc_body(t, h):
        gh = jnp.dot(h, enc_wh_ref[...], preferred_element_type=jnp.float32)
        return _gru_step(enc_gx_ref[t], gh, enc_bhn, h)

    h = jax.lax.fori_loop(0, src_len, enc_body,
                          jnp.zeros((bp, hp), jnp.float32), unroll=True)

    # ---------------- Decoder -------------------------------------------------
    dec_bhn = dec_bhn_ref[...]                             # (1, Hp)
    bout = bout_ref[...]                                   # (1, Vp)
    lane = jax.lax.broadcasted_iota(jnp.int32, (bp, vp), 1)   # hoisted iotas
    sub = jax.lax.broadcasted_iota(jnp.int32, (bp, vp), 0)

    def trg_onehot(t):
        """(Bp, Vp) one-hot of trg[t] built from SMEM token ids; pad rows = 0."""
        oh = jnp.zeros((bp, vp), jnp.float32)
        for b in range(batch):                             # tiny, static batch
            tok = trg_ref[t * batch + b]                   # SMEM scalar read
            oh = oh + ((lane == tok) & (sub == b)).astype(jnp.float32)
        return oh

    def dec_core(h, in_oh):
        # Embedding + input projection fused: one-hot @ gate_table (MXU gather).
        gx = jnp.dot(in_oh, gate_tab_ref[...], preferred_element_type=jnp.float32)
        gh = jnp.dot(h, dec_wh_ref[...], preferred_element_type=jnp.float32)
        h_new = _gru_step(gx, gh, dec_bhn, h)
        logits = jnp.dot(h_new, wout_ref[...],
                         preferred_element_type=jnp.float32) + bout
        return h_new, logits

    def dec_body(j, carry):
        h, in_oh = carry
        h_new, logits = dec_core(h, in_oh)
        logits_ref[pl.ds(j, 1), :, :] = logits[None]       # lane-dense store
        # Select the NEXT step's input fully in-kernel (no host sync).
        top1_oh = _first_argmax_onehot(logits, lane)
        tf = (tf_ref[j] == 1).astype(jnp.float32)          # SMEM scalar flag
        in_next = tf * trg_onehot(j + 1) + (1.0 - tf) * top1_oh
        return h_new, in_next

    h, in_oh = jax.lax.fori_loop(0, n_dec - 1, dec_body,
                                 (h, trg_onehot(0)), unroll=True)

    # Peeled final step: its argmax / next-input selection would never be used.
    _, logits = dec_core(h, in_oh)
    logits_ref[pl.ds(n_dec - 1, 1), :, :] = logits[None]


def run_seq2seq(tf_flags, trg_ids, enc_gx, enc_wh, enc_bhn,
                gate_tab, dec_wh, dec_bhn, wout, bout, *, batch):
    """Returns decoder logits for target steps 1..T-1, shape (T-1, Bp, Vp)."""
    src_len, bp, h3 = enc_gx.shape
    hp = enc_wh.shape[0]
    vp = wout.shape[1]
    n_dec = tf_flags.shape[0]

    def full(shape):
        return pl.BlockSpec(shape, lambda i, *_: (0,) * len(shape))

    return pl.pallas_call(
        functools.partial(seq2seq_kernel, batch),
        out_shape=jax.ShapeDtypeStruct((n_dec, bp, vp), jnp.float32),
        grid_spec=pltpu.PrefetchScalarGridSpec(
            num_scalar_prefetch=2,          # teacher-forcing flags + trg ids -> SMEM
            grid=(1,),
            in_specs=[
                full((src_len, bp, h3)),    # precomputed encoder input gates
                full((hp, h3)),             # encoder recurrent weights (resident)
                full((1, hp)),              # encoder bhn
                full((vp, h3)),             # decoder emb@Wi+bi gate table
                full((hp, h3)),             # decoder recurrent weights
                full((1, hp)),              # decoder bhn
                full((hp, vp)),             # output projection
                full((1, vp)),              # output bias (pad cols = -1e30)
            ],
            out_specs=full((n_dec, bp, vp)),
        ),
        compiler_params=pltpu.CompilerParams(dimension_semantics=("arbitrary",)),
    )(tf_flags, trg_ids, enc_gx, enc_wh, enc_bhn, gate_tab, dec_wh, dec_bhn,
      wout, bout)


# ----------------------------------------------------------------------------
# Parameter packing: fuse r/z/n gates, fold bhr/bhz into input-side biases,
# pad to TPU-friendly shapes.
# ----------------------------------------------------------------------------
def _pad2(x, rows, cols, fill=0.0):
    r, c = x.shape
    return jnp.pad(x, ((0, rows - r), (0, cols - c)), constant_values=fill)


def _pack_gru(g, hid_pad):
    in_dim = g["wir"].shape[0]
    wi = jnp.concatenate([_pad2(g["wir"], in_dim, hid_pad),
                          _pad2(g["wiz"], in_dim, hid_pad),
                          _pad2(g["win"], in_dim, hid_pad)], axis=1)
    # bhr / bhz fold into the input-side bias; bhn must stay inside r*(...).
    bi = jnp.concatenate([_pad2(g["bir"] + g["bhr"], 1, hid_pad),
                          _pad2(g["biz"] + g["bhz"], 1, hid_pad),
                          _pad2(g["bin"], 1, hid_pad)], axis=1)
    wh = jnp.concatenate([_pad2(g["whr"], hid_pad, hid_pad),
                          _pad2(g["whz"], hid_pad, hid_pad),
                          _pad2(g["whn"], hid_pad, hid_pad)], axis=1)
    bhn = _pad2(g["bhn"], 1, hid_pad)
    return wi, bi, wh, bhn


def pack_params(params):
    enc, dec = params["encoder"], params["decoder"]
    hid = enc["whr"].shape[0]
    out_vocab = dec["wout"].shape[1]
    hid_pad = ((hid + 127) // 128) * 128
    vocab_pad = ((out_vocab + 127) // 128) * 128

    e_wi, e_bi, e_wh, e_bhn = _pack_gru(enc, hid_pad)
    d_wi, d_bi, d_wh, d_bhn = _pack_gru(dec, hid_pad)

    # Decoder: fuse embedding lookup + input projection (+ folded biases) into
    # one (vocab, 3Hp) gate table.
    gate_tab = dec["emb"] @ d_wi + d_bi
    gate_tab = jnp.pad(gate_tab, ((0, vocab_pad - out_vocab), (0, 0)))

    wout = _pad2(dec["wout"], hid_pad, vocab_pad)
    bout = jnp.concatenate(
        [dec["bout"],
         jnp.full((1, vocab_pad - out_vocab), NEG_INF, jnp.float32)], axis=1)

    return {
        "enc_emb": enc["emb"], "enc_wi": e_wi, "enc_bi": e_bi,
        "enc_wh": e_wh, "enc_bhn": e_bhn,
        "dec_gate_tab": gate_tab, "dec_wh": d_wh, "dec_bhn": d_bhn,
        "dec_wout": wout, "dec_bout": bout,
        "dims": (hid, out_vocab, hid_pad, vocab_pad),
    }


# ----------------------------------------------------------------------------
# Seq2Seq forward (mirrors the PyTorch module; time-major src/trg).
# ----------------------------------------------------------------------------
def seq2seq_forward(src, trg, tparams, teacher_forcing_ratio=0.5,
                    tf_key=jax.random.PRNGKey(123)):
    """src: (src_len, B) int32, trg: (trg_len, B) int32.
    Returns outputs: (trg_len, B, trg_vocab) f32 with outputs[0] == 0."""
    hid, out_vocab, hid_pad, vocab_pad = tparams["dims"]
    trg_len, batch = trg.shape
    batch_pad = ((batch + 7) // 8) * 8

    # Encoder embedding + hoisted input-side projection for ALL timesteps
    # (one big matmul, XLA glue) -> (L, Bp, 3Hp).
    emb_src = tparams["enc_emb"][src]
    gx = jnp.einsum("lbe,eh->lbh", emb_src, tparams["enc_wi"]) + tparams["enc_bi"]
    gx = jnp.pad(gx, ((0, 0), (0, batch_pad - batch), (0, 0)))

    n_dec = trg_len - 1
    # Deterministic stand-in for python random.random() teacher-forcing draws
    # (flag j selects the input feeding target step j+2; the last is unused,
    # matching the PyTorch loop where the last draw's selection is discarded).
    tf_flags = (jax.random.uniform(tf_key, (n_dec,)) <
                teacher_forcing_ratio).astype(jnp.int32)
    trg_ids = trg.reshape(-1).astype(jnp.int32)           # (T*B,) time-major flat

    logits_tail = run_seq2seq(tf_flags, trg_ids, gx,
                              tparams["enc_wh"], tparams["enc_bhn"],
                              tparams["dec_gate_tab"], tparams["dec_wh"],
                              tparams["dec_bhn"], tparams["dec_wout"],
                              tparams["dec_bout"], batch=batch)   # (T-1, Bp, Vp)
    logits_tail = logits_tail[:, :batch, :out_vocab]
    return jnp.concatenate(
        [jnp.zeros((1, batch, out_vocab), jnp.float32), logits_tail], axis=0)


# ----------------------------------------------------------------------------
# Deterministic parameter init (synthetic; PyTorch-like per-gate layout).
# ----------------------------------------------------------------------------
def init_params(key, in_vocab, out_vocab, emb_dim, hid_dim):
    ks = iter(jax.random.split(key, 32))
    u = lambda shape, s=0.1: jax.random.uniform(next(ks), shape, jnp.float32, -s, s)

    def gru(in_dim):
        return {
            "wir": u((in_dim, hid_dim)), "wiz": u((in_dim, hid_dim)), "win": u((in_dim, hid_dim)),
            "whr": u((hid_dim, hid_dim)), "whz": u((hid_dim, hid_dim)), "whn": u((hid_dim, hid_dim)),
            "bir": u((1, hid_dim)), "biz": u((1, hid_dim)), "bin": u((1, hid_dim)),
            "bhr": u((1, hid_dim)), "bhz": u((1, hid_dim)), "bhn": u((1, hid_dim)),
        }

    enc = {"emb": u((in_vocab, emb_dim), 1.0)}
    enc.update(gru(emb_dim))
    dec = {"emb": u((out_vocab, emb_dim), 1.0)}
    dec.update(gru(emb_dim))
    dec["wout"] = u((hid_dim, out_vocab))
    dec["bout"] = u((1, out_vocab))
    return {"encoder": enc, "decoder": dec}


if __name__ == "__main__":
    IN_VOCAB, OUT_VOCAB = 20, 24
    EMB_DIM, HID_DIM = 16, 32
    SRC_LEN, TRG_LEN, BATCH = 7, 8, 2

    key = jax.random.PRNGKey(0)
    k_param, k_src, k_trg, k_tf = jax.random.split(key, 4)

    params = pack_params(init_params(k_param, IN_VOCAB, OUT_VOCAB, EMB_DIM, HID_DIM))
    src = jax.random.randint(k_src, (SRC_LEN, BATCH), 0, IN_VOCAB, jnp.int32)
    trg = jax.random.randint(k_trg, (TRG_LEN, BATCH), 0, OUT_VOCAB, jnp.int32)

    outputs = seq2seq_forward(src, trg, params,
                              teacher_forcing_ratio=0.5, tf_key=k_tf)
    outputs = jax.block_until_ready(outputs)

    assert outputs.shape == (TRG_LEN, BATCH, OUT_VOCAB)
    assert outputs.dtype == jnp.float32
    assert bool(jnp.all(outputs[0] == 0.0))
    assert bool(jnp.all(jnp.isfinite(outputs)))
    print("KERNEL_OK")
</pallas_src>

<mosaic_0001>
module attributes {stable_mosaic.version = 11 : i64} {
  func.func @seq2seq_kernel(%arg0: i32, %arg1: memref<7xi32, #tpu.memory_space<smem>>, %arg2: memref<16xi32, #tpu.memory_space<smem>>, %arg3: memref<7x8x384xf32, #tpu.memory_space<vmem>>, %arg4: memref<128x384xf32, #tpu.memory_space<vmem>>, %arg5: memref<1x128xf32, #tpu.memory_space<vmem>>, %arg6: memref<128x384xf32, #tpu.memory_space<vmem>>, %arg7: memref<128x384xf32, #tpu.memory_space<vmem>>, %arg8: memref<1x128xf32, #tpu.memory_space<vmem>>, %arg9: memref<128x128xf32, #tpu.memory_space<vmem>>, %arg10: memref<1x128xf32, #tpu.memory_space<vmem>>, %arg11: memref<7x8x128xf32, #tpu.memory_space<vmem>>) attributes {dimension_semantics = [#tpu.dimension_semantics<arbitrary>], iteration_bounds = array<i64: 1>, scalar_prefetch = 2 : i64, scratch_operands = 0 : i64, tpu.core_type = #tpu.core_type<tc>, window_params = [{pipeline_mode = #tpu.pipeline_mode<synchronous>, transform_indices = @transform_0, window_bounds = array<i64: 7, 8, 384>}, {pipeline_mode = #tpu.pipeline_mode<synchronous>, transform_indices = @transform_1, window_bounds = array<i64: 128, 384>}, {pipeline_mode = #tpu.pipeline_mode<synchronous>, transform_indices = @transform_2, window_bounds = array<i64: 1, 128>}, {pipeline_mode = #tpu.pipeline_mode<synchronous>, transform_indices = @transform_3, window_bounds = array<i64: 128, 384>}, {pipeline_mode = #tpu.pipeline_mode<synchronous>, transform_indices = @transform_4, window_bounds = array<i64: 128, 384>}, {pipeline_mode = #tpu.pipeline_mode<synchronous>, transform_indices = @transform_5, window_bounds = array<i64: 1, 128>}, {pipeline_mode = #tpu.pipeline_mode<synchronous>, transform_indices = @transform_6, window_bounds = array<i64: 128, 128>}, {pipeline_mode = #tpu.pipeline_mode<synchronous>, transform_indices = @transform_7, window_bounds = array<i64: 1, 128>}, {pipeline_mode = #tpu.pipeline_mode<synchronous>, transform_indices = @transform_8, window_bounds = array<i64: 7, 8, 128>}]} {
    %c0 = arith.constant 0 : index
    %c0_0 = arith.constant 0 : index
    %0 = vector.load %arg5[%c0, %c0_0] : memref<1x128xf32, #tpu.memory_space<vmem>>, vector<1x128xf32>
    %cst = arith.constant 0.000000e+00 : f32
    %1 = vector.broadcast %cst : f32 to vector<8x128xf32>
    %c0_i32 = arith.constant 0 : i32
    %c0_1 = arith.constant 0 : index
    %c0_2 = arith.constant 0 : index
    %2 = vector.load %arg4[%c0_1, %c0_2] : memref<128x384xf32, #tpu.memory_space<vmem>>, vector<128x384xf32>
    %cst_3 = arith.constant dense<0.000000e+00> : vector<8x384xf32>
    %3 = tpu.matmul %1, %2, %cst_3 {dimension_numbers = #tpu.dot_dimension_numbers<[1], [0], [0], [1], [0, 0, 1, 1], [], []>} : vector<8x128xf32>, vector<128x384xf32>, vector<8x384xf32> -> vector<8x384xf32>
    %4 = arith.index_cast %c0_i32 : i32 to index
    %c0_4 = arith.constant 0 : index
    %c0_5 = arith.constant 0 : index
    %5 = vector.load %arg3[%4, %c0_4, %c0_5] : memref<7x8x384xf32, #tpu.memory_space<vmem>>, vector<1x8x384xf32>
    %6 = vector.shape_cast %5 : vector<1x8x384xf32> to vector<8x384xf32>
    %7 = vector.extract_strided_slice %6 {offsets = [0, 0], sizes = [8, 128], strides = [1, 1]} : vector<8x384xf32> to vector<8x128xf32>
    %8 = vector.extract_strided_slice %3 {offsets = [0, 0], sizes = [8, 128], strides = [1, 1]} : vector<8x384xf32> to vector<8x128xf32>
    %9 = arith.addf %7, %8 : vector<8x128xf32>
    %10 = arith.negf %9 : vector<8x128xf32>
    %11 = math.exp %10 : vector<8x128xf32>
    %cst_6 = arith.constant 1.000000e+00 : f32
    %12 = vector.broadcast %cst_6 : f32 to vector<8x128xf32>
    %13 = arith.addf %12, %11 : vector<8x128xf32>
    %14 = arith.divf %12, %13 : vector<8x128xf32>
    %15 = vector.extract_strided_slice %6 {offsets = [0, 128], sizes = [8, 128], strides = [1, 1]} : vector<8x384xf32> to vector<8x128xf32>
    %16 = vector.extract_strided_slice %3 {offsets = [0, 128], sizes = [8, 128], strides = [1, 1]} : vector<8x384xf32> to vector<8x128xf32>
    %17 = arith.addf %15, %16 : vector<8x128xf32>
    %18 = arith.negf %17 : vector<8x128xf32>
    %19 = math.exp %18 : vector<8x128xf32>
    %cst_7 = arith.constant 1.000000e+00 : f32
    %20 = vector.broadcast %cst_7 : f32 to vector<8x128xf32>
    %21 = arith.addf %20, %19 : vector<8x128xf32>
    %22 = arith.divf %20, %21 : vector<8x128xf32>
    %23 = vector.extract_strided_slice %6 {offsets = [0, 256], sizes = [8, 128], strides = [1, 1]} : vector<8x384xf32> to vector<8x128xf32>
    %24 = vector.extract_strided_slice %3 {offsets = [0, 256], sizes = [8, 128], strides = [1, 1]} : vector<8x384xf32> to vector<8x128xf32>
    %25 = vector.broadcast %0 : vector<1x128xf32> to vector<8x128xf32>
    %26 = arith.addf %24, %25 : vector<8x128xf32>
    %27 = arith.mulf %14, %26 : vector<8x128xf32>
    %28 = arith.addf %23, %27 : vector<8x128xf32>
    %29 = math.tanh %28 : vector<8x128xf32>
    %cst_8 = arith.constant 1.000000e+00 : f32
    %30 = vector.broadcast %cst_8 : f32 to vector<8x128xf32>
    %31 = arith.subf %30, %22 : vector<8x128xf32>
    %32 = arith.mulf %31, %29 : vector<8x128xf32>
    %33 = arith.mulf %22, %1 : vector<8x128xf32>
    %34 = arith.addf %32, %33 : vector<8x128xf32>
    %c1_i32 = arith.constant 1 : i32
    %c0_9 = arith.constant 0 : index
    %c0_10 = arith.constant 0 : index
    %35 = vector.load %arg4[%c0_9, %c0_10] : memref<128x384xf32, #tpu.memory_space<vmem>>, vector<128x384xf32>
    %cst_11 = arith.constant dense<0.000000e+00> : vector<8x384xf32>
    %36 = tpu.matmul %34, %35, %cst_11 {dimension_numbers = #tpu.dot_dimension_numbers<[1], [0], [0], [1], [0, 0, 1, 1], [], []>} : vector<8x128xf32>, vector<128x384xf32>, vector<8x384xf32> -> vector<8x384xf32>
    %37 = arith.index_cast %c1_i32 : i32 to index
    %c0_12 = arith.constant 0 : index
    %c0_13 = arith.constant 0 : index
    %38 = vector.load %arg3[%37, %c0_12, %c0_13] : memref<7x8x384xf32, #tpu.memory_space<vmem>>, vector<1x8x384xf32>
    %39 = vector.shape_cast %38 : vector<1x8x384xf32> to vector<8x384xf32>
    %40 = vector.extract_strided_slice %39 {offsets = [0, 0], sizes = [8, 128], strides = [1, 1]} : vector<8x384xf32> to vector<8x128xf32>
    %41 = vector.extract_strided_slice %36 {offsets = [0, 0], sizes = [8, 128], strides = [1, 1]} : vector<8x384xf32> to vector<8x128xf32>
    %42 = arith.addf %40, %41 : vector<8x128xf32>
    %43 = arith.negf %42 : vector<8x128xf32>
    %44 = math.exp %43 : vector<8x128xf32>
    %cst_14 = arith.constant 1.000000e+00 : f32
    %45 = vector.broadcast %cst_14 : f32 to vector<8x128xf32>
    %46 = arith.addf %45, %44 : vector<8x128xf32>
    %47 = arith.divf %45, %46 : vector<8x128xf32>
    %48 = vector.extract_strided_slice %39 {offsets = [0, 128], sizes = [8, 128], strides = [1, 1]} : vector<8x384xf32> to vector<8x128xf32>
    %49 = vector.extract_strided_slice %36 {offsets = [0, 128], sizes = [8, 128], strides = [1, 1]} : vector<8x384xf32> to vector<8x128xf32>
    %50 = arith.addf %48, %49 : vector<8x128xf32>
    %51 = arith.negf %50 : vector<8x128xf32>
    %52 = math.exp %51 : vector<8x128xf32>
    %cst_15 = arith.constant 1.000000e+00 : f32
    %53 = vector.broadcast %cst_15 : f32 to vector<8x128xf32>
    %54 = arith.addf %53, %52 : vector<8x128xf32>
    %55 = arith.divf %53, %54 : vector<8x128xf32>
    %56 = vector.extract_strided_slice %39 {offsets = [0, 256], sizes = [8, 128], strides = [1, 1]} : vector<8x384xf32> to vector<8x128xf32>
    %57 = vector.extract_strided_slice %36 {offsets = [0, 256], sizes = [8, 128], strides = [1, 1]} : vector<8x384xf32> to vector<8x128xf32>
    %58 = vector.broadcast %0 : vector<1x128xf32> to vector<8x128xf32>
    %59 = arith.addf %57, %58 : vector<8x128xf32>
    %60 = arith.mulf %47, %59 : vector<8x128xf32>
    %61 = arith.addf %56, %60 : vector<8x128xf32>
    %62 = math.tanh %61 : vector<8x128xf32>
    %cst_16 = arith.constant 1.000000e+00 : f32
    %63 = vector.broadcast %cst_16 : f32 to vector<8x128xf32>
    %64 = arith.subf %63, %55 : vector<8x128xf32>
    %65 = arith.mulf %64, %62 : vector<8x128xf32>
    %66 = arith.mulf %55, %34 : vector<8x128xf32>
    %67 = arith.addf %65, %66 : vector<8x128xf32>
    %c2_i32 = arith.constant 2 : i32
    %c0_17 = arith.constant 0 : index
    %c0_18 = arith.constant 0 : index
    %68 = vector.load %arg4[%c0_17, %c0_18] : memref<128x384xf32, #tpu.memory_space<vmem>>, vector<128x384xf32>
    %cst_19 = arith.constant dense<0.000000e+00> : vector<8x384xf32>
    %69 = tpu.matmul %67, %68, %cst_19 {dimension_numbers = #tpu.dot_dimension_numbers<[1], [0], [0], [1], [0, 0, 1, 1], [], []>} : vector<8x128xf32>, vector<128x384xf32>, vector<8x384xf32> -> vector<8x384xf32>
    %70 = arith.index_cast %c2_i32 : i32 to index
    %c0_20 = arith.constant 0 : index
    %c0_21 = arith.constant 0 : index
    %71 = vector.load %arg3[%70, %c0_20, %c0_21] : memref<7x8x384xf32, #tpu.memory_space<vmem>>, vector<1x8x384xf32>
    %72 = vector.shape_cast %71 : vector<1x8x384xf32> to vector<8x384xf32>
    %73 = vector.extract_strided_slice %72 {offsets = [0, 0], sizes = [8, 128], strides = [1, 1]} : vector<8x384xf32> to vector<8x128xf32>
    %74 = vector.extract_strided_slice %69 {offsets = [0, 0], sizes = [8, 128], strides = [1, 1]} : vector<8x384xf32> to vector<8x128xf32>
    %75 = arith.addf %73, %74 : vector<8x128xf32>
    %76 = arith.negf %75 : vector<8x128xf32>
    %77 = math.exp %76 : vector<8x128xf32>
    %cst_22 = arith.constant 1.000000e+00 : f32
    %78 = vector.broadcast %cst_22 : f32 to vector<8x128xf32>
    %79 = arith.addf %78, %77 : vector<8x128xf32>
    %80 = arith.divf %78, %79 : vector<8x128xf32>
    %81 = vector.extract_strided_slice %72 {offsets = [0, 128], sizes = [8, 128], strides = [1, 1]} : vector<8x384xf32> to vector<8x128xf32>
    %82 = vector.extract_strided_slice %69 {offsets = [0, 128], sizes = [8, 128], strides = [1, 1]} : vector<8x384xf32> to vector<8x128xf32>
    %83 = arith.addf %81, %82 : vector<8x128xf32>
    %84 = arith.negf %83 : vector<8x128xf32>
    %85 = math.exp %84 : vector<8x128xf32>
    %cst_23 = arith.constant 1.000000e+00 : f32
    %86 = vector.broadcast %cst_23 : f32 to vector<8x128xf32>
    %87 = arith.addf %86, %85 : vector<8x128xf32>
    %88 = arith.divf %86, %87 : vector<8x128xf32>
    %89 = vector.extract_strided_slice %72 {offsets = [0, 256], sizes = [8, 128], strides = [1, 1]} : vector<8x384xf32> to vector<8x128xf32>
    %90 = vector.extract_strided_slice %69 {offsets = [0, 256], sizes = [8, 128], strides = [1, 1]} : vector<8x384xf32> to vector<8x128xf32>
    %91 = vector.broadcast %0 : vector<1x128xf32> to vector<8x128xf32>
    %92 = arith.addf %90, %91 : vector<8x128xf32>
    %93 = arith.mulf %80, %92 : vector<8x128xf32>
    %94 = arith.addf %89, %93 : vector<8x128xf32>
    %95 = math.tanh %94 : vector<8x128xf32>
    %cst_24 = arith.constant 1.000000e+00 : f32
    %96 = vector.broadcast %cst_24 : f32 to vector<8x128xf32>
    %97 = arith.subf %96, %88 : vector<8x128xf32>
    %98 = arith.mulf %97, %95 : vector<8x128xf32>
    %99 = arith.mulf %88, %67 : vector<8x128xf32>
    %100 = arith.addf %98, %99 : vector<8x128xf32>
    %c3_i32 = arith.constant 3 : i32
    %c0_25 = arith.constant 0 : index
    %c0_26 = arith.constant 0 : index
    %101 = vector.load %arg4[%c0_25, %c0_26] : memref<128x384xf32, #tpu.memory_space<vmem>>, vector<128x384xf32>
    %cst_27 = arith.constant dense<0.000000e+00> : vector<8x384xf32>
    %102 = tpu.matmul %100, %101, %cst_27 {dimension_numbers = #tpu.dot_dimension_numbers<[1], [0], [0], [1], [0, 0, 1, 1], [], []>} : vector<8x128xf32>, vector<128x384xf32>, vector<8x384xf32> -> vector<8x384xf32>
    %103 = arith.index_cast %c3_i32 : i32 to index
    %c0_28 = arith.constant 0 : index
    %c0_29 = arith.constant 0 : index
    %104 = vector.load %arg3[%103, %c0_28, %c0_29] : memref<7x8x384xf32, #tpu.memory_space<vmem>>, vector<1x8x384xf32>
    %105 = vector.shape_cast %104 : vector<1x8x384xf32> to vector<8x384xf32>
    %106 = vector.extract_strided_slice %105 {offsets = [0, 0], sizes = [8, 128], strides = [1, 1]} : vector<8x384xf32> to vector<8x128xf32>
    %107 = vector.extract_strided_slice %102 {offsets = [0, 0], sizes = [8, 128], strides = [1, 1]} : vector<8x384xf32> to vector<8x128xf32>
    %108 = arith.addf %106, %107 : vector<8x128xf32>
    %109 = arith.negf %108 : vector<8x128xf32>
    %110 = math.exp %109 : vector<8x128xf32>
    %cst_30 = arith.constant 1.000000e+00 : f32
    %111 = vector.broadcast %cst_30 : f32 to vector<8x128xf32>
    %112 = arith.addf %111, %110 : vector<8x128xf32>
    %113 = arith.divf %111, %112 : vector<8x128xf32>
    %114 = vector.extract_strided_slice %105 {offsets = [0, 128], sizes = [8, 128], strides = [1, 1]} : vector<8x384xf32> to vector<8x128xf32>
    %115 = vector.extract_strided_slice %102 {offsets = [0, 128], sizes = [8, 128], strides = [1, 1]} : vector<8x384xf32> to vector<8x128xf32>
    %116 = arith.addf %114, %115 : vector<8x128xf32>
    %117 = arith.negf %116 : vector<8x128xf32>
    %118 = math.exp %117 : vector<8x128xf32>
    %cst_31 = arith.constant 1.000000e+00 : f32
    %119 = vector.broadcast %cst_31 : f32 to vector<8x128xf32>
    %120 = arith.addf %119, %118 : vector<8x128xf32>
    %121 = arith.divf %119, %120 : vector<8x128xf32>
    %122 = vector.extract_strided_slice %105 {offsets = [0, 256], sizes = [8, 128], strides = [1, 1]} : vector<8x384xf32> to vector<8x128xf32>
    %123 = vector.extract_strided_slice %102 {offsets = [0, 256], sizes = [8, 128], strides = [1, 1]} : vector<8x384xf32> to vector<8x128xf32>
    %124 = vector.broadcast %0 : vector<1x128xf32> to vector<8x128xf32>
    %125 = arith.addf %123, %124 : vector<8x128xf32>
    %126 = arith.mulf %113, %125 : vector<8x128xf32>
    %127 = arith.addf %122, %126 : vector<8x128xf32>
    %128 = math.tanh %127 : vector<8x128xf32>
    %cst_32 = arith.constant 1.000000e+00 : f32
    %129 = vector.broadcast %cst_32 : f32 to vector<8x128xf32>
    %130 = arith.subf %129, %121 : vector<8x128xf32>
    %131 = arith.mulf %130, %128 : vector<8x128xf32>
    %132 = arith.mulf %121, %100 : vector<8x128xf32>
    %133 = arith.addf %131, %132 : vector<8x128xf32>
    %c4_i32 = arith.constant 4 : i32
    %c0_33 = arith.constant 0 : index
    %c0_34 = arith.constant 0 : index
    %134 = vector.load %arg4[%c0_33, %c0_34] : memref<128x384xf32, #tpu.memory_space<vmem>>, vector<128x384xf32>
    %cst_35 = arith.constant dense<0.000000e+00> : vector<8x384xf32>
    %135 = tpu.matmul %133, %134, %cst_35 {dimension_numbers = #tpu.dot_dimension_numbers<[1], [0], [0], [1], [0, 0, 1, 1], [], []>} : vector<8x128xf32>, vector<128x384xf32>, vector<8x384xf32> -> vector<8x384xf32>
    %136 = arith.index_cast %c4_i32 : i32 to index
    %c0_36 = arith.constant 0 : index
    %c0_37 = arith.constant 0 : index
    %137 = vector.load %arg3[%136, %c0_36, %c0_37] : memref<7x8x384xf32, #tpu.memory_space<vmem>>, vector<1x8x384xf32>
    %138 = vector.shape_cast %137 : vector<1x8x384xf32> to vector<8x384xf32>
    %139 = vector.extract_strided_slice %138 {offsets = [0, 0], sizes = [8, 128], strides = [1, 1]} : vector<8x384xf32> to vector<8x128xf32>
    %140 = vector.extract_strided_slice %135 {offsets = [0, 0], sizes = [8, 128], strides = [1, 1]} : vector<8x384xf32> to vector<8x128xf32>
    %141 = arith.addf %139, %140 : vector<8x128xf32>
    %142 = arith.negf %141 : vector<8x128xf32>
    %143 = math.exp %142 : vector<8x128xf32>
    %cst_38 = arith.constant 1.000000e+00 : f32
    %144 = vector.broadcast %cst_38 : f32 to vector<8x128xf32>
    %145 = arith.addf %144, %143 : vector<8x128xf32>
    %146 = arith.divf %144, %145 : vector<8x128xf32>
    %147 = vector.extract_strided_slice %138 {offsets = [0, 128], sizes = [8, 128], strides = [1, 1]} : vector<8x384xf32> to vector<8x128xf32>
    %148 = vector.extract_strided_slice %135 {offsets = [0, 128], sizes = [8, 128], strides = [1, 1]} : vector<8x384xf32> to vector<8x128xf32>
    %149 = arith.addf %147, %148 : vector<8x128xf32>
    %150 = arith.negf %149 : vector<8x128xf32>
    %151 = math.exp %150 : vector<8x128xf32>
    %cst_39 = arith.constant 1.000000e+00 : f32
    %152 = vector.broadcast %cst_39 : f32 to vector<8x128xf32>
    %153 = arith.addf %152, %151 : vector<8x128xf32>
    %154 = arith.divf %152, %153 : vector<8x128xf32>
    %155 = vector.extract_strided_slice %138 {offsets = [0, 256], sizes = [8, 128], strides = [1, 1]} : vector<8x384xf32> to vector<8x128xf32>
    %156 = vector.extract_strided_slice %135 {offsets = [0, 256], sizes = [8, 128], strides = [1, 1]} : vector<8x384xf32> to vector<8x128xf32>
    %157 = vector.broadcast %0 : vector<1x128xf32> to vector<8x128xf32>
    %158 = arith.addf %156, %157 : vector<8x128xf32>
    %159 = arith.mulf %146, %158 : vector<8x128xf32>
    %160 = arith.addf %155, %159 : vector<8x128xf32>
    %161 = math.tanh %160 : vector<8x128xf32>
    %cst_40 = arith.constant 1.000000e+00 : f32
    %162 = vector.broadcast %cst_40 : f32 to vector<8x128xf32>
    %163 = arith.subf %162, %154 : vector<8x128xf32>
    %164 = arith.mulf %163, %161 : vector<8x128xf32>
    %165 = arith.mulf %154, %133 : vector<8x128xf32>
    %166 = arith.addf %164, %165 : vector<8x128xf32>
    %c5_i32 = arith.constant 5 : i32
    %c0_41 = arith.constant 0 : index
    %c0_42 = arith.constant 0 : index
    %167 = vector.load %arg4[%c0_41, %c0_42] : memref<128x384xf32, #tpu.memory_space<vmem>>, vector<128x384xf32>
    %cst_43 = arith.constant dense<0.000000e+00> : vector<8x384xf32>
    %168 = tpu.matmul %166, %167, %cst_43 {dimension_numbers = #tpu.dot_dimension_numbers<[1], [0], [0], [1], [0, 0, 1, 1], [], []>} : vector<8x128xf32>, vector<128x384xf32>, vector<8x384xf32> -> vector<8x384xf32>
    %169 = arith.index_cast %c5_i32 : i32 to index
    %c0_44 = arith.constant 0 : index
    %c0_45 = arith.constant 0 : index
    %170 = vector.load %arg3[%169, %c0_44, %c0_45] : memref<7x8x384xf32, #tpu.memory_space<vmem>>, vector<1x8x384xf32>
    %171 = vector.shape_cast %170 : vector<1x8x384xf32> to vector<8x384xf32>
    %172 = vector.extract_strided_slice %171 {offsets = [0, 0], sizes = [8, 128], strides = [1, 1]} : vector<8x384xf32> to vector<8x128xf32>
    %173 = vector.extract_strided_slice %168 {offsets = [0, 0], sizes = [8, 128], strides = [1, 1]} : vector<8x384xf32> to vector<8x128xf32>
    %174 = arith.addf %172, %173 : vector<8x128xf32>
    %175 = arith.negf %174 : vector<8x128xf32>
    %176 = math.exp %175 : vector<8x128xf32>
    %cst_46 = arith.constant 1.000000e+00 : f32
    %177 = vector.broadcast %cst_46 : f32 to vector<8x128xf32>
    %178 = arith.addf %177, %176 : vector<8x128xf32>
    %179 = arith.divf %177, %178 : vector<8x128xf32>
    %180 = vector.extract_strided_slice %171 {offsets = [0, 128], sizes = [8, 128], strides = [1, 1]} : vector<8x384xf32> to vector<8x128xf32>
    %181 = vector.extract_strided_slice %168 {offsets = [0, 128], sizes = [8, 128], strides = [1, 1]} : vector<8x384xf32> to vector<8x128xf32>
    %182 = arith.addf %180, %181 : vector<8x128xf32>
    %183 = arith.negf %182 : vector<8x128xf32>
    %184 = math.exp %183 : vector<8x128xf32>
    %cst_47 = arith.constant 1.000000e+00 : f32
    %185 = vector.broadcast %cst_47 : f32 to vector<8x128xf32>
    %186 = arith.addf %185, %184 : vector<8x128xf32>
    %187 = arith.divf %185, %186 : vector<8x128xf32>
    %188 = vector.extract_strided_slice %171 {offsets = [0, 256], sizes = [8, 128], strides = [1, 1]} : vector<8x384xf32> to vector<8x128xf32>
    %189 = vector.extract_strided_slice %168 {offsets = [0, 256], sizes = [8, 128], strides = [1, 1]} : vector<8x384xf32> to vector<8x128xf32>
    %190 = vector.broadcast %0 : vector<1x128xf32> to vector<8x128xf32>
    %191 = arith.addf %189, %190 : vector<8x128xf32>
    %192 = arith.mulf %179, %191 : vector<8x128xf32>
    %193 = arith.addf %188, %192 : vector<8x128xf32>
    %194 = math.tanh %193 : vector<8x128xf32>
    %cst_48 = arith.constant 1.000000e+00 : f32
    %195 = vector.broadcast %cst_48 : f32 to vector<8x128xf32>
    %196 = arith.subf %195, %187 : vector<8x128xf32>
    %197 = arith.mulf %196, %194 : vector<8x128xf32>
    %198 = arith.mulf %187, %166 : vector<8x128xf32>
    %199 = arith.addf %197, %198 : vector<8x128xf32>
    %c6_i32 = arith.constant 6 : i32
    %c0_49 = arith.constant 0 : index
    %c0_50 = arith.constant 0 : index
    %200 = vector.load %arg4[%c0_49, %c0_50] : memref<128x384xf32, #tpu.memory_space<vmem>>, vector<128x384xf32>
    %cst_51 = arith.constant dense<0.000000e+00> : vector<8x384xf32>
    %201 = tpu.matmul %199, %200, %cst_51 {dimension_numbers = #tpu.dot_dimension_numbers<[1], [0], [0], [1], [0, 0, 1, 1], [], []>} : vector<8x128xf32>, vector<128x384xf32>, vector<8x384xf32> -> vector<8x384xf32>
    %202 = arith.index_cast %c6_i32 : i32 to index
    %c0_52 = arith.constant 0 : index
    %c0_53 = arith.constant 0 : index
    %203 = vector.load %arg3[%202, %c0_52, %c0_53] : memref<7x8x384xf32, #tpu.memory_space<vmem>>, vector<1x8x384xf32>
    %204 = vector.shape_cast %203 : vector<1x8x384xf32> to vector<8x384xf32>
    %205 = vector.extract_strided_slice %204 {offsets = [0, 0], sizes = [8, 128], strides = [1, 1]} : vector<8x384xf32> to vector<8x128xf32>
    %206 = vector.extract_strided_slice %201 {offsets = [0, 0], sizes = [8, 128], strides = [1, 1]} : vector<8x384xf32> to vector<8x128xf32>
    %207 = arith.addf %205, %206 : vector<8x128xf32>
    %208 = arith.negf %207 : vector<8x128xf32>
    %209 = math.exp %208 : vector<8x128xf32>
    %cst_54 = arith.constant 1.000000e+00 : f32
    %210 = vector.broadcast %cst_54 : f32 to vector<8x128xf32>
    %211 = arith.addf %210, %209 : vector<8x128xf32>
    %212 = arith.divf %210, %211 : vector<8x128xf32>
    %213 = vector.extract_strided_slice %204 {offsets = [0, 128], sizes = [8, 128], strides = [1, 1]} : vector<8x384xf32> to vector<8x128xf32>
    %214 = vector.extract_strided_slice %201 {offsets = [0, 128], sizes = [8, 128], strides = [1, 1]} : vector<8x384xf32> to vector<8x128xf32>
    %215 = arith.addf %213, %214 : vector<8x128xf32>
    %216 = arith.negf %215 : vector<8x128xf32>
    %217 = math.exp %216 : vector<8x128xf32>
    %cst_55 = arith.constant 1.000000e+00 : f32
    %218 = vector.broadcast %cst_55 : f32 to vector<8x128xf32>
    %219 = arith.addf %218, %217 : vector<8x128xf32>
    %220 = arith.divf %218, %219 : vector<8x128xf32>
    %221 = vector.extract_strided_slice %204 {offsets = [0, 256], sizes = [8, 128], strides = [1, 1]} : vector<8x384xf32> to vector<8x128xf32>
    %222 = vector.extract_strided_slice %201 {offsets = [0, 256], sizes = [8, 128], strides = [1, 1]} : vector<8x384xf32> to vector<8x128xf32>
    %223 = vector.broadcast %0 : vector<1x128xf32> to vector<8x128xf32>
    %224 = arith.addf %222, %223 : vector<8x128xf32>
    %225 = arith.mulf %212, %224 : vector<8x128xf32>
    %226 = arith.addf %221, %225 : vector<8x128xf32>
    %227 = math.tanh %226 : vector<8x128xf32>
    %cst_56 = arith.constant 1.000000e+00 : f32
    %228 = vector.broadcast %cst_56 : f32 to vector<8x128xf32>
    %229 = arith.subf %228, %220 : vector<8x128xf32>
    %230 = arith.mulf %229, %227 : vector<8x128xf32>
    %231 = arith.mulf %220, %199 : vector<8x128xf32>
    %232 = arith.addf %230, %231 : vector<8x128xf32>
    %c7_i32 = arith.constant 7 : i32
    %c0_57 = arith.constant 0 : index
    %c0_58 = arith.constant 0 : index
    %233 = vector.load %arg8[%c0_57, %c0_58] : memref<1x128xf32, #tpu.memory_space<vmem>>, vector<1x128xf32>
    %c0_59 = arith.constant 0 : index
    %c0_60 = arith.constant 0 : index
    %234 = vector.load %arg10[%c0_59, %c0_60] : memref<1x128xf32, #tpu.memory_space<vmem>>, vector<1x128xf32>
    %235 = tpu.iota {dimensions = array<i32: 1>} : vector<8x128xi32>
    %236 = tpu.iota {dimensions = array<i32: 0>} : vector<8x128xi32>
    %cst_61 = arith.constant 0.000000e+00 : f32
    %237 = vector.broadcast %cst_61 : f32 to vector<8x128xf32>
    %c0_62 = arith.constant 0 : index
    %238 = memref.load %arg2[%c0_62] : memref<16xi32, #tpu.memory_space<smem>>
    %239 = vector.broadcast %238 : i32 to vector<8x128xi32>
    %240 = arith.cmpi eq, %235, %239 : vector<8x128xi32>
    %c0_i32_63 = arith.constant 0 : i32
    %241 = vector.broadcast %c0_i32_63 : i32 to vector<8x128xi32>
    %242 = arith.cmpi eq, %236, %241 : vector<8x128xi32>
    %243 = arith.andi %240, %242 : vector<8x128xi1>
    %244 = arith.extui %243 : vector<8x128xi1> to vector<8x128xi32>
    %245 = arith.sitofp %244 : vector<8x128xi32> to vector<8x128xf32>
    %246 = arith.addf %237, %245 : vector<8x128xf32>
    %c1 = arith.constant 1 : index
    %247 = memref.load %arg2[%c1] : memref<16xi32, #tpu.memory_space<smem>>
    %248 = vector.broadcast %247 : i32 to vector<8x128xi32>
    %249 = arith.cmpi eq, %235, %248 : vector<8x128xi32>
    %c1_i32_64 = arith.constant 1 : i32
    %250 = vector.broadcast %c1_i32_64 : i32 to vector<8x128xi32>
    %251 = arith.cmpi eq, %236, %250 : vector<8x128xi32>
    %252 = arith.andi %249, %251 : vector<8x128xi1>
    %253 = arith.extui %252 : vector<8x128xi1> to vector<8x128xi32>
    %254 = arith.sitofp %253 : vector<8x128xi32> to vector<8x128xf32>
    %255 = arith.addf %246, %254 : vector<8x128xf32>
    %c0_i32_65 = arith.constant 0 : i32
    %c0_66 = arith.constant 0 : index
    %c0_67 = arith.constant 0 : index
    %256 = vector.load %arg6[%c0_66, %c0_67] : memref<128x384xf32, #tpu.memory_space<vmem>>, vector<128x384xf32>
    %cst_68 = arith.constant dense<0.000000e+00> : vector<8x384xf32>
    %257 = tpu.matmul %255, %256, %cst_68 {dimension_numbers = #tpu.dot_dimension_numbers<[1], [0], [0], [1], [0, 0, 1, 1], [], []>} : vector<8x128xf32>, vector<128x384xf32>, vector<8x384xf32> -> vector<8x384xf32>
    %c0_69 = arith.constant 0 : index
    %c0_70 = arith.constant 0 : index
    %258 = vector.load %arg7[%c0_69, %c0_70] : memref<128x384xf32, #tpu.memory_space<vmem>>, vector<128x384xf32>
    %cst_71 = arith.constant dense<0.000000e+00> : vector<8x384xf32>
    %259 = tpu.matmul %232, %258, %cst_71 {dimension_numbers = #tpu.dot_dimension_numbers<[1], [0], [0], [1], [0, 0, 1, 1], [], []>} : vector<8x128xf32>, vector<128x384xf32>, vector<8x384xf32> -> vector<8x384xf32>
    %260 = vector.extract_strided_slice %257 {offsets = [0, 0], sizes = [8, 128], strides = [1, 1]} : vector<8x384xf32> to vector<8x128xf32>
    %261 = vector.extract_strided_slice %259 {offsets = [0, 0], sizes = [8, 128], strides = [1, 1]} : vector<8x384xf32> to vector<8x128xf32>
    %262 = arith.addf %260, %261 : vector<8x128xf32>
    %263 = arith.negf %262 : vector<8x128xf32>
    %264 = math.exp %263 : vector<8x128xf32>
    %cst_72 = arith.constant 1.000000e+00 : f32
    %265 = vector.broadcast %cst_72 : f32 to vector<8x128xf32>
    %266 = arith.addf %265, %264 : vector<8x128xf32>
    %267 = arith.divf %265, %266 : vector<8x128xf32>
    %268 = vector.extract_strided_slice %257 {offsets = [0, 128], sizes = [8, 128], strides = [1, 1]} : vector<8x384xf32> to vector<8x128xf32>
    %269 = vector.extract_strided_slice %259 {offsets = [0, 128], sizes = [8, 128], strides = [1, 1]} : vector<8x384xf32> to vector<8x128xf32>
    %270 = arith.addf %268, %269 : vector<8x128xf32>
    %271 = arith.negf %270 : vector<8x128xf32>
    %272 = math.exp %271 : vector<8x128xf32>
    %cst_73 = arith.constant 1.000000e+00 : f32
    %273 = vector.broadcast %cst_73 : f32 to vector<8x128xf32>
    %274 = arith.addf %273, %272 : vector<8x128xf32>
    %275 = arith.divf %273, %274 : vector<8x128xf32>
    %276 = vector.extract_strided_slice %257 {offsets = [0, 256], sizes = [8, 128], strides = [1, 1]} : vector<8x384xf32> to vector<8x128xf32>
    %277 = vector.extract_strided_slice %259 {offsets = [0, 256], sizes = [8, 128], strides = [1, 1]} : vector<8x384xf32> to vector<8x128xf32>
    %278 = vector.broadcast %233 : vector<1x128xf32> to vector<8x128xf32>
    %279 = arith.addf %277, %278 : vector<8x128xf32>
    %280 = arith.mulf %267, %279 : vector<8x128xf32>
    %281 = arith.addf %276, %280 : vector<8x128xf32>
    %282 = math.tanh %281 : vector<8x128xf32>
    %cst_74 = arith.constant 1.000000e+00 : f32
    %283 = vector.broadcast %cst_74 : f32 to vector<8x128xf32>
    %284 = arith.subf %283, %275 : vector<8x128xf32>
    %285 = arith.mulf %284, %282 : vector<8x128xf32>
    %286 = arith.mulf %275, %232 : vector<8x128xf32>
    %287 = arith.addf %285, %286 : vector<8x128xf32>
    %c0_75 = arith.constant 0 : index
    %c0_76 = arith.constant 0 : index
    %288 = vector.load %arg9[%c0_75, %c0_76] : memref<128x128xf32, #tpu.memory_space<vmem>>, vector<128x128xf32>
    %cst_77 = arith.constant dense<0.000000e+00> : vector<8x128xf32>
    %289 = tpu.matmul %287, %288, %cst_77 {dimension_numbers = #tpu.dot_dimension_numbers<[1], [0], [0], [1], [0, 0, 1, 1], [], []>} : vector<8x128xf32>, vector<128x128xf32>, vector<8x128xf32> -> vector<8x128xf32>
    %290 = vector.broadcast %234 : vector<1x128xf32> to vector<8x128xf32>
    %291 = arith.addf %289, %290 : vector<8x128xf32>
    %292 = vector.shape_cast %291 : vector<8x128xf32> to vector<1x8x128xf32>
    %293 = arith.index_cast %c0_i32_65 : i32 to index
    %c0_78 = arith.constant 0 : index
    %c0_79 = arith.constant 0 : index
    %294 = vector.load %arg11[%293, %c0_78, %c0_79] : memref<7x8x128xf32, #tpu.memory_space<vmem>>, vector<1x8x128xf32>
    tpu.vector_store %arg11[%293, %c0_78, %c0_79], %292 {strides = array<i32>} : memref<7x8x128xf32, #tpu.memory_space<vmem>>, vector<1x8x128xf32>,
    %cst_80 = arith.constant dense<0xFF800000> : vector<8xf32>
    %295 = vector.multi_reduction <maximumf>, %291, %cst_80 [1] : vector<8x128xf32> to vector<8xf32>
    %296 = vector.shape_cast %295 : vector<8xf32> to vector<8x1xf32>
    %297 = vector.broadcast %296 : vector<8x1xf32> to vector<8x128xf32>
    %298 = arith.cmpf oeq, %291, %297 : vector<8x128xf32>
    %c128_i32 = arith.constant 128 : i32
    %299 = vector.broadcast %c128_i32 : i32 to vector<8x128xi32>
    %300 = arith.select %298, %235, %299 : vector<8x128xi1>, vector<8x128xi32>
    %cst_81 = arith.constant dense<2147483647> : vector<8xi32>
    %301 = vector.multi_reduction <minsi>, %300, %cst_81 [1] : vector<8x128xi32> to vector<8xi32>
    %302 = vector.shape_cast %301 : vector<8xi32> to vector<8x1xi32>
    %303 = vector.broadcast %302 : vector<8x1xi32> to vector<8x128xi32>
    %304 = arith.cmpi eq, %235, %303 : vector<8x128xi32>
    %305 = arith.extui %304 : vector<8x128xi1> to vector<8x128xi32>
    %306 = arith.sitofp %305 : vector<8x128xi32> to vector<8x128xf32>
    %307 = arith.index_cast %c0_i32_65 : i32 to index
    %308 = memref.load %arg1[%307] : memref<7xi32, #tpu.memory_space<smem>>
    %c1_i32_82 = arith.constant 1 : i32
    %309 = arith.cmpi eq, %308, %c1_i32_82 : i32
    %310 = arith.extui %309 : i1 to i32
    %311 = arith.sitofp %310 : i32 to f32
    %c1_i32_83 = arith.constant 1 : i32
    %312 = arith.addi %c0_i32_65, %c1_i32_83 : i32
    %cst_84 = arith.constant 0.000000e+00 : f32
    %313 = vector.broadcast %cst_84 : f32 to vector<8x128xf32>
    %c2_i32_85 = arith.constant 2 : i32
    %314 = arith.muli %312, %c2_i32_85 : i32
    %c0_i32_86 = arith.constant 0 : i32
    %315 = arith.addi %314, %c0_i32_86 : i32
    %316 = arith.index_cast %315 : i32 to index
    %317 = memref.load %arg2[%316] : memref<16xi32, #tpu.memory_space<smem>>
    %318 = vector.broadcast %317 : i32 to vector<8x128xi32>
    %319 = arith.cmpi eq, %235, %318 : vector<8x128xi32>
    %c0_i32_87 = arith.constant 0 : i32
    %320 = vector.broadcast %c0_i32_87 : i32 to vector<8x128xi32>
    %321 = arith.cmpi eq, %236, %320 : vector<8x128xi32>
    %322 = arith.andi %319, %321 : vector<8x128xi1>
    %323 = arith.extui %322 : vector<8x128xi1> to vector<8x128xi32>
    %324 = arith.sitofp %323 : vector<8x128xi32> to vector<8x128xf32>
    %325 = arith.addf %313, %324 : vector<8x128xf32>
    %c2_i32_88 = arith.constant 2 : i32
    %326 = arith.muli %312, %c2_i32_88 : i32
    %c1_i32_89 = arith.constant 1 : i32
    %327 = arith.addi %326, %c1_i32_89 : i32
    %328 = arith.index_cast %327 : i32 to index
    %329 = memref.load %arg2[%328] : memref<16xi32, #tpu.memory_space<smem>>
    %330 = vector.broadcast %329 : i32 to vector<8x128xi32>
    %331 = arith.cmpi eq, %235, %330 : vector<8x128xi32>
    %c1_i32_90 = arith.constant 1 : i32
    %332 = vector.broadcast %c1_i32_90 : i32 to vector<8x128xi32>
    %333 = arith.cmpi eq, %236, %332 : vector<8x128xi32>
    %334 = arith.andi %331, %333 : vector<8x128xi1>
    %335 = arith.extui %334 : vector<8x128xi1> to vector<8x128xi32>
    %336 = arith.sitofp %335 : vector<8x128xi32> to vector<8x128xf32>
    %337 = arith.addf %325, %336 : vector<8x128xf32>
    %338 = vector.broadcast %311 : f32 to vector<8x128xf32>
    %339 = arith.mulf %338, %337 : vector<8x128xf32>
    %cst_91 = arith.constant 1.000000e+00 : f32
    %340 = arith.subf %cst_91, %311 : f32
    %341 = vector.broadcast %340 : f32 to vector<8x128xf32>
    %342 = arith.mulf %341, %306 : vector<8x128xf32>
    %343 = arith.addf %339, %342 : vector<8x128xf32>
    %c1_i32_92 = arith.constant 1 : i32
    %c0_93 = arith.constant 0 : index
    %c0_94 = arith.constant 0 : index
    %344 = vector.load %arg6[%c0_93, %c0_94] : memref<128x384xf32, #tpu.memory_space<vmem>>, vector<128x384xf32>
    %cst_95 = arith.constant dense<0.000000e+00> : vector<8x384xf32>
    %345 = tpu.matmul %343, %344, %cst_95 {dimension_numbers = #tpu.dot_dimension_numbers<[1], [0], [0], [1], [0, 0, 1, 1], [], []>} : vector<8x128xf32>, vector<128x384xf32>, vector<8x384xf32> -> vector<8x384xf32>
    %c0_96 = arith.constant 0 : index
    %c0_97 = arith.constant 0 : index
    %346 = vector.load %arg7[%c0_96, %c0_97] : memref<128x384xf32, #tpu.memory_space<vmem>>, vector<128x384xf32>
    %cst_98 = arith.constant dense<0.000000e+00> : vector<8x384xf32>
    %347 = tpu.matmul %287, %346, %cst_98 {dimension_numbers = #tpu.dot_dimension_numbers<[1], [0], [0], [1], [0, 0, 1, 1], [], []>} : vector<8x128xf32>, vector<128x384xf32>, vector<8x384xf32> -> vector<8x384xf32>
    %348 = vector.extract_strided_slice %345 {offsets = [0, 0], sizes = [8, 128], strides = [1, 1]} : vector<8x384xf32> to vector<8x128xf32>
    %349 = vector.extract_strided_slice %347 {offsets = [0, 0], sizes = [8, 128], strides = [1, 1]} : vector<8x384xf32> to vector<8x128xf32>
    %350 = arith.addf %348, %349 : vector<8x128xf32>
    %351 = arith.negf %350 : vector<8x128xf32>
    %352 = math.exp %351 : vector<8x128xf32>
    %cst_99 = arith.constant 1.000000e+00 : f32
    %353 = vector.broadcast %cst_99 : f32 to vector<8x128xf32>
    %354 = arith.addf %353, %352 : vector<8x128xf32>
    %355 = arith.divf %353, %354 : vector<8x128xf32>
    %356 = vector.extract_strided_slice %345 {offsets = [0, 128], sizes = [8, 128], strides = [1, 1]} : vector<8x384xf32> to vector<8x128xf32>
    %357 = vector.extract_strided_slice %347 {offsets = [0, 128], sizes = [8, 128], strides = [1, 1]} : vector<8x384xf32> to vector<8x128xf32>
    %358 = arith.addf %356, %357 : vector<8x128xf32>
    %359 = arith.negf %358 : vector<8x128xf32>
    %360 = math.exp %359 : vector<8x128xf32>
    %cst_100 = arith.constant 1.000000e+00 : f32
    %361 = vector.broadcast %cst_100 : f32 to vector<8x128xf32>
    %362 = arith.addf %361, %360 : vector<8x128xf32>
    %363 = arith.divf %361, %362 : vector<8x128xf32>
    %364 = vector.extract_strided_slice %345 {offsets = [0, 256], sizes = [8, 128], strides = [1, 1]} : vector<8x384xf32> to vector<8x128xf32>
    %365 = vector.extract_strided_slice %347 {offsets = [0, 256], sizes = [8, 128], strides = [1, 1]} : vector<8x384xf32> to vector<8x128xf32>
    %366 = vector.broadcast %233 : vector<1x128xf32> to vector<8x128xf32>
    %367 = arith.addf %365, %366 : vector<8x128xf32>
    %368 = arith.mulf %355, %367 : vector<8x128xf32>
    %369 = arith.addf %364, %368 : vector<8x128xf32>
    %370 = math.tanh %369 : vector<8x128xf32>
    %cst_101 = arith.constant 1.000000e+00 : f32
    %371 = vector.broadcast %cst_101 : f32 to vector<8x128xf32>
    %372 = arith.subf %371, %363 : vector<8x128xf32>
    %373 = arith.mulf %372, %370 : vector<8x128xf32>
    %374 = arith.mulf %363, %287 : vector<8x128xf32>
    %375 = arith.addf %373, %374 : vector<8x128xf32>
    %c0_102 = arith.constant 0 : index
    %c0_103 = arith.constant 0 : index
    %376 = vector.load %arg9[%c0_102, %c0_103] : memref<128x128xf32, #tpu.memory_space<vmem>>, vector<128x128xf32>
    %cst_104 = arith.constant dense<0.000000e+00> : vector<8x128xf32>
    %377 = tpu.matmul %375, %376, %cst_104 {dimension_numbers = #tpu.dot_dimension_numbers<[1], [0], [0], [1], [0, 0, 1, 1], [], []>} : vector<8x128xf32>, vector<128x128xf32>, vector<8x128xf32> -> vector<8x128xf32>
    %378 = vector.broadcast %234 : vector<1x128xf32> to vector<8x128xf32>
    %379 = arith.addf %377, %378 : vector<8x128xf32>
    %380 = vector.shape_cast %379 : vector<8x128xf32> to vector<1x8x128xf32>
    %381 = arith.index_cast %c1_i32_92 : i32 to index
    %c0_105 = arith.constant 0 : index
    %c0_106 = arith.constant 0 : index
    %382 = vector.load %arg11[%381, %c0_105, %c0_106] : memref<7x8x128xf32, #tpu.memory_space<vmem>>, vector<1x8x128xf32>
    tpu.vector_store %arg11[%381, %c0_105, %c0_106], %380 {strides = array<i32>} : memref<7x8x128xf32, #tpu.memory_space<vmem>>, vector<1x8x128xf32>,
    %cst_107 = arith.constant dense<0xFF800000> : vector<8xf32>
    %383 = vector.multi_reduction <maximumf>, %379, %cst_107 [1] : vector<8x128xf32> to vector<8xf32>
    %384 = vector.shape_cast %383 : vector<8xf32> to vector<8x1xf32>
    %385 = vector.broadcast %384 : vector<8x1xf32> to vector<8x128xf32>
    %386 = arith.cmpf oeq, %379, %385 : vector<8x128xf32>
    %c128_i32_108 = arith.constant 128 : i32
    %387 = vector.broadcast %c128_i32_108 : i32 to vector<8x128xi32>
    %388 = arith.select %386, %235, %387 : vector<8x128xi1>, vector<8x128xi32>
    %cst_109 = arith.constant dense<2147483647> : vector<8xi32>
    %389 = vector.multi_reduction <minsi>, %388, %cst_109 [1] : vector<8x128xi32> to vector<8xi32>
    %390 = vector.shape_cast %389 : vector<8xi32> to vector<8x1xi32>
    %391 = vector.broadcast %390 : vector<8x1xi32> to vector<8x128xi32>
    %392 = arith.cmpi eq, %235, %391 : vector<8x128xi32>
    %393 = arith.extui %392 : vector<8x128xi1> to vector<8x128xi32>
    %394 = arith.sitofp %393 : vector<8x128xi32> to vector<8x128xf32>
    %395 = arith.index_cast %c1_i32_92 : i32 to index
    %396 = memref.load %arg1[%395] : memref<7xi32, #tpu.memory_space<smem>>
    %c1_i32_110 = arith.constant 1 : i32
    %397 = arith.cmpi eq, %396, %c1_i32_110 : i32
    %398 = arith.extui %397 : i1 to i32
    %399 = arith.sitofp %398 : i32 to f32
    %c1_i32_111 = arith.constant 1 : i32
    %400 = arith.addi %c1_i32_92, %c1_i32_111 : i32
    %cst_112 = arith.constant 0.000000e+00 : f32
    %401 = vector.broadcast %cst_112 : f32 to vector<8x128xf32>
    %c2_i32_113 = arith.constant 2 : i32
    %402 = arith.muli %400, %c2_i32_113 : i32
    %c0_i32_114 = arith.constant 0 : i32
    %403 = arith.addi %402, %c0_i32_114 : i32
    %404 = arith.index_cast %403 : i32 to index
    %405 = memref.load %arg2[%404] : memref<16xi32, #tpu.memory_space<smem>>
    %406 = vector.broadcast %405 : i32 to vector<8x128xi32>
    %407 = arith.cmpi eq, %235, %406 : vector<8x128xi32>
    %c0_i32_115 = arith.constant 0 : i32
    %408 = vector.broadcast %c0_i32_115 : i32 to vector<8x128xi32>
    %409 = arith.cmpi eq, %236, %408 : vector<8x128xi32>
    %410 = arith.andi %407, %409 : vector<8x128xi1>
    %411 = arith.extui %410 : vector<8x128xi1> to vector<8x128xi32>
    %412 = arith.sitofp %411 : vector<8x128xi32> to vector<8x128xf32>
    %413 = arith.addf %401, %412 : vector<8x128xf32>
    %c2_i32_116 = arith.constant 2 : i32
    %414 = arith.muli %400, %c2_i32_116 : i32
    %c1_i32_117 = arith.constant 1 : i32
    %415 = arith.addi %414, %c1_i32_117 : i32
    %416 = arith.index_cast %415 : i32 to index
    %417 = memref.load %arg2[%416] : memref<16xi32, #tpu.memory_space<smem>>
    %418 = vector.broadcast %417 : i32 to vector<8x128xi32>
    %419 = arith.cmpi eq, %235, %418 : vector<8x128xi32>
    %c1_i32_118 = arith.constant 1 : i32
    %420 = vector.broadcast %c1_i32_118 : i32 to vector<8x128xi32>
    %421 = arith.cmpi eq, %236, %420 : vector<8x128xi32>
    %422 = arith.andi %419, %421 : vector<8x128xi1>
    %423 = arith.extui %422 : vector<8x128xi1> to vector<8x128xi32>
    %424 = arith.sitofp %423 : vector<8x128xi32> to vector<8x128xf32>
    %425 = arith.addf %413, %424 : vector<8x128xf32>
    %426 = vector.broadcast %399 : f32 to vector<8x128xf32>
    %427 = arith.mulf %426, %425 : vector<8x128xf32>
    %cst_119 = arith.constant 1.000000e+00 : f32
    %428 = arith.subf %cst_119, %399 : f32
    %429 = vector.broadcast %428 : f32 to vector<8x128xf32>
    %430 = arith.mulf %429, %394 : vector<8x128xf32>
    %431 = arith.addf %427, %430 : vector<8x128xf32>
    %c2_i32_120 = arith.constant 2 : i32
    %c0_121 = arith.constant 0 : index
    %c0_122 = arith.constant 0 : index
    %432 = vector.load %arg6[%c0_121, %c0_122] : memref<128x384xf32, #tpu.memory_space<vmem>>, vector<128x384xf32>
    %cst_123 = arith.constant dense<0.000000e+00> : vector<8x384xf32>
    %433 = tpu.matmul %431, %432, %cst_123 {dimension_numbers = #tpu.dot_dimension_numbers<[1], [0], [0], [1], [0, 0, 1, 1], [], []>} : vector<8x128xf32>, vector<128x384xf32>, vector<8x384xf32> -> vector<8x384xf32>
    %c0_124 = arith.constant 0 : index
    %c0_125 = arith.constant 0 : index
    %434 = vector.load %arg7[%c0_124, %c0_125] : memref<128x384xf32, #tpu.memory_space<vmem>>, vector<128x384xf32>
    %cst_126 = arith.constant dense<0.000000e+00> : vector<8x384xf32>
    %435 = tpu.matmul %375, %434, %cst_126 {dimension_numbers = #tpu.dot_dimension_numbers<[1], [0], [0], [1], [0, 0, 1, 1], [], []>} : vector<8x128xf32>, vector<128x384xf32>, vector<8x384xf32> -> vector<8x384xf32>
    %436 = vector.extract_strided_slice %433 {offsets = [0, 0], sizes = [8, 128], strides = [1, 1]} : vector<8x384xf32> to vector<8x128xf32>
    %437 = vector.extract_strided_slice %435 {offsets = [0, 0], sizes = [8, 128], strides = [1, 1]} : vector<8x384xf32> to vector<8x128xf32>
    %438 = arith.addf %436, %437 : vector<8x128xf32>
    %439 = arith.negf %438 : vector<8x128xf32>
    %440 = math.exp %439 : vector<8x128xf32>
    %cst_127 = arith.constant 1.000000e+00 : f32
    %441 = vector.broadcast %cst_127 : f32 to vector<8x128xf32>
    %442 = arith.addf %441, %440 : vector<8x128xf32>
    %443 = arith.divf %441, %442 : vector<8x128xf32>
    %444 = vector.extract_strided_slice %433 {offsets = [0, 128], sizes = [8, 128], strides = [1, 1]} : vector<8x384xf32> to vector<8x128xf32>
    %445 = vector.extract_strided_slice %435 {offsets = [0, 128], sizes = [8, 128], strides = [1, 1]} : vector<8x384xf32> to vector<8x128xf32>
    %446 = arith.addf %444, %445 : vector<8x128xf32>
    %447 = arith.negf %446 : vector<8x128xf32>
    %448 = math.exp %447 : vector<8x128xf32>
    %cst_128 = arith.constant 1.000000e+00 : f32
    %449 = vector.broadcast %cst_128 : f32 to vector<8x128xf32>
    %450 = arith.addf %449, %448 : vector<8x128xf32>
    %451 = arith.divf %449, %450 : vector<8x128xf32>
    %452 = vector.extract_strided_slice %433 {offsets = [0, 256], sizes = [8, 128], strides = [1, 1]} : vector<8x384xf32> to vector<8x128xf32>
    %453 = vector.extract_strided_slice %435 {offsets = [0, 256], sizes = [8, 128], strides = [1, 1]} : vector<8x384xf32> to vector<8x128xf32>
    %454 = vector.broadcast %233 : vector<1x128xf32> to vector<8x128xf32>
    %455 = arith.addf %453, %454 : vector<8x128xf32>
    %456 = arith.mulf %443, %455 : vector<8x128xf32>
    %457 = arith.addf %452, %456 : vector<8x128xf32>
    %458 = math.tanh %457 : vector<8x128xf32>
    %cst_129 = arith.constant 1.000000e+00 : f32
    %459 = vector.broadcast %cst_129 : f32 to vector<8x128xf32>
    %460 = arith.subf %459, %451 : vector<8x128xf32>
    %461 = arith.mulf %460, %458 : vector<8x128xf32>
    %462 = arith.mulf %451, %375 : vector<8x128xf32>
    %463 = arith.addf %461, %462 : vector<8x128xf32>
    %c0_130 = arith.constant 0 : index
    %c0_131 = arith.constant 0 : index
    %464 = vector.load %arg9[%c0_130, %c0_131] : memref<128x128xf32, #tpu.memory_space<vmem>>, vector<128x128xf32>
    %cst_132 = arith.constant dense<0.000000e+00> : vector<8x128xf32>
    %465 = tpu.matmul %463, %464, %cst_132 {dimension_numbers = #tpu.dot_dimension_numbers<[1], [0], [0], [1], [0, 0, 1, 1], [], []>} : vector<8x128xf32>, vector<128x128xf32>, vector<8x128xf32> -> vector<8x128xf32>
    %466 = vector.broadcast %234 : vector<1x128xf32> to vector<8x128xf32>
    %467 = arith.addf %465, %466 : vector<8x128xf32>
    %468 = vector.shape_cast %467 : vector<8x128xf32> to vector<1x8x128xf32>
    %469 = arith.index_cast %c2_i32_120 : i32 to index
    %c0_133 = arith.constant 0 : index
    %c0_134 = arith.constant 0 : index
    %470 = vector.load %arg11[%469, %c0_133, %c0_134] : memref<7x8x128xf32, #tpu.memory_space<vmem>>, vector<1x8x128xf32>
    tpu.vector_store %arg11[%469, %c0_133, %c0_134], %468 {strides = array<i32>} : memref<7x8x128xf32, #tpu.memory_space<vmem>>, vector<1x8x128xf32>,
    %cst_135 = arith.constant dense<0xFF800000> : vector<8xf32>
    %471 = vector.multi_reduction <maximumf>, %467, %cst_135 [1] : vector<8x128xf32> to vector<8xf32>
    %472 = vector.shape_cast %471 : vector<8xf32> to vector<8x1xf32>
    %473 = vector.broadcast %472 : vector<8x1xf32> to vector<8x128xf32>
    %474 = arith.cmpf oeq, %467, %473 : vector<8x128xf32>
    %c128_i32_136 = arith.constant 128 : i32
    %475 = vector.broadcast %c128_i32_136 : i32 to vector<8x128xi32>
    %476 = arith.select %474, %235, %475 : vector<8x128xi1>, vector<8x128xi32>
    %cst_137 = arith.constant dense<2147483647> : vector<8xi32>
    %477 = vector.multi_reduction <minsi>, %476, %cst_137 [1] : vector<8x128xi32> to vector<8xi32>
    %478 = vector.shape_cast %477 : vector<8xi32> to vector<8x1xi32>
    %479 = vector.broadcast %478 : vector<8x1xi32> to vector<8x128xi32>
    %480 = arith.cmpi eq, %235, %479 : vector<8x128xi32>
    %481 = arith.extui %480 : vector<8x128xi1> to vector<8x128xi32>
    %482 = arith.sitofp %481 : vector<8x128xi32> to vector<8x128xf32>
    %483 = arith.index_cast %c2_i32_120 : i32 to index
    %484 = memref.load %arg1[%483] : memref<7xi32, #tpu.memory_space<smem>>
    %c1_i32_138 = arith.constant 1 : i32
    %485 = arith.cmpi eq, %484, %c1_i32_138 : i32
    %486 = arith.extui %485 : i1 to i32
    %487 = arith.sitofp %486 : i32 to f32
    %c1_i32_139 = arith.constant 1 : i32
    %488 = arith.addi %c2_i32_120, %c1_i32_139 : i32
    %cst_140 = arith.constant 0.000000e+00 : f32
    %489 = vector.broadcast %cst_140 : f32 to vector<8x128xf32>
    %c2_i32_141 = arith.constant 2 : i32
    %490 = arith.muli %488, %c2_i32_141 : i32
    %c0_i32_142 = arith.constant 0 : i32
    %491 = arith.addi %490, %c0_i32_142 : i32
    %492 = arith.index_cast %491 : i32 to index
    %493 = memref.load %arg2[%492] : memref<16xi32, #tpu.memory_space<smem>>
    %494 = vector.broadcast %493 : i32 to vector<8x128xi32>
    %495 = arith.cmpi eq, %235, %494 : vector<8x128xi32>
    %c0_i32_143 = arith.constant 0 : i32
    %496 = vector.broadcast %c0_i32_143 : i32 to vector<8x128xi32>
    %497 = arith.cmpi eq, %236, %496 : vector<8x128xi32>
    %498 = arith.andi %495, %497 : vector<8x128xi1>
    %499 = arith.extui %498 : vector<8x128xi1> to vector<8x128xi32>
    %500 = arith.sitofp %499 : vector<8x128xi32> to vector<8x128xf32>
    %501 = arith.addf %489, %500 : vector<8x128xf32>
    %c2_i32_144 = arith.constant 2 : i32
    %502 = arith.muli %488, %c2_i32_144 : i32
    %c1_i32_145 = arith.constant 1 : i32
    %503 = arith.addi %502, %c1_i32_145 : i32
    %504 = arith.index_cast %503 : i32 to index
    %505 = memref.load %arg2[%504] : memref<16xi32, #tpu.memory_space<smem>>
    %506 = vector.broadcast %505 : i32 to vector<8x128xi32>
    %507 = arith.cmpi eq, %235, %506 : vector<8x128xi32>
    %c1_i32_146 = arith.constant 1 : i32
    %508 = vector.broadcast %c1_i32_146 : i32 to vector<8x128xi32>
    %509 = arith.cmpi eq, %236, %508 : vector<8x128xi32>
    %510 = arith.andi %507, %509 : vector<8x128xi1>
    %511 = arith.extui %510 : vector<8x128xi1> to vector<8x128xi32>
    %512 = arith.sitofp %511 : vector<8x128xi32> to vector<8x128xf32>
    %513 = arith.addf %501, %512 : vector<8x128xf32>
    %514 = vector.broadcast %487 : f32 to vector<8x128xf32>
    %515 = arith.mulf %514, %513 : vector<8x128xf32>
    %cst_147 = arith.constant 1.000000e+00 : f32
    %516 = arith.subf %cst_147, %487 : f32
    %517 = vector.broadcast %516 : f32 to vector<8x128xf32>
    %518 = arith.mulf %517, %482 : vector<8x128xf32>
    %519 = arith.addf %515, %518 : vector<8x128xf32>
    %c3_i32_148 = arith.constant 3 : i32
    %c0_149 = arith.constant 0 : index
    %c0_150 = arith.constant 0 : index
    %520 = vector.load %arg6[%c0_149, %c0_150] : memref<128x384xf32, #tpu.memory_space<vmem>>, vector<128x384xf32>
    %cst_151 = arith.constant dense<0.000000e+00> : vector<8x384xf32>
    %521 = tpu.matmul %519, %520, %cst_151 {dimension_numbers = #tpu.dot_dimension_numbers<[1], [0], [0], [1], [0, 0, 1, 1], [], []>} : vector<8x128xf32>, vector<128x384xf32>, vector<8x384xf32> -> vector<8x384xf32>
    %c0_152 = arith.constant 0 : index
    %c0_153 = arith.constant 0 : index
    %522 = vector.load %arg7[%c0_152, %c0_153] : memref<128x384xf32, #tpu.memory_space<vmem>>, vector<128x384xf32>
    %cst_154 = arith.constant dense<0.000000e+00> : vector<8x384xf32>
    %523 = tpu.matmul %463, %522, %cst_154 {dimension_numbers = #tpu.dot_dimension_numbers<[1], [0], [0], [1], [0, 0, 1, 1], [], []>} : vector<8x128xf32>, vector<128x384xf32>, vector<8x384xf32> -> vector<8x384xf32>
    %524 = vector.extract_strided_slice %521 {offsets = [0, 0], sizes = [8, 128], strides = [1, 1]} : vector<8x384xf32> to vector<8x128xf32>
    %525 = vector.extract_strided_slice %523 {offsets = [0, 0], sizes = [8, 128], strides = [1, 1]} : vector<8x384xf32> to vector<8x128xf32>
    %526 = arith.addf %524, %525 : vector<8x128xf32>
    %527 = arith.negf %526 : vector<8x128xf32>
    %528 = math.exp %527 : vector<8x128xf32>
    %cst_155 = arith.constant 1.000000e+00 : f32
    %529 = vector.broadcast %cst_155 : f32 to vector<8x128xf32>
    %530 = arith.addf %529, %528 : vector<8x128xf32>
    %531 = arith.divf %529, %530 : vector<8x128xf32>
    %532 = vector.extract_strided_slice %521 {offsets = [0, 128], sizes = [8, 128], strides = [1, 1]} : vector<8x384xf32> to vector<8x128xf32>
    %533 = vector.extract_strided_slice %523 {offsets = [0, 128], sizes = [8, 128], strides = [1, 1]} : vector<8x384xf32> to vector<8x128xf32>
    %534 = arith.addf %532, %533 : vector<8x128xf32>
    %535 = arith.negf %534 : vector<8x128xf32>
    %536 = math.exp %535 : vector<8x128xf32>
    %cst_156 = arith.constant 1.000000e+00 : f32
    %537 = vector.broadcast %cst_156 : f32 to vector<8x128xf32>
    %538 = arith.addf %537, %536 : vector<8x128xf32>
    %539 = arith.divf %537, %538 : vector<8x128xf32>
    %540 = vector.extract_strided_slice %521 {offsets = [0, 256], sizes = [8, 128], strides = [1, 1]} : vector<8x384xf32> to vector<8x128xf32>
    %541 = vector.extract_strided_slice %523 {offsets = [0, 256], sizes = [8, 128], strides = [1, 1]} : vector<8x384xf32> to vector<8x128xf32>
    %542 = vector.broadcast %233 : vector<1x128xf32> to vector<8x128xf32>
    %543 = arith.addf %541, %542 : vector<8x128xf32>
    %544 = arith.mulf %531, %543 : vector<8x128xf32>
    %545 = arith.addf %540, %544 : vector<8x128xf32>
    %546 = math.tanh %545 : vector<8x128xf32>
    %cst_157 = arith.constant 1.000000e+00 : f32
    %547 = vector.broadcast %cst_157 : f32 to vector<8x128xf32>
    %548 = arith.subf %547, %539 : vector<8x128xf32>
    %549 = arith.mulf %548, %546 : vector<8x128xf32>
    %550 = arith.mulf %539, %463 : vector<8x128xf32>
    %551 = arith.addf %549, %550 : vector<8x128xf32>
    %c0_158 = arith.constant 0 : index
    %c0_159 = arith.constant 0 : index
    %552 = vector.load %arg9[%c0_158, %c0_159] : memref<128x128xf32, #tpu.memory_space<vmem>>, vector<128x128xf32>
    %cst_160 = arith.constant dense<0.000000e+00> : vector<8x128xf32>
    %553 = tpu.matmul %551, %552, %cst_160 {dimension_numbers = #tpu.dot_dimension_numbers<[1], [0], [0], [1], [0, 0, 1, 1], [], []>} : vector<8x128xf32>, vector<128x128xf32>, vector<8x128xf32> -> vector<8x128xf32>
    %554 = vector.broadcast %234 : vector<1x128xf32> to vector<8x128xf32>
    %555 = arith.addf %553, %554 : vector<8x128xf32>
    %556 = vector.shape_cast %555 : vector<8x128xf32> to vector<1x8x128xf32>
    %557 = arith.index_cast %c3_i32_148 : i32 to index
    %c0_161 = arith.constant 0 : index
    %c0_162 = arith.constant 0 : index
    %558 = vector.load %arg11[%557, %c0_161, %c0_162] : memref<7x8x128xf32, #tpu.memory_space<vmem>>, vector<1x8x128xf32>
    tpu.vector_store %arg11[%557, %c0_161, %c0_162], %556 {strides = array<i32>} : memref<7x8x128xf32, #tpu.memory_space<vmem>>, vector<1x8x128xf32>,
    %cst_163 = arith.constant dense<0xFF800000> : vector<8xf32>
    %559 = vector.multi_reduction <maximumf>, %555, %cst_163 [1] : vector<8x128xf32> to vector<8xf32>
    %560 = vector.shape_cast %559 : vector<8xf32> to vector<8x1xf32>
    %561 = vector.broadcast %560 : vector<8x1xf32> to vector<8x128xf32>
    %562 = arith.cmpf oeq, %555, %561 : vector<8x128xf32>
    %c128_i32_164 = arith.constant 128 : i32
    %563 = vector.broadcast %c128_i32_164 : i32 to vector<8x128xi32>
    %564 = arith.select %562, %235, %563 : vector<8x128xi1>, vector<8x128xi32>
    %cst_165 = arith.constant dense<2147483647> : vector<8xi32>
    %565 = vector.multi_reduction <minsi>, %564, %cst_165 [1] : vector<8x128xi32> to vector<8xi32>
    %566 = vector.shape_cast %565 : vector<8xi32> to vector<8x1xi32>
    %567 = vector.broadcast %566 : vector<8x1xi32> to vector<8x128xi32>
    %568 = arith.cmpi eq, %235, %567 : vector<8x128xi32>
    %569 = arith.extui %568 : vector<8x128xi1> to vector<8x128xi32>
    %570 = arith.sitofp %569 : vector<8x128xi32> to vector<8x128xf32>
    %571 = arith.index_cast %c3_i32_148 : i32 to index
    %572 = memref.load %arg1[%571] : memref<7xi32, #tpu.memory_space<smem>>
    %c1_i32_166 = arith.constant 1 : i32
    %573 = arith.cmpi eq, %572, %c1_i32_166 : i32
    %574 = arith.extui %573 : i1 to i32
    %575 = arith.sitofp %574 : i32 to f32
    %c1_i32_167 = arith.constant 1 : i32
    %576 = arith.addi %c3_i32_148, %c1_i32_167 : i32
    %cst_168 = arith.constant 0.000000e+00 : f32
    %577 = vector.broadcast %cst_168 : f32 to vector<8x128xf32>
    %c2_i32_169 = arith.constant 2 : i32
    %578 = arith.muli %576, %c2_i32_169 : i32
    %c0_i32_170 = arith.constant 0 : i32
    %579 = arith.addi %578, %c0_i32_170 : i32
    %580 = arith.index_cast %579 : i32 to index
    %581 = memref.load %arg2[%580] : memref<16xi32, #tpu.memory_space<smem>>
    %582 = vector.broadcast %581 : i32 to vector<8x128xi32>
    %583 = arith.cmpi eq, %235, %582 : vector<8x128xi32>
    %c0_i32_171 = arith.constant 0 : i32
    %584 = vector.broadcast %c0_i32_171 : i32 to vector<8x128xi32>
    %585 = arith.cmpi eq, %236, %584 : vector<8x128xi32>
    %586 = arith.andi %583, %585 : vector<8x128xi1>
    %587 = arith.extui %586 : vector<8x128xi1> to vector<8x128xi32>
    %588 = arith.sitofp %587 : vector<8x128xi32> to vector<8x128xf32>
    %589 = arith.addf %577, %588 : vector<8x128xf32>
    %c2_i32_172 = arith.constant 2 : i32
    %590 = arith.muli %576, %c2_i32_172 : i32
    %c1_i32_173 = arith.constant 1 : i32
    %591 = arith.addi %590, %c1_i32_173 : i32
    %592 = arith.index_cast %591 : i32 to index
    %593 = memref.load %arg2[%592] : memref<16xi32, #tpu.memory_space<smem>>
    %594 = vector.broadcast %593 : i32 to vector<8x128xi32>
    %595 = arith.cmpi eq, %235, %594 : vector<8x128xi32>
    %c1_i32_174 = arith.constant 1 : i32
    %596 = vector.broadcast %c1_i32_174 : i32 to vector<8x128xi32>
    %597 = arith.cmpi eq, %236, %596 : vector<8x128xi32>
    %598 = arith.andi %595, %597 : vector<8x128xi1>
    %599 = arith.extui %598 : vector<8x128xi1> to vector<8x128xi32>
    %600 = arith.sitofp %599 : vector<8x128xi32> to vector<8x128xf32>
    %601 = arith.addf %589, %600 : vector<8x128xf32>
    %602 = vector.broadcast %575 : f32 to vector<8x128xf32>
    %603 = arith.mulf %602, %601 : vector<8x128xf32>
    %cst_175 = arith.constant 1.000000e+00 : f32
    %604 = arith.subf %cst_175, %575 : f32
    %605 = vector.broadcast %604 : f32 to vector<8x128xf32>
    %606 = arith.mulf %605, %570 : vector<8x128xf32>
    %607 = arith.addf %603, %606 : vector<8x128xf32>
    %c4_i32_176 = arith.constant 4 : i32
    %c0_177 = arith.constant 0 : index
    %c0_178 = arith.constant 0 : index
    %608 = vector.load %arg6[%c0_177, %c0_178] : memref<128x384xf32, #tpu.memory_space<vmem>>, vector<128x384xf32>
    %cst_179 = arith.constant dense<0.000000e+00> : vector<8x384xf32>
    %609 = tpu.matmul %607, %608, %cst_179 {dimension_numbers = #tpu.dot_dimension_numbers<[1], [0], [0], [1], [0, 0, 1, 1], [], []>} : vector<8x128xf32>, vector<128x384xf32>, vector<8x384xf32> -> vector<8x384xf32>
    %c0_180 = arith.constant 0 : index
    %c0_181 = arith.constant 0 : index
    %610 = vector.load %arg7[%c0_180, %c0_181] : memref<128x384xf32, #tpu.memory_space<vmem>>, vector<128x384xf32>
    %cst_182 = arith.constant dense<0.000000e+00> : vector<8x384xf32>
    %611 = tpu.matmul %551, %610, %cst_182 {dimension_numbers = #tpu.dot_dimension_numbers<[1], [0], [0], [1], [0, 0, 1, 1], [], []>} : vector<8x128xf32>, vector<128x384xf32>, vector<8x384xf32> -> vector<8x384xf32>
    %612 = vector.extract_strided_slice %609 {offsets = [0, 0], sizes = [8, 128], strides = [1, 1]} : vector<8x384xf32> to vector<8x128xf32>
    %613 = vector.extract_strided_slice %611 {offsets = [0, 0], sizes = [8, 128], strides = [1, 1]} : vector<8x384xf32> to vector<8x128xf32>
    %614 = arith.addf %612, %613 : vector<8x128xf32>
    %615 = arith.negf %614 : vector<8x128xf32>
    %616 = math.exp %615 : vector<8x128xf32>
    %cst_183 = arith.constant 1.000000e+00 : f32
    %617 = vector.broadcast %cst_183 : f32 to vector<8x128xf32>
    %618 = arith.addf %617, %616 : vector<8x128xf32>
    %619 = arith.divf %617, %618 : vector<8x128xf32>
    %620 = vector.extract_strided_slice %609 {offsets = [0, 128], sizes = [8, 128], strides = [1, 1]} : vector<8x384xf32> to vector<8x128xf32>
    %621 = vector.extract_strided_slice %611 {offsets = [0, 128], sizes = [8, 128], strides = [1, 1]} : vector<8x384xf32> to vector<8x128xf32>
    %622 = arith.addf %620, %621 : vector<8x128xf32>
    %623 = arith.negf %622 : vector<8x128xf32>
    %624 = math.exp %623 : vector<8x128xf32>
    %cst_184 = arith.constant 1.000000e+00 : f32
    %625 = vector.broadcast %cst_184 : f32 to vector<8x128xf32>
    %626 = arith.addf %625, %624 : vector<8x128xf32>
    %627 = arith.divf %625, %626 : vector<8x128xf32>
    %628 = vector.extract_strided_slice %609 {offsets = [0, 256], sizes = [8, 128], strides = [1, 1]} : vector<8x384xf32> to vector<8x128xf32>
    %629 = vector.extract_strided_slice %611 {offsets = [0, 256], sizes = [8, 128], strides = [1, 1]} : vector<8x384xf32> to vector<8x128xf32>
    %630 = vector.broadcast %233 : vector<1x128xf32> to vector<8x128xf32>
    %631 = arith.addf %629, %630 : vector<8x128xf32>
    %632 = arith.mulf %619, %631 : vector<8x128xf32>
    %633 = arith.addf %628, %632 : vector<8x128xf32>
    %634 = math.tanh %633 : vector<8x128xf32>
    %cst_185 = arith.constant 1.000000e+00 : f32
    %635 = vector.broadcast %cst_185 : f32 to vector<8x128xf32>
    %636 = arith.subf %635, %627 : vector<8x128xf32>
    %637 = arith.mulf %636, %634 : vector<8x128xf32>
    %638 = arith.mulf %627, %551 : vector<8x128xf32>
    %639 = arith.addf %637, %638 : vector<8x128xf32>
    %c0_186 = arith.constant 0 : index
    %c0_187 = arith.constant 0 : index
    %640 = vector.load %arg9[%c0_186, %c0_187] : memref<128x128xf32, #tpu.memory_space<vmem>>, vector<128x128xf32>
    %cst_188 = arith.constant dense<0.000000e+00> : vector<8x128xf32>
    %641 = tpu.matmul %639, %640, %cst_188 {dimension_numbers = #tpu.dot_dimension_numbers<[1], [0], [0], [1], [0, 0, 1, 1], [], []>} : vector<8x128xf32>, vector<128x128xf32>, vector<8x128xf32> -> vector<8x128xf32>
    %642 = vector.broadcast %234 : vector<1x128xf32> to vector<8x128xf32>
    %643 = arith.addf %641, %642 : vector<8x128xf32>
    %644 = vector.shape_cast %643 : vector<8x128xf32> to vector<1x8x128xf32>
    %645 = arith.index_cast %c4_i32_176 : i32 to index
    %c0_189 = arith.constant 0 : index
    %c0_190 = arith.constant 0 : index
    %646 = vector.load %arg11[%645, %c0_189, %c0_190] : memref<7x8x128xf32, #tpu.memory_space<vmem>>, vector<1x8x128xf32>
    tpu.vector_store %arg11[%645, %c0_189, %c0_190], %644 {strides = array<i32>} : memref<7x8x128xf32, #tpu.memory_space<vmem>>, vector<1x8x128xf32>,
    %cst_191 = arith.constant dense<0xFF800000> : vector<8xf32>
    %647 = vector.multi_reduction <maximumf>, %643, %cst_191 [1] : vector<8x128xf32> to vector<8xf32>
    %648 = vector.shape_cast %647 : vector<8xf32> to vector<8x1xf32>
    %649 = vector.broadcast %648 : vector<8x1xf32> to vector<8x128xf32>
    %650 = arith.cmpf oeq, %643, %649 : vector<8x128xf32>
    %c128_i32_192 = arith.constant 128 : i32
    %651 = vector.broadcast %c128_i32_192 : i32 to vector<8x128xi32>
    %652 = arith.select %650, %235, %651 : vector<8x128xi1>, vector<8x128xi32>
    %cst_193 = arith.constant dense<2147483647> : vector<8xi32>
    %653 = vector.multi_reduction <minsi>, %652, %cst_193 [1] : vector<8x128xi32> to vector<8xi32>
    %654 = vector.shape_cast %653 : vector<8xi32> to vector<8x1xi32>
    %655 = vector.broadcast %654 : vector<8x1xi32> to vector<8x128xi32>
    %656 = arith.cmpi eq, %235, %655 : vector<8x128xi32>
    %657 = arith.extui %656 : vector<8x128xi1> to vector<8x128xi32>
    %658 = arith.sitofp %657 : vector<8x128xi32> to vector<8x128xf32>
    %659 = arith.index_cast %c4_i32_176 : i32 to index
    %660 = memref.load %arg1[%659] : memref<7xi32, #tpu.memory_space<smem>>
    %c1_i32_194 = arith.constant 1 : i32
    %661 = arith.cmpi eq, %660, %c1_i32_194 : i32
    %662 = arith.extui %661 : i1 to i32
    %663 = arith.sitofp %662 : i32 to f32
    %c1_i32_195 = arith.constant 1 : i32
    %664 = arith.addi %c4_i32_176, %c1_i32_195 : i32
    %cst_196 = arith.constant 0.000000e+00 : f32
    %665 = vector.broadcast %cst_196 : f32 to vector<8x128xf32>
    %c2_i32_197 = arith.constant 2 : i32
    %666 = arith.muli %664, %c2_i32_197 : i32
    %c0_i32_198 = arith.constant 0 : i32
    %667 = arith.addi %666, %c0_i32_198 : i32
    %668 = arith.index_cast %667 : i32 to index
    %669 = memref.load %arg2[%668] : memref<16xi32, #tpu.memory_space<smem>>
    %670 = vector.broadcast %669 : i32 to vector<8x128xi32>
    %671 = arith.cmpi eq, %235, %670 : vector<8x128xi32>
    %c0_i32_199 = arith.constant 0 : i32
    %672 = vector.broadcast %c0_i32_199 : i32 to vector<8x128xi32>
    %673 = arith.cmpi eq, %236, %672 : vector<8x128xi32>
    %674 = arith.andi %671, %673 : vector<8x128xi1>
    %675 = arith.extui %674 : vector<8x128xi1> to vector<8x128xi32>
    %676 = arith.sitofp %675 : vector<8x128xi32> to vector<8x128xf32>
    %677 = arith.addf %665, %676 : vector<8x128xf32>
    %c2_i32_200 = arith.constant 2 : i32
    %678 = arith.muli %664, %c2_i32_200 : i32
    %c1_i32_201 = arith.constant 1 : i32
    %679 = arith.addi %678, %c1_i32_201 : i32
    %680 = arith.index_cast %679 : i32 to index
    %681 = memref.load %arg2[%680] : memref<16xi32, #tpu.memory_space<smem>>
    %682 = vector.broadcast %681 : i32 to vector<8x128xi32>
    %683 = arith.cmpi eq, %235, %682 : vector<8x128xi32>
    %c1_i32_202 = arith.constant 1 : i32
    %684 = vector.broadcast %c1_i32_202 : i32 to vector<8x128xi32>
    %685 = arith.cmpi eq, %236, %684 : vector<8x128xi32>
    %686 = arith.andi %683, %685 : vector<8x128xi1>
    %687 = arith.extui %686 : vector<8x128xi1> to vector<8x128xi32>
    %688 = arith.sitofp %687 : vector<8x128xi32> to vector<8x128xf32>
    %689 = arith.addf %677, %688 : vector<8x128xf32>
    %690 = vector.broadcast %663 : f32 to vector<8x128xf32>
    %691 = arith.mulf %690, %689 : vector<8x128xf32>
    %cst_203 = arith.constant 1.000000e+00 : f32
    %692 = arith.subf %cst_203, %663 : f32
    %693 = vector.broadcast %692 : f32 to vector<8x128xf32>
    %694 = arith.mulf %693, %658 : vector<8x128xf32>
    %695 = arith.addf %691, %694 : vector<8x128xf32>
    %c5_i32_204 = arith.constant 5 : i32
    %c0_205 = arith.constant 0 : index
    %c0_206 = arith.constant 0 : index
    %696 = vector.load %arg6[%c0_205, %c0_206] : memref<128x384xf32, #tpu.memory_space<vmem>>, vector<128x384xf32>
    %cst_207 = arith.constant dense<0.000000e+00> : vector<8x384xf32>
    %697 = tpu.matmul %695, %696, %cst_207 {dimension_numbers = #tpu.dot_dimension_numbers<[1], [0], [0], [1], [0, 0, 1, 1], [], []>} : vector<8x128xf32>, vector<128x384xf32>, vector<8x384xf32> -> vector<8x384xf32>
    %c0_208 = arith.constant 0 : index
    %c0_209 = arith.constant 0 : index
    %698 = vector.load %arg7[%c0_208, %c0_209] : memref<128x384xf32, #tpu.memory_space<vmem>>, vector<128x384xf32>
    %cst_210 = arith.constant dense<0.000000e+00> : vector<8x384xf32>
    %699 = tpu.matmul %639, %698, %cst_210 {dimension_numbers = #tpu.dot_dimension_numbers<[1], [0], [0], [1], [0, 0, 1, 1], [], []>} : vector<8x128xf32>, vector<128x384xf32>, vector<8x384xf32> -> vector<8x384xf32>
    %700 = vector.extract_strided_slice %697 {offsets = [0, 0], sizes = [8, 128], strides = [1, 1]} : vector<8x384xf32> to vector<8x128xf32>
    %701 = vector.extract_strided_slice %699 {offsets = [0, 0], sizes = [8, 128], strides = [1, 1]} : vector<8x384xf32> to vector<8x128xf32>
    %702 = arith.addf %700, %701 : vector<8x128xf32>
    %703 = arith.negf %702 : vector<8x128xf32>
    %704 = math.exp %703 : vector<8x128xf32>
    %cst_211 = arith.constant 1.000000e+00 : f32
    %705 = vector.broadcast %cst_211 : f32 to vector<8x128xf32>
    %706 = arith.addf %705, %704 : vector<8x128xf32>
    %707 = arith.divf %705, %706 : vector<8x128xf32>
    %708 = vector.extract_strided_slice %697 {offsets = [0, 128], sizes = [8, 128], strides = [1, 1]} : vector<8x384xf32> to vector<8x128xf32>
    %709 = vector.extract_strided_slice %699 {offsets = [0, 128], sizes = [8, 128], strides = [1, 1]} : vector<8x384xf32> to vector<8x128xf32>
    %710 = arith.addf %708, %709 : vector<8x128xf32>
    %711 = arith.negf %710 : vector<8x128xf32>
    %712 = math.exp %711 : vector<8x128xf32>
    %cst_212 = arith.constant 1.000000e+00 : f32
    %713 = vector.broadcast %cst_212 : f32 to vector<8x128xf32>
    %714 = arith.addf %713, %712 : vector<8x128xf32>
    %715 = arith.divf %713, %714 : vector<8x128xf32>
    %716 = vector.extract_strided_slice %697 {offsets = [0, 256], sizes = [8, 128], strides = [1, 1]} : vector<8x384xf32> to vector<8x128xf32>
    %717 = vector.extract_strided_slice %699 {offsets = [0, 256], sizes = [8, 128], strides = [1, 1]} : vector<8x384xf32> to vector<8x128xf32>
    %718 = vector.broadcast %233 : vector<1x128xf32> to vector<8x128xf32>
    %719 = arith.addf %717, %718 : vector<8x128xf32>
    %720 = arith.mulf %707, %719 : vector<8x128xf32>
    %721 = arith.addf %716, %720 : vector<8x128xf32>
    %722 = math.tanh %721 : vector<8x128xf32>
    %cst_213 = arith.constant 1.000000e+00 : f32
    %723 = vector.broadcast %cst_213 : f32 to vector<8x128xf32>
    %724 = arith.subf %723, %715 : vector<8x128xf32>
    %725 = arith.mulf %724, %722 : vector<8x128xf32>
    %726 = arith.mulf %715, %639 : vector<8x128xf32>
    %727 = arith.addf %725, %726 : vector<8x128xf32>
    %c0_214 = arith.constant 0 : index
    %c0_215 = arith.constant 0 : index
    %728 = vector.load %arg9[%c0_214, %c0_215] : memref<128x128xf32, #tpu.memory_space<vmem>>, vector<128x128xf32>
    %cst_216 = arith.constant dense<0.000000e+00> : vector<8x128xf32>
    %729 = tpu.matmul %727, %728, %cst_216 {dimension_numbers = #tpu.dot_dimension_numbers<[1], [0], [0], [1], [0, 0, 1, 1], [], []>} : vector<8x128xf32>, vector<128x128xf32>, vector<8x128xf32> -> vector<8x128xf32>
    %730 = vector.broadcast %234 : vector<1x128xf32> to vector<8x128xf32>
    %731 = arith.addf %729, %730 : vector<8x128xf32>
    %732 = vector.shape_cast %731 : vector<8x128xf32> to vector<1x8x128xf32>
    %733 = arith.index_cast %c5_i32_204 : i32 to index
    %c0_217 = arith.constant 0 : index
    %c0_218 = arith.constant 0 : index
    %734 = vector.load %arg11[%733, %c0_217, %c0_218] : memref<7x8x128xf32, #tpu.memory_space<vmem>>, vector<1x8x128xf32>
    tpu.vector_store %arg11[%733, %c0_217, %c0_218], %732 {strides = array<i32>} : memref<7x8x128xf32, #tpu.memory_space<vmem>>, vector<1x8x128xf32>,
    %cst_219 = arith.constant dense<0xFF800000> : vector<8xf32>
    %735 = vector.multi_reduction <maximumf>, %731, %cst_219 [1] : vector<8x128xf32> to vector<8xf32>
    %736 = vector.shape_cast %735 : vector<8xf32> to vector<8x1xf32>
    %737 = vector.broadcast %736 : vector<8x1xf32> to vector<8x128xf32>
    %738 = arith.cmpf oeq, %731, %737 : vector<8x128xf32>
    %c128_i32_220 = arith.constant 128 : i32
    %739 = vector.broadcast %c128_i32_220 : i32 to vector<8x128xi32>
    %740 = arith.select %738, %235, %739 : vector<8x128xi1>, vector<8x128xi32>
    %cst_221 = arith.constant dense<2147483647> : vector<8xi32>
    %741 = vector.multi_reduction <minsi>, %740, %cst_221 [1] : vector<8x128xi32> to vector<8xi32>
    %742 = vector.shape_cast %741 : vector<8xi32> to vector<8x1xi32>
    %743 = vector.broadcast %742 : vector<8x1xi32> to vector<8x128xi32>
    %744 = arith.cmpi eq, %235, %743 : vector<8x128xi32>
    %745 = arith.extui %744 : vector<8x128xi1> to vector<8x128xi32>
    %746 = arith.sitofp %745 : vector<8x128xi32> to vector<8x128xf32>
    %747 = arith.index_cast %c5_i32_204 : i32 to index
    %748 = memref.load %arg1[%747] : memref<7xi32, #tpu.memory_space<smem>>
    %c1_i32_222 = arith.constant 1 : i32
    %749 = arith.cmpi eq, %748, %c1_i32_222 : i32
    %750 = arith.extui %749 : i1 to i32
    %751 = arith.sitofp %750 : i32 to f32
    %c1_i32_223 = arith.constant 1 : i32
    %752 = arith.addi %c5_i32_204, %c1_i32_223 : i32
    %cst_224 = arith.constant 0.000000e+00 : f32
    %753 = vector.broadcast %cst_224 : f32 to vector<8x128xf32>
    %c2_i32_225 = arith.constant 2 : i32
    %754 = arith.muli %752, %c2_i32_225 : i32
    %c0_i32_226 = arith.constant 0 : i32
    %755 = arith.addi %754, %c0_i32_226 : i32
    %756 = arith.index_cast %755 : i32 to index
    %757 = memref.load %arg2[%756] : memref<16xi32, #tpu.memory_space<smem>>
    %758 = vector.broadcast %757 : i32 to vector<8x128xi32>
    %759 = arith.cmpi eq, %235, %758 : vector<8x128xi32>
    %c0_i32_227 = arith.constant 0 : i32
    %760 = vector.broadcast %c0_i32_227 : i32 to vector<8x128xi32>
    %761 = arith.cmpi eq, %236, %760 : vector<8x128xi32>
    %762 = arith.andi %759, %761 : vector<8x128xi1>
    %763 = arith.extui %762 : vector<8x128xi1> to vector<8x128xi32>
    %764 = arith.sitofp %763 : vector<8x128xi32> to vector<8x128xf32>
    %765 = arith.addf %753, %764 : vector<8x128xf32>
    %c2_i32_228 = arith.constant 2 : i32
    %766 = arith.muli %752, %c2_i32_228 : i32
    %c1_i32_229 = arith.constant 1 : i32
    %767 = arith.addi %766, %c1_i32_229 : i32
    %768 = arith.index_cast %767 : i32 to index
    %769 = memref.load %arg2[%768] : memref<16xi32, #tpu.memory_space<smem>>
    %770 = vector.broadcast %769 : i32 to vector<8x128xi32>
    %771 = arith.cmpi eq, %235, %770 : vector<8x128xi32>
    %c1_i32_230 = arith.constant 1 : i32
    %772 = vector.broadcast %c1_i32_230 : i32 to vector<8x128xi32>
    %773 = arith.cmpi eq, %236, %772 : vector<8x128xi32>
    %774 = arith.andi %771, %773 : vector<8x128xi1>
    %775 = arith.extui %774 : vector<8x128xi1> to vector<8x128xi32>
    %776 = arith.sitofp %775 : vector<8x128xi32> to vector<8x128xf32>
    %777 = arith.addf %765, %776 : vector<8x128xf32>
    %778 = vector.broadcast %751 : f32 to vector<8x128xf32>
    %779 = arith.mulf %778, %777 : vector<8x128xf32>
    %cst_231 = arith.constant 1.000000e+00 : f32
    %780 = arith.subf %cst_231, %751 : f32
    %781 = vector.broadcast %780 : f32 to vector<8x128xf32>
    %782 = arith.mulf %781, %746 : vector<8x128xf32>
    %783 = arith.addf %779, %782 : vector<8x128xf32>
    %c6_i32_232 = arith.constant 6 : i32
    %c0_233 = arith.constant 0 : index
    %c0_234 = arith.constant 0 : index
    %784 = vector.load %arg6[%c0_233, %c0_234] : memref<128x384xf32, #tpu.memory_space<vmem>>, vector<128x384xf32>
    %cst_235 = arith.constant dense<0.000000e+00> : vector<8x384xf32>
    %785 = tpu.matmul %783, %784, %cst_235 {dimension_numbers = #tpu.dot_dimension_numbers<[1], [0], [0], [1], [0, 0, 1, 1], [], []>} : vector<8x128xf32>, vector<128x384xf32>, vector<8x384xf32> -> vector<8x384xf32>
    %c0_236 = arith.constant 0 : index
    %c0_237 = arith.constant 0 : index
    %786 = vector.load %arg7[%c0_236, %c0_237] : memref<128x384xf32, #tpu.memory_space<vmem>>, vector<128x384xf32>
    %cst_238 = arith.constant dense<0.000000e+00> : vector<8x384xf32>
    %787 = tpu.matmul %727, %786, %cst_238 {dimension_numbers = #tpu.dot_dimension_numbers<[1], [0], [0], [1], [0, 0, 1, 1], [], []>} : vector<8x128xf32>, vector<128x384xf32>, vector<8x384xf32> -> vector<8x384xf32>
    %788 = vector.extract_strided_slice %785 {offsets = [0, 0], sizes = [8, 128], strides = [1, 1]} : vector<8x384xf32> to vector<8x128xf32>
    %789 = vector.extract_strided_slice %787 {offsets = [0, 0], sizes = [8, 128], strides = [1, 1]} : vector<8x384xf32> to vector<8x128xf32>
    %790 = arith.addf %788, %789 : vector<8x128xf32>
    %791 = arith.negf %790 : vector<8x128xf32>
    %792 = math.exp %791 : vector<8x128xf32>
    %cst_239 = arith.constant 1.000000e+00 : f32
    %793 = vector.broadcast %cst_239 : f32 to vector<8x128xf32>
    %794 = arith.addf %793, %792 : vector<8x128xf32>
    %795 = arith.divf %793, %794 : vector<8x128xf32>
    %796 = vector.extract_strided_slice %785 {offsets = [0, 128], sizes = [8, 128], strides = [1, 1]} : vector<8x384xf32> to vector<8x128xf32>
    %797 = vector.extract_strided_slice %787 {offsets = [0, 128], sizes = [8, 128], strides = [1, 1]} : vector<8x384xf32> to vector<8x128xf32>
    %798 = arith.addf %796, %797 : vector<8x128xf32>
    %799 = arith.negf %798 : vector<8x128xf32>
    %800 = math.exp %799 : vector<8x128xf32>
    %cst_240 = arith.constant 1.000000e+00 : f32
    %801 = vector.broadcast %cst_240 : f32 to vector<8x128xf32>
    %802 = arith.addf %801, %800 : vector<8x128xf32>
    %803 = arith.divf %801, %802 : vector<8x128xf32>
    %804 = vector.extract_strided_slice %785 {offsets = [0, 256], sizes = [8, 128], strides = [1, 1]} : vector<8x384xf32> to vector<8x128xf32>
    %805 = vector.extract_strided_slice %787 {offsets = [0, 256], sizes = [8, 128], strides = [1, 1]} : vector<8x384xf32> to vector<8x128xf32>
    %806 = vector.broadcast %233 : vector<1x128xf32> to vector<8x128xf32>
    %807 = arith.addf %805, %806 : vector<8x128xf32>
    %808 = arith.mulf %795, %807 : vector<8x128xf32>
    %809 = arith.addf %804, %808 : vector<8x128xf32>
    %810 = math.tanh %809 : vector<8x128xf32>
    %cst_241 = arith.constant 1.000000e+00 : f32
    %811 = vector.broadcast %cst_241 : f32 to vector<8x128xf32>
    %812 = arith.subf %811, %803 : vector<8x128xf32>
    %813 = arith.mulf %812, %810 : vector<8x128xf32>
    %814 = arith.mulf %803, %727 : vector<8x128xf32>
    %815 = arith.addf %813, %814 : vector<8x128xf32>
    %c0_242 = arith.constant 0 : index
    %c0_243 = arith.constant 0 : index
    %816 = vector.load %arg9[%c0_242, %c0_243] : memref<128x128xf32, #tpu.memory_space<vmem>>, vector<128x128xf32>
    %cst_244 = arith.constant dense<0.000000e+00> : vector<8x128xf32>
    %817 = tpu.matmul %815, %816, %cst_244 {dimension_numbers = #tpu.dot_dimension_numbers<[1], [0], [0], [1], [0, 0, 1, 1], [], []>} : vector<8x128xf32>, vector<128x128xf32>, vector<8x128xf32> -> vector<8x128xf32>
    %818 = vector.broadcast %234 : vector<1x128xf32> to vector<8x128xf32>
    %819 = arith.addf %817, %818 : vector<8x128xf32>
    %820 = vector.shape_cast %819 : vector<8x128xf32> to vector<1x8x128xf32>
    %c6 = arith.constant 6 : index
    %c0_245 = arith.constant 0 : index
    %c0_246 = arith.constant 0 : index
    %821 = vector.load %arg11[%c6, %c0_245, %c0_246] : memref<7x8x128xf32, #tpu.memory_space<vmem>>, vector<1x8x128xf32>
    tpu.vector_store %arg11[%c6, %c0_245, %c0_246], %820 {strides = array<i32>} : memref<7x8x128xf32, #tpu.memory_space<vmem>>, vector<1x8x128xf32>,
    return
  }
  func.func @transform_0(%arg0: i32, %arg1: memref<7xi32, #tpu.memory_space<smem>>, %arg2: memref<16xi32, #tpu.memory_space<smem>>) -> (i32, i32, i32) {
    %c0_i32 = arith.constant 0 : i32
    %c0_i32_0 = arith.constant 0 : i32
    %c0_i32_1 = arith.constant 0 : i32
    %c0_i32_2 = arith.constant 0 : i32
    return %c0_i32, %c0_i32_0, %c0_i32_1 : i32, i32, i32
  }
  func.func @transform_1(%arg0: i32, %arg1: memref<7xi32, #tpu.memory_space<smem>>, %arg2: memref<16xi32, #tpu.memory_space<smem>>) -> (i32, i32) {
    %c0_i32 = arith.constant 0 : i32
    %c0_i32_0 = arith.constant 0 : i32
    %c0_i32_1 = arith.constant 0 : i32
    return %c0_i32, %c0_i32_0 : i32, i32
  }
  func.func @transform_2(%arg0: i32, %arg1: memref<7xi32, #tpu.memory_space<smem>>, %arg2: memref<16xi32, #tpu.memory_space<smem>>) -> (i32, i32) {
    %c0_i32 = arith.constant 0 : i32
    %c0_i32_0 = arith.constant 0 : i32
    %c0_i32_1 = arith.constant 0 : i32
    return %c0_i32, %c0_i32_0 : i32, i32
  }
  func.func @transform_3(%arg0: i32, %arg1: memref<7xi32, #tpu.memory_space<smem>>, %arg2: memref<16xi32, #tpu.memory_space<smem>>) -> (i32, i32) {
    %c0_i32 = arith.constant 0 : i32
    %c0_i32_0 = arith.constant 0 : i32
    %c0_i32_1 = arith.constant 0 : i32
    return %c0_i32, %c0_i32_0 : i32, i32
  }
  func.func @transform_4(%arg0: i32, %arg1: memref<7xi32, #tpu.memory_space<smem>>, %arg2: memref<16xi32, #tpu.memory_space<smem>>) -> (i32, i32) {
    %c0_i32 = arith.constant 0 : i32
    %c0_i32_0 = arith.constant 0 : i32
    %c0_i32_1 = arith.constant 0 : i32
    return %c0_i32, %c0_i32_0 : i32, i32
  }
  func.func @transform_5(%arg0: i32, %arg1: memref<7xi32, #tpu.memory_space<smem>>, %arg2: memref<16xi32, #tpu.memory_space<smem>>) -> (i32, i32) {
    %c0_i32 = arith.constant 0 : i32
    %c0_i32_0 = arith.constant 0 : i32
    %c0_i32_1 = arith.constant 0 : i32
    return %c0_i32, %c0_i32_0 : i32, i32
  }
  func.func @transform_6(%arg0: i32, %arg1: memref<7xi32, #tpu.memory_space<smem>>, %arg2: memref<16xi32, #tpu.memory_space<smem>>) -> (i32, i32) {
    %c0_i32 = arith.constant 0 : i32
    %c0_i32_0 = arith.constant 0 : i32
    %c0_i32_1 = arith.constant 0 : i32
    return %c0_i32, %c0_i32_0 : i32, i32
  }
  func.func @transform_7(%arg0: i32, %arg1: memref<7xi32, #tpu.memory_space<smem>>, %arg2: memref<16xi32, #tpu.memory_space<smem>>) -> (i32, i32) {
    %c0_i32 = arith.constant 0 : i32
    %c0_i32_0 = arith.constant 0 : i32
    %c0_i32_1 = arith.constant 0 : i32
    return %c0_i32, %c0_i32_0 : i32, i32
  }
  func.func @transform_8(%arg0: i32, %arg1: memref<7xi32, #tpu.memory_space<smem>>, %arg2: memref<16xi32, #tpu.memory_space<smem>>) -> (i32, i32, i32) {
    %c0_i32 = arith.constant 0 : i32
    %c0_i32_0 = arith.constant 0 : i32
    %c0_i32_1 = arith.constant 0 : i32
    %c0_i32_2 = arith.constant 0 : i32
    return %c0_i32, %c0_i32_0, %c0_i32_1 : i32, i32, i32
  }
}

</mosaic_0001>

<bundles_post_ra>
// kernel: tpu_custom_call.1
= control target key start
LH: loop header
LB: loop body
LE: loop exit
PB: predicated region body
PF: predicated region fallthrough
CT: control target
= control target key end

     0   :  { %s3808_s19 = smov [#allocation3]   ;;  %s3809_s20 = smov [#allocation4]   ;;  %s5488_s0 = inlined_call_operand.hbm [shape: s32[7], index: 0, kind: input, shape index: {}]   ;;  %s5489_s2 = inlined_call_operand.hbm [shape: f32[7,8,384], index: 2, kind: input, shape index: {}]   ;;  %s5490_s3 = inlined_call_operand.hbm [shape: f32[128,384], index: 3, kind: input, shape index: {}]   ;;  %s5491_s4 = inlined_call_operand.vmem [shape: f32[1,128], index: 4, kind: input, shape index: {}]   ;;  %s5492_s5 = inlined_call_operand.hbm [shape: f32[128,384], index: 5, kind: input, shape index: {}]   ;;  %s5493_s6 = inlined_call_operand.hbm [shape: f32[128,384], index: 6, kind: input, shape index: {}]   ;;  %s5494_s7 = inlined_call_operand.vmem [shape: f32[1,128], index: 7, kind: input, shape index: {}]   ;;  %s5495_s8 = inlined_call_operand.hbm [shape: f32[128,128], index: 8, kind: input, shape index: {}]   ;;  %s5496_s9 = inlined_call_operand.vmem [shape: f32[1,128], index: 9, kind: input, shape index: {}]   ;;  %s5497_s10 = inlined_call_operand.hbm [shape: f32[7,8,128], index: 10, kind: output, shape index: {}]   ;;  %s5498_s1 = inlined_call_operand.hbm [shape: s32[16], index: 1, kind: input, shape index: {}]  }
   0x1   :  { %s16_s15 = sshll.u32 %s5488_s0, 4  ;;  %s21_s18 = sshll.u32 %s5498_s1, 4  ;;  %s17_s15 = int_to_ptr.hbm [resolvable:$true] %s16_s15  ;;  %s22_s18 = int_to_ptr.hbm [resolvable:$true] %s21_s18 }
   0x2   :  { %19 = dma.hbm_to_smem %s17_s15, 16, %s3808_s19, [#allocation2] }
   0x3   :  { %24 = dma.hbm_to_smem %s22_s18, 16, %s3809_s20, [#allocation2] }
   0x4   :  { %3798 = dma.done.wait [#allocation2], 32 }
   0x5   :  { %3799 = vsyncadd [#allocation2], 4294967264 }
   0x6   :  { %27 = sfence }
   0x7   :  { %28 = vsyncpa [#allocation6], 0 }
   0x8   :  { %29 = vsyncpa [#allocation9], 0 }
   0x9   :  { %30 = vsyncpa [#allocation12], 0 }
   0xa   :  { %31 = vsyncpa [#allocation7], 0  ;;  %s49_s0 = sshll.u32 %s5490_s3, 4  ;;  %s3810_s23 = smov [#allocation8]   ;;  %s50_s0 = int_to_ptr.hbm [resolvable:$true] %s49_s0 }
   0xb   :  { %s51_s1 = sshll.u32 %s3810_s23, 4  ;;  %s77_s26 = sshll.u32 %s5493_s6, 4  ;;  %s52_s1 = int_to_ptr.vmem [resolvable:$true] %s51_s1  ;;  %s78_s26 = int_to_ptr.hbm [resolvable:$true] %s77_s26 }
   0xc   :  { %s3811_s27 = smov 384   ;;  %s3812_s28 = smov 24  }
   0xd   :  { %57 = dma.hbm_to_vmem [thread:$0]  %s50_s0, 6144, %s52_s1, [#allocation9], %s3811_s27, %s3811_s27, %s3812_s28  }
   0xe   :  { %s3813_s29 = smov [#allocation11]   ;;  %s36_s13 = sshll.u32 %s5489_s2, 4  ;;  %s37_s13 = int_to_ptr.hbm [resolvable:$true] %s36_s13 }
   0xf   :  { %s79_s30 = sshll.u32 %s3813_s29, 4  ;;  %s64_s15 = sshll.u32 %s5492_s5, 4  ;;  %s80_s30 = int_to_ptr.vmem [resolvable:$true] %s79_s30  ;;  %s65_s15 = int_to_ptr.hbm [resolvable:$true] %s64_s15 }
  0x10   :  { %85 = dma.hbm_to_vmem [thread:$0]  %s78_s26, 6144, %s80_s30, [#allocation12], %s3811_s27, %s3811_s27, %s3812_s28  }
  0x11   :  { %s3814_s16 = smov [#allocation5]   ;;  %s3815_s6 = smov [#allocation10]  }
  0x12   :  { %s38_s17 = sshll.u32 %s3814_s16, 4  ;;  %s66_s18 = sshll.u32 %s3815_s6, 4  ;;  %s39_s17 = int_to_ptr.vmem [resolvable:$true] %s38_s17  ;;  %s67_s18 = int_to_ptr.vmem [resolvable:$true] %s66_s18 }
  0x13   :  { %44 = dma.hbm_to_vmem [thread:$0]  %s37_s13, 2688, %s39_s17, [#allocation6], %s3811_s27, %s3811_s27, %s3812_s28  }
  0x14   :  { %s92_s21 = sshll.u32 %s5495_s8, 4  ;;  %s3816_s2 = smov [#allocation13]   ;;  %s93_s21 = int_to_ptr.hbm [resolvable:$true] %s92_s21 }
  0x15   :  { %72 = dma.hbm_to_vmem [thread:$0]  %s65_s15, 6144, %s67_s18, [#allocation9], %s3811_s27, %s3811_s27, %s3812_s28  }
  0x16   :  { %s94_s22 = sshll.u32 %s3816_s2, 4  ;;  %s3817_s0 = smov 128   ;;  %s95_s22 = int_to_ptr.vmem [resolvable:$true] %s94_s22 }
  0x17   :  { %s3818_s23 = smov 8  }
  0x18   :  { %100 = dma.hbm_to_vmem [thread:$0]  %s93_s21, 2048, %s95_s22, [#allocation12], %s3817_s0, %s3817_s0, %s3818_s23  }
  0x19   :  { %3800 = dma.done.wait [#allocation6], 2688  }
  0x1a   :  { %3801 = vsyncadd [#allocation6], 4294964608 }
  0x1b   :  { %3802 = dma.done.wait [#allocation9], 12288  }
  0x1c   :  { %3803 = vsyncadd [#allocation9], 4294955008 }
  0x1d   :  { %3804 = dma.done.wait [#allocation12], 8192  }
  0x1e   :  { %3805 = vsyncadd [#allocation12], 4294959104  ;;  %v3900_v0 = vld [vmem:[#allocation8 + $0x168] sm:$0xff]  ;;  %v3902_v1 = vld [vmem:[#allocation8 + $0x170] sm:$0xff]  ;;  %v5499_v44 = vmov 0.0   ;;  %s4499_s1 = sld [smem:[#allocation4]] }
  0x1f   :  { %v3904_v2 = vld [vmem:[#allocation8 + $0x150] sm:$0xff]  ;;  %172 = vmatpush.msra.mxu0 %v3900_v0  ;;  %192 = vmatpush.msra.mxu1 %v3902_v1  ;;  %v3908_v3 = vld [vmem:[#allocation8 + $0x158] sm:$0xff]  ;;  %v3912_v5 = vld [vmem:[#allocation8 + $0x140] sm:$0xff]  ;;  %s4508_s24 = sld [smem:[#allocation4 + $0x1]] }
  0x20   :  { %v3910_v4 = vld [vmem:[#allocation8 + $0x138] sm:$0xff]  ;;  %286 = vmatpush.msra.mxu3 %v3900_v0  ;;  %v3917_v6 = vld [vmem:[#allocation8 + $0x120] sm:$0xff]  ;;  %v3919_v7 = vld [vmem:[#allocation8 + $0x128] sm:$0xff]  ;;  %s1308_s30 = sld [smem:[#allocation3]] }
  0x21   :  { %173 = vmatpush.msra.mxu0 %v3904_v2  ;;  %193 = vmatpush.msra.mxu1 %v3908_v3  ;;  %v3924_v8 = vld [vmem:[#allocation8 + $0x108] sm:$0xff]  ;;  %v3926_v9 = vld [vmem:[#allocation8 + $0x110] sm:$0xff]  ;;  %v3933_v11 = vld [vmem:[#allocation8 + $0xf8] sm:$0xff]  ;;  %s3410_s11 = sld [smem:[#allocation4 + $0x2]] }
  0x22   :  { %287 = vmatpush.msra.mxu3 %v3904_v2  ;;  %v3931_v10 = vld [vmem:[#allocation8 + $0xf0] sm:$0xff]  ;;  %v3935_v12 = vld [vmem:[#allocation8 + $0x178] sm:$0xff]  ;;  %v3940_v13 = vld [vmem:[#allocation8 + $0x160] sm:$0xff]  ;;  %s3412_s12 = sld [smem:[#allocation4 + $0x3]] }
  0x23   :  { %174 = vmatpush.msra.mxu0 %v3910_v4  ;;  %194 = vmatpush.msra.mxu1 %v3912_v5  ;;  %v3942_v14 = vld [vmem:[#allocation8 + $0xd8] sm:$0xff]  ;;  %v3944_v15 = vld [vmem:[#allocation8 + $0xe0] sm:$0xff]  ;;  %v3950_v16 = vld [vmem:[#allocation8 + $0x148] sm:$0xff]  ;;  %s4970_s15 = sld [smem:[#allocation3 + $0x1]] }
  0x24   :  { %288 = vmatpush.msra.mxu3 %v3910_v4  ;;  %212 = vmatpush.msra.mxu2 %v3935_v12  ;;  %v3952_v17 = vld [vmem:[#allocation8 + $0xc0] sm:$0xff]  ;;  %v3954_v18 = vld [vmem:[#allocation8 + $0xc8] sm:$0xff]  ;;  %v3960_v19 = vld [vmem:[#allocation8 + $0x130] sm:$0xff]  ;;  %s3418_s16 = sld [smem:[#allocation4 + $0x4]] }
  0x25   :  { %175 = vmatpush.msra.mxu0 %v3917_v6  ;;  %195 = vmatpush.msra.mxu1 %v3919_v7  ;;  %v3962_v20 = vld [vmem:[#allocation8 + $0xa8] sm:$0xff]  ;;  %v3964_v21 = vld [vmem:[#allocation8 + $0xb0] sm:$0xff]  ;;  %v3972_v23 = vld [vmem:[#allocation8 + $0x98] sm:$0xff]  ;;  %s3420_s17 = sld [smem:[#allocation4 + $0x5]] }
  0x26   :  { %289 = vmatpush.msra.mxu3 %v3917_v6  ;;  %213 = vmatpush.msra.mxu2 %v3940_v13  ;;  %v3970_v22 = vld [vmem:[#allocation8 + $0x90] sm:$0xff]  ;;  %v3974_v24 = vld [vmem:[#allocation8 + $0x118] sm:$0xff]  ;;  %v3980_v25 = vld [vmem:[#allocation8 + $0x100] sm:$0xff]  ;;  %p1309_p0 = scmp.eq.s32.totalorder %s1308_s30, 1  ;;  %s3425_s5 = sld [smem:[#allocation3 + $0x2]] }
  0x27   :  { %176 = vmatpush.msra.mxu0 %v3924_v8  ;;  %196 = vmatpush.msra.mxu1 %v3926_v9  ;;  %v3982_v26 = vld [vmem:[#allocation8 + $0x78] sm:$0xff]  ;;  %v3984_v27 = vld [vmem:[#allocation8 + $0x80] sm:$0xff]  ;;  %v3990_v28 = vld [vmem:[#allocation8 + $0xe8] sm:$0xff]  ;;  %s3426_s8 = sld [smem:[#allocation4 + $0x6]] }
  0x28   :  { %290 = vmatpush.msra.mxu3 %v3924_v8  ;;  %214 = vmatpush.msra.mxu2 %v3950_v16  ;;  %v3992_v29 = vld [vmem:[#allocation8 + $0x60] sm:$0xff]  ;;  %v3994_v30 = vld [vmem:[#allocation8 + $0x68] sm:$0xff]  ;;  %v4000_v31 = vld [vmem:[#allocation8 + $0xd0] sm:$0xff]  ;;  %s1310_s13 = scalar_select %p1309_p0, 1, 0 }
  0x29   :  { %177 = vmatpush.msra.mxu0 %v3931_v10  ;;  %197 = vmatpush.msra.mxu1 %v3933_v11  ;;  %v4002_v32 = vld [vmem:[#allocation8 + $0x48] sm:$0xff]  ;;  %v4004_v33 = vld [vmem:[#allocation8 + $0x50] sm:$0xff]  ;;  %v4010_v34 = vld [vmem:[#allocation8 + $0xb8] sm:$0xff]  ;;  %p1656_p1 = scmp.eq.s32.totalorder %s4970_s15, 1  ;;  %s5299_s27 = sld [smem:[#allocation4 + $0x8]] }
  0x2a   :  { %291 = vmatpush.msra.mxu3 %v3931_v10  ;;  %215 = vmatpush.msra.mxu2 %v3960_v19  ;;  %v4012_v35 = vld [vmem:[#allocation8 + $0x30] sm:$0xff]  ;;  %v4014_v36 = vld [vmem:[#allocation8 + $0x38] sm:$0xff]  ;;  %v4020_v37 = vld [vmem:[#allocation8 + $0xa0] sm:$0xff]  ;;  %s1311_s3 = scvt.s32.f32 %s1310_s13  ;;  %s3436_s28 = sld [smem:[#allocation4 + $0x9]] }
  0x2b   :  { %178 = vmatpush.msra.mxu0 %v3942_v14  ;;  %198 = vmatpush.msra.mxu1 %v3944_v15  ;;  %5593 = vst [vmem:[#allocation20_spill] sm:$0xff] %v4012_v35  ;;  %v4022_v38 = vld [vmem:[#allocation8 + $0x18] sm:$0xff]  ;;  %v4024_v39 = vld [vmem:[#allocation8 + $0x20] sm:$0xff]  ;;  %v4030_v40 = vld [vmem:[#allocation8 + $0x88] sm:$0xff]  ;;  %s1657_s6 = scalar_select %p1656_p1, 1, 0 }
  0x2c   :  { %292 = vmatpush.msra.mxu3 %v3942_v14  ;;  %216 = vmatpush.msra.mxu2 %v3974_v24  ;;  %5594 = vst [vmem:[#allocation21_spill] sm:$0xff] %v4014_v36  ;;  %v4032_v41 = vld [vmem:[#allocation8] sm:$0xff]  ;;  %v4034_v42 = vld [vmem:[#allocation8 + $0x8] sm:$0xff]  ;;  %v4041_v43 = vld [vmem:[#allocation8 + $0x70] sm:$0xff]  ;;  %s1328_s14 = ssub.f32 1.0, %s1311_s3  ;;  %p2003_p2 = scmp.eq.s32.totalorder %s3425_s5, 1 }
  0x2d   :  { %179 = vmatpush.msra.mxu0 %v3952_v17  ;;  %199 = vmatpush.msra.mxu1 %v3954_v18  ;;  %5595 = vst [vmem:[#allocation22_spill] sm:$0xff] %v4022_v38  ;;  %v4048_v45 = vld [vmem:[#allocation8 + $0x58] sm:$0xff]  ;;  %v4052_v46 = vld [vmem:[#allocation8 + $0x40] sm:$0xff]  ;;  %v4058_v47 = vld [vmem:[#allocation8 + $0x28] sm:$0xff]  ;;  %s1658_s18 = scvt.s32.f32 %s1657_s6  ;;  %s3444_s15 = sld [smem:[#allocation4 + $0xb]] }
  0x2e   :  { %293 = vmatpush.msra.mxu3 %v3952_v17  ;;  %217 = vmatpush.msra.mxu2 %v3980_v25  ;;  %5596 = vst [vmem:[#allocation23_spill] sm:$0xff] %v4024_v39  ;;  %v4064_v48 = vld [vmem:[#allocation8 + $0x10] sm:$0xff]  ;;  %v232_v49 = vld [vmem:[#allocation5] sm:$0xff]  ;;  %v233_v50 = vld [vmem:[#allocation5 + $0x8] sm:$0xff]  ;;  %s3452_s20 = sld [smem:[#allocation4 + $0xd]]  ;;  %s3820_s5 = smov [#allocation14]  }
  0x2f   :  { %180 = vmatpush.msra.mxu0 %v3962_v20  ;;  %200 = vmatpush.msra.mxu1 %v3964_v21  ;;  %5597 = vst [vmem:[#allocation24_spill] sm:$0xff] %v4032_v41  ;;  %s1675_s19 = ssub.f32 1.0, %s1658_s18 }
  0x30   :  { %294 = vmatpush.msra.mxu3 %v3962_v20  ;;  %218 = vmatpush.msra.mxu2 %v3990_v28  ;;  %5598 = vst [vmem:[#allocation25_spill] sm:$0xff] %v4034_v42 }
  0x31   :  { %181 = vmatpush.msra.mxu0 %v3970_v22  ;;  %201 = vmatpush.msra.mxu1 %v3972_v23  ;;  %5599 = vst [vmem:[#allocation26_spill] sm:$0xff] %v4058_v47 }
  0x32   :  { %295 = vmatpush.msra.mxu3 %v3970_v22  ;;  %219 = vmatpush.msra.mxu2 %v4000_v31  ;;  %5600 = vst [vmem:[#allocation27_spill] sm:$0xff] %v4064_v48 }
  0x33   :  { %182 = vmatpush.msra.mxu0 %v3982_v26  ;;  %202 = vmatpush.msra.mxu1 %v3984_v27 }
  0x34   :  { %296 = vmatpush.msra.mxu3 %v3982_v26  ;;  %220 = vmatpush.msra.mxu2 %v4010_v34 }
  0x35   :  { %183 = vmatpush.msra.mxu0 %v3992_v29  ;;  %203 = vmatpush.msra.mxu1 %v3994_v30 }
  0x36   :  { %297 = vmatpush.msra.mxu3 %v3992_v29  ;;  %221 = vmatpush.msra.mxu2 %v4020_v37 }
  0x37   :  { %184 = vmatpush.msra.mxu0 %v4002_v32  ;;  %204 = vmatpush.msra.mxu1 %v4004_v33 }
  0x38   :  { %298 = vmatpush.msra.mxu3 %v4002_v32  ;;  %222 = vmatpush.msra.mxu2 %v4030_v40 }
  0x39   :  { %185 = vmatpush.msra.mxu0 %v4012_v35  ;;  %205 = vmatpush.msra.mxu1 %v4014_v36 }
  0x3a   :  { %299 = vmatpush.msra.mxu3 %v4012_v35  ;;  %223 = vmatpush.msra.mxu2 %v4041_v43 }
  0x3b   :  { %186 = vmatpush.msra.mxu0 %v4022_v38  ;;  %206 = vmatpush.msra.mxu1 %v4024_v39 }
  0x3c   :  { %300 = vmatpush.msra.mxu3 %v4022_v38  ;;  %224 = vmatpush.msra.mxu2 %v4048_v45 }
  0x3d   :  { %187 = vmatpush.msra.mxu0 %v4032_v41  ;;  %207 = vmatpush.msra.mxu1 %v4034_v42 }
  0x3e   :  { %188 = vmatmul.f32.vlgmr.msra.gmra.mxu0 %v5499_v44  ;;  %208 = vmatmul.f32.vlgmr.msra.gmra.mxu1 %v5499_v44 }
  0x3f   :  { %306 = vmatpush.msrb.mxu0 %v3902_v1  ;;  %326 = vmatpush.msrb.mxu1 %v3935_v12 }
  0x40   :  { %301 = vmatpush.msra.mxu3 %v4032_v41  ;;  %225 = vmatpush.msra.mxu2 %v4052_v46 }
  0x41   :  { %307 = vmatpush.msrb.mxu0 %v3908_v3  ;;  %327 = vmatpush.msrb.mxu1 %v3940_v13 }
  0x42   :  { %418 = vmatpush.msrb.mxu3 %v3902_v1  ;;  %226 = vmatpush.msra.mxu2 %v4058_v47 }
  0x43   :  { %308 = vmatpush.msrb.mxu0 %v3912_v5  ;;  %328 = vmatpush.msrb.mxu1 %v3950_v16 }
  0x44   :  { %419 = vmatpush.msrb.mxu3 %v3908_v3  ;;  %227 = vmatpush.msra.mxu2 %v4064_v48 }
  0x45   :  { %309 = vmatpush.msrb.mxu0 %v3919_v7  ;;  %329 = vmatpush.msrb.mxu1 %v3960_v19 }
  0x46   :  { %420 = vmatpush.msrb.mxu3 %v3912_v5  ;;  %228 = vmatmul.f32.vlgmr.msra.gmra.mxu2 %v5499_v44 }
  0x47   :  { %310 = vmatpush.msrb.mxu0 %v3926_v9  ;;  %330 = vmatpush.msrb.mxu1 %v3974_v24 }
  0x48   :  { %398 = vmatpush.msrb.mxu2 %v3900_v0  ;;  %421 = vmatpush.msrb.mxu3 %v3919_v7 }
  0x49   :  { %311 = vmatpush.msrb.mxu0 %v3933_v11  ;;  %331 = vmatpush.msrb.mxu1 %v3980_v25 }
  0x4a   :  { %399 = vmatpush.msrb.mxu2 %v3904_v2  ;;  %422 = vmatpush.msrb.mxu3 %v3926_v9 }
  0x4b   :  { %312 = vmatpush.msrb.mxu0 %v3944_v15  ;;  %332 = vmatpush.msrb.mxu1 %v3990_v28 }
  0x4c   :  { %400 = vmatpush.msrb.mxu2 %v3910_v4  ;;  %423 = vmatpush.msrb.mxu3 %v3933_v11 }
  0x4d   :  { %313 = vmatpush.msrb.mxu0 %v3954_v18  ;;  %333 = vmatpush.msrb.mxu1 %v4000_v31 }
  0x4e   :  { %401 = vmatpush.msrb.mxu2 %v3917_v6  ;;  %424 = vmatpush.msrb.mxu3 %v3944_v15 }
  0x4f   :  { %314 = vmatpush.msrb.mxu0 %v3964_v21  ;;  %334 = vmatpush.msrb.mxu1 %v4010_v34 }
  0x50   :  { %402 = vmatpush.msrb.mxu2 %v3924_v8  ;;  %425 = vmatpush.msrb.mxu3 %v3954_v18 }
  0x51   :  { %315 = vmatpush.msrb.mxu0 %v3972_v23  ;;  %335 = vmatpush.msrb.mxu1 %v4020_v37 }
  0x52   :  { %403 = vmatpush.msrb.mxu2 %v3931_v10  ;;  %426 = vmatpush.msrb.mxu3 %v3964_v21 }
  0x53   :  { %316 = vmatpush.msrb.mxu0 %v3984_v27  ;;  %336 = vmatpush.msrb.mxu1 %v4030_v40 }
  0x54   :  { %404 = vmatpush.msrb.mxu2 %v3942_v14  ;;  %427 = vmatpush.msrb.mxu3 %v3972_v23 }
  0x55   :  { %317 = vmatpush.msrb.mxu0 %v3994_v30  ;;  %337 = vmatpush.msrb.mxu1 %v4041_v43 }
  0x56   :  { %405 = vmatpush.msrb.mxu2 %v3952_v17  ;;  %428 = vmatpush.msrb.mxu3 %v3984_v27 }
  0x57   :  { %318 = vmatpush.msrb.mxu0 %v4004_v33  ;;  %338 = vmatpush.msrb.mxu1 %v4048_v45 }
  0x58   :  { %406 = vmatpush.msrb.mxu2 %v3962_v20  ;;  %429 = vmatpush.msrb.mxu3 %v3994_v30 }
  0x59   :  { %319 = vmatpush.msrb.mxu0 %v4014_v36  ;;  %339 = vmatpush.msrb.mxu1 %v4052_v46 }
  0x5a   :  { %407 = vmatpush.msrb.mxu2 %v3970_v22  ;;  %430 = vmatpush.msrb.mxu3 %v4004_v33 }
  0x5b   :  { %320 = vmatpush.msrb.mxu0 %v4024_v39  ;;  %340 = vmatpush.msrb.mxu1 %v4058_v47 }
  0x5c   :  { %408 = vmatpush.msrb.mxu2 %v3982_v26  ;;  %431 = vmatpush.msrb.mxu3 %v4014_v36 }
  0x5d   :  { %321 = vmatpush.msrb.mxu0 %v4034_v42  ;;  %341 = vmatpush.msrb.mxu1 %v4064_v48 }
  0x5e   :  { %409 = vmatpush.msrb.mxu2 %v3992_v29  ;;  %432 = vmatpush.msrb.mxu3 %v4024_v39 }
  0x5f   :  { %438 = vmatpush.msra.mxu0 %v3935_v12  ;;  %510 = vmatpush.msra.mxu1 %v3900_v0 }
  0x60   :  { %410 = vmatpush.msrb.mxu2 %v4002_v32  ;;  %433 = vmatpush.msrb.mxu3 %v4034_v42 }
  0x61   :  { %439 = vmatpush.msra.mxu0 %v3940_v13  ;;  %511 = vmatpush.msra.mxu1 %v3904_v2 }
  0x62   :  { %411 = vmatpush.msrb.mxu2 %v4012_v35 }
  0x63   :  { %440 = vmatpush.msra.mxu0 %v3950_v16  ;;  %512 = vmatpush.msra.mxu1 %v3910_v4 }
  0x64   :  { %412 = vmatpush.msrb.mxu2 %v4022_v38 }
  0x65   :  { %441 = vmatpush.msra.mxu0 %v3960_v19  ;;  %513 = vmatpush.msra.mxu1 %v3917_v6 }
  0x66   :  { %413 = vmatpush.msrb.mxu2 %v4032_v41 }
  0x67   :  { %442 = vmatpush.msra.mxu0 %v3974_v24  ;;  %514 = vmatpush.msra.mxu1 %v3924_v8 }
  0x68   :  { %530 = vmatpush.msra.mxu2 %v3902_v1 }
  0x69   :  { %443 = vmatpush.msra.mxu0 %v3980_v25  ;;  %515 = vmatpush.msra.mxu1 %v3931_v10 }
  0x6a   :  { %531 = vmatpush.msra.mxu2 %v3908_v3 }
  0x6b   :  { %444 = vmatpush.msra.mxu0 %v3990_v28  ;;  %516 = vmatpush.msra.mxu1 %v3942_v14 }
  0x6c   :  { %532 = vmatpush.msra.mxu2 %v3912_v5 }
  0x6d   :  { %445 = vmatpush.msra.mxu0 %v4000_v31  ;;  %517 = vmatpush.msra.mxu1 %v3952_v17 }
  0x6e   :  { %533 = vmatpush.msra.mxu2 %v3919_v7 }
  0x6f   :  { %446 = vmatpush.msra.mxu0 %v4010_v34  ;;  %518 = vmatpush.msra.mxu1 %v3962_v20 }
  0x70   :  { %534 = vmatpush.msra.mxu2 %v3926_v9 }
  0x71   :  { %447 = vmatpush.msra.mxu0 %v4020_v37  ;;  %519 = vmatpush.msra.mxu1 %v3970_v22 }
  0x72   :  { %535 = vmatpush.msra.mxu2 %v3933_v11 }
  0x73   :  { %448 = vmatpush.msra.mxu0 %v4030_v40  ;;  %520 = vmatpush.msra.mxu1 %v3982_v26 }
  0x74   :  { %536 = vmatpush.msra.mxu2 %v3944_v15 }
  0x75   :  { %449 = vmatpush.msra.mxu0 %v4041_v43  ;;  %521 = vmatpush.msra.mxu1 %v3992_v29 }
  0x76   :  { %537 = vmatpush.msra.mxu2 %v3954_v18 }
  0x77   :  { %450 = vmatpush.msra.mxu0 %v4048_v45  ;;  %522 = vmatpush.msra.mxu1 %v4002_v32 }
  0x78   :  { %538 = vmatpush.msra.mxu2 %v3964_v21 }
  0x79   :  { %451 = vmatpush.msra.mxu0 %v4052_v46  ;;  %523 = vmatpush.msra.mxu1 %v4012_v35 }
  0x7a   :  { %539 = vmatpush.msra.mxu2 %v3972_v23 }
  0x7b   :  { %452 = vmatpush.msra.mxu0 %v4058_v47  ;;  %524 = vmatpush.msra.mxu1 %v4022_v38 }
  0x7c   :  { %540 = vmatpush.msra.mxu2 %v3984_v27 }
  0x7d   :  { %453 = vmatpush.msra.mxu0 %v4064_v48  ;;  %525 = vmatpush.msra.mxu1 %v4032_v41 }
  0x7e   :  { %541 = vmatpush.msra.mxu2 %v3994_v30 }
  0x80   :  { %542 = vmatpush.msra.mxu2 %v4004_v33 }
  0x82   :  { %543 = vmatpush.msra.mxu2 %v4014_v36 }
  0x84   :  { %544 = vmatpush.msra.mxu2 %v4024_v39 }
  0x86   :  { %545 = vmatpush.msra.mxu2 %v4034_v42 }
  0xbb   :  { %v189_v51 = vpop.f32.mrf.mxu0  ;;  %v209_v52 = vpop.f32.mrf.mxu1 }
  0xbc   :  { %v235_v53 = vadd.f32 %v232_v49, %v189_v51  ;;  %v255_v54 = vadd.f32 %v233_v50, %v209_v52  ;;  %v4178_v49 = vld [vmem:[%s5491_s4] ss:$0 sm:$0xff] }
  0xbe   :  { %v3390_v55 = vmul.f32 -1.442695, %v235_v53  ;;  %v3391_v56 = vmul.f32 -1.442695, %v255_v54 }
  0xc0   :  { %3472 = vpow2.f32 %v3390_v55 }
  0xc1   :  { %3474 = vpow2.f32 %v3391_v56 }
  0xc6   :  { %v3473_v57 = vpop.eup %3472 }
  0xc7   :  { %v3475_v58 = vpop.eup %3474  ;;  %v239_v59 = vadd.f32 1.0, %v3473_v57 }
  0xc8   :  { %v259_v60 = vadd.f32 1.0, %v3475_v58 }
  0xc9   :  { %3476 = vrcp.f32 %v239_v59  ;;  %v229_v51 = vpop.f32.mrf.mxu2  ;;  %v251_v52 = vand.u32 2147483648, %v239_v59  ;;  %v249_v54 = vand.u32 2147483647, %v239_v59  ;;  %vm245_vm1 = vweird.f32 %v239_v59 }
  0xca   :  { %3478 = vrcp.f32 %v259_v60  ;;  %v278_v57 = vadd.f32 %v4178_v49, %v229_v51  ;;  %vm265_vm4 = vweird.f32 %v259_v60  ;;  %v271_v38 = vand.u32 2147483648, %v259_v60 }
  0xcb   :  { %v252_v58 = vor.u32 1.1754944e-38, %v251_v52  ;;  %vm250_vm3 = vcmp.eq.f32.partialorder %v249_v54, 8.507059e+37  ;;  %v269_v47 = vand.u32 2147483647, %v259_v60 }
  0xcd   :  { %vm270_vm7 = vcmp.eq.f32.partialorder %v269_v47, 8.507059e+37  ;;  %v5605_v47 = vld [vmem:[#allocation27_spill] sm:$0xff] }
  0xcf   :  { %v3477_v61 = vpop.eup %3476 }
  0xd0   :  { %v3479_v62 = vpop.eup %3478  ;;  %v241_v63 = vmul.f32 %v3477_v61, %v239_v59  ;;  %vm246_vm0 = vweird.f32 %v3477_v61 }
  0xd1   :  { %v261_v44 = vmul.f32 %v3479_v62, %v259_v60  ;;  %vm247_vm2 = vmor %vm245_vm1, %vm246_vm0  ;;  %vm266_vm5 = vweird.f32 %v3479_v62  ;;  %v5607_v60 = vld [vmem:[#allocation25_spill] sm:$0xff] }
  0xd2   :  { %v242_v42 = vsub.f32 1.0, %v241_v63  ;;  %v234_v63 = vld [vmem:[#allocation5 + $0x10] sm:$0xff]  ;;  %vm267_vm6 = vmor %vm265_vm4, %vm266_vm5 }
  0xd3   :  { %v262_v50 = vsub.f32 1.0, %v261_v44 }
  0xd4   :  { %v243_v53 = vmul.f32 %v3477_v61, %v242_v42 }
  0xd5   :  { %v263_v55 = vmul.f32 %v3479_v62, %v262_v50  ;;  %v272_v50 = vor.u32 1.1754944e-38, %v271_v38  ;;  %v5602_v38 = vld [vmem:[#allocation26_spill] sm:$0xff] }
  0xd6   :  { %v244_v56 = vadd.f32 %v3477_v61, %v243_v53 }
  0xd7   :  { %v264_v39 = vadd.f32 %v3479_v62, %v263_v55 }
  0xd8   :  { %v248_v41 = vsel %vm247_vm2, %v3477_v61, %v244_v56 }
  0xd9   :  { %v253_v48 = vsel %vm250_vm3, %v252_v58, %v248_v41  ;;  %v268_v36 = vsel %vm267_vm6, %v3479_v62, %v264_v39  ;;  %v5603_v39 = vld [vmem:[#allocation22_spill] sm:$0xff]  ;;  %v5604_v41 = vld [vmem:[#allocation23_spill] sm:$0xff]  ;;  %v348_v62 = vld [vmem:[#allocation5 + $0x20] sm:$0xff] }
  0xda   :  { %v279_v44 = vmul.f32 %v278_v57, %v253_v48  ;;  %v273_v59 = vsel %vm270_vm7, %v272_v50, %v268_v36  ;;  %v5601_v36 = vld [vmem:[#allocation21_spill] sm:$0xff]  ;;  %v5606_v48 = vld [vmem:[#allocation24_spill] sm:$0xff]  ;;  %v347_v58 = vld [vmem:[#allocation5 + $0x18] sm:$0xff] }
  0xdb   :  { %v282_v51 = vsub.f32 1.0, %v273_v59  ;;  %v284_v61 = vmul.f32 0.0, %v273_v59 }
  0xdc   :  { %v280_v42 = vadd.f32 %v279_v44, %v234_v63 }
  0xde   :  { %3480 = vtanh.f32 %v280_v42 }
  0xe4   :  { %v3481_v53 = vpop.eup %3480 }
  0xe5   :  { %v283_v52 = vmul.f32 %v3481_v53, %v282_v51 }
  0xe7   :  { %v4181_v54 = vadd.f32 %v284_v61, %v283_v52 }
  0xe9   :  { %302 = vmatmul.f32.vlgmr.msra.gmra.mxu3 %v4181_v54  ;;  %322 = vmatmul.f32.vlgmr.msrb.gmra.mxu0 %v4181_v54 }
  0xea   :  { %342 = vmatmul.f32.vlgmr.msrb.gmra.mxu1 %v4181_v54  ;;  %550 = vmatpush.msra.mxu3 %v3935_v12 }
  0xeb   :  { %622 = vmatpush.msrb.mxu0 %v3900_v0  ;;  %642 = vmatpush.msrb.mxu1 %v3902_v1 }
  0xec   :  { %551 = vmatpush.msra.mxu3 %v3940_v13 }
  0xed   :  { %623 = vmatpush.msrb.mxu0 %v3904_v2  ;;  %643 = vmatpush.msrb.mxu1 %v3908_v3 }
  0xee   :  { %552 = vmatpush.msra.mxu3 %v3950_v16 }
  0xef   :  { %624 = vmatpush.msrb.mxu0 %v3910_v4  ;;  %644 = vmatpush.msrb.mxu1 %v3912_v5 }
  0xf0   :  { %553 = vmatpush.msra.mxu3 %v3960_v19 }
  0xf1   :  { %625 = vmatpush.msrb.mxu0 %v3917_v6  ;;  %645 = vmatpush.msrb.mxu1 %v3919_v7 }
  0xf2   :  { %554 = vmatpush.msra.mxu3 %v3974_v24 }
  0xf3   :  { %626 = vmatpush.msrb.mxu0 %v3924_v8  ;;  %646 = vmatpush.msrb.mxu1 %v3926_v9 }
  0xf4   :  { %555 = vmatpush.msra.mxu3 %v3980_v25 }
  0xf5   :  { %627 = vmatpush.msrb.mxu0 %v3931_v10  ;;  %647 = vmatpush.msrb.mxu1 %v3933_v11 }
  0xf6   :  { %556 = vmatpush.msra.mxu3 %v3990_v28 }
  0xf7   :  { %628 = vmatpush.msrb.mxu0 %v3942_v14  ;;  %648 = vmatpush.msrb.mxu1 %v3944_v15 }
  0xf8   :  { %557 = vmatpush.msra.mxu3 %v4000_v31 }
  0xf9   :  { %629 = vmatpush.msrb.mxu0 %v3952_v17  ;;  %649 = vmatpush.msrb.mxu1 %v3954_v18 }
  0xfa   :  { %558 = vmatpush.msra.mxu3 %v4010_v34 }
  0xfb   :  { %630 = vmatpush.msrb.mxu0 %v3962_v20  ;;  %650 = vmatpush.msrb.mxu1 %v3964_v21 }
  0xfc   :  { %559 = vmatpush.msra.mxu3 %v4020_v37 }
  0xfd   :  { %631 = vmatpush.msrb.mxu0 %v3970_v22  ;;  %651 = vmatpush.msrb.mxu1 %v3972_v23 }
  0xfe   :  { %560 = vmatpush.msra.mxu3 %v4030_v40 }
  0xff   :  { %632 = vmatpush.msrb.mxu0 %v3982_v26  ;;  %652 = vmatpush.msrb.mxu1 %v3984_v27 }
 0x100   :  { %561 = vmatpush.msra.mxu3 %v4041_v43 }
 0x101   :  { %633 = vmatpush.msrb.mxu0 %v3992_v29  ;;  %653 = vmatpush.msrb.mxu1 %v3994_v30 }
 0x102   :  { %562 = vmatpush.msra.mxu3 %v4048_v45 }
 0x103   :  { %634 = vmatpush.msrb.mxu0 %v4002_v32  ;;  %654 = vmatpush.msrb.mxu1 %v4004_v33 }
 0x104   :  { %563 = vmatpush.msra.mxu3 %v4052_v46 }
 0x105   :  { %635 = vmatpush.msrb.mxu0 %v4012_v35  ;;  %655 = vmatpush.msrb.mxu1 %v5601_v36 }
 0x106   :  { %564 = vmatpush.msra.mxu3 %v5602_v38 }
 0x107   :  { %636 = vmatpush.msrb.mxu0 %v5603_v39  ;;  %656 = vmatpush.msrb.mxu1 %v5604_v41  ;;  %v349_v39 = vld [vmem:[#allocation5 + $0x28] sm:$0xff] }
 0x108   :  { %565 = vmatpush.msra.mxu3 %v5605_v47 }
 0x109   :  { %637 = vmatpush.msrb.mxu0 %v5606_v48  ;;  %657 = vmatpush.msrb.mxu1 %v5607_v60 }
 0x166   :  { %v323_v55 = vpop.f32.mrf.mxu0 }
 0x167   :  { %v370_v56 = vadd.f32 %v348_v62, %v323_v55 }
 0x169   :  { %v3393_v57 = vmul.f32 -1.442695, %v370_v56 }
 0x16b   :  { %3482 = vpow2.f32 %v3393_v57 }
 0x16c   :  { %v303_v63 = vpop.f32.mrf.mxu3 }
 0x16d   :  { %v350_v44 = vadd.f32 %v347_v58, %v303_v63  ;;  %v343_v58 = vpop.f32.mrf.mxu1 }
 0x16f   :  { %v3392_v42 = vmul.f32 -1.442695, %v350_v44 }
 0x171   :  { %v3483_v50 = vpop.eup %3482  ;;  %3484 = vpow2.f32 %v3392_v42  ;;  %v390_v42 = vadd.f32 %v4178_v49, %v343_v58 }
 0x172   :  { %v374_v59 = vadd.f32 1.0, %v3483_v50 }
 0x174   :  { %3486 = vrcp.f32 %v374_v59  ;;  %vm380_vm13 = vweird.f32 %v374_v59 }
 0x177   :  { %v3485_v51 = vpop.eup %3484 }
 0x178   :  { %v354_v53 = vadd.f32 1.0, %v3485_v51 }
 0x17a   :  { %3488 = vrcp.f32 %v354_v53  ;;  %v3487_v52 = vpop.eup %3486  ;;  %v366_v62 = vand.u32 2147483648, %v354_v53  ;;  %v364_v56 = vand.u32 2147483647, %v354_v53  ;;  %vm360_vm9 = vweird.f32 %v354_v53 }
 0x17b   :  { %v376_v61 = vmul.f32 %v3487_v52, %v374_v59  ;;  %vm381_vm12 = vweird.f32 %v3487_v52 }
 0x17c   :  { %v367_v44 = vor.u32 1.1754944e-38, %v366_v62  ;;  %vm365_vm11 = vcmp.eq.f32.partialorder %v364_v56, 8.507059e+37  ;;  %vm382_vm14 = vmor %vm380_vm13, %vm381_vm12 }
 0x17d   :  { %v377_v47 = vsub.f32 1.0, %v376_v61  ;;  %v386_v61 = vand.u32 2147483648, %v374_v59 }
 0x17f   :  { %v378_v57 = vmul.f32 %v3487_v52, %v377_v47  ;;  %v387_v35 = vor.u32 1.1754944e-38, %v386_v61 }
 0x180   :  { %v3489_v48 = vpop.eup %3488 }
 0x181   :  { %v356_v60 = vmul.f32 %v3489_v48, %v354_v53  ;;  %vm361_vm8 = vweird.f32 %v3489_v48  ;;  %v379_v38 = vadd.f32 %v3487_v52, %v378_v57  ;;  %v5615_v57 = vld [vmem:[#allocation25_spill] sm:$0xff] }
 0x182   :  { %vm362_vm10 = vmor %vm360_vm9, %vm361_vm8 }
 0x183   :  { %v357_v41 = vsub.f32 1.0, %v356_v60  ;;  %v383_v47 = vsel %vm382_vm14, %v3487_v52, %v379_v38  ;;  %v5611_v38 = vld [vmem:[#allocation22_spill] sm:$0xff]  ;;  %v5614_v52 = vld [vmem:[#allocation24_spill] sm:$0xff] }
 0x185   :  { %v358_v55 = vmul.f32 %v3489_v48, %v357_v41  ;;  %v384_v41 = vand.u32 2147483647, %v374_v59  ;;  %v5613_v59 = vld [vmem:[#allocation27_spill] sm:$0xff] }
 0x187   :  { %v359_v63 = vadd.f32 %v3489_v48, %v358_v55  ;;  %vm385_vm15 = vcmp.eq.f32.partialorder %v384_v41, 8.507059e+37 }
 0x188   :  { %v388_v53 = vsel %vm385_vm15, %v387_v35, %v383_v47  ;;  %v5608_v35 = vld [vmem:[#allocation20_spill] sm:$0xff] }
 0x189   :  { %v363_v50 = vsel %vm362_vm10, %v3489_v48, %v359_v63  ;;  %v394_v62 = vsub.f32 1.0, %v388_v53  ;;  %v396_v48 = vmul.f32 %v388_v53, %v4181_v54  ;;  %v5609_v54 = vld [vmem:[#allocation21_spill] sm:$0xff]  ;;  %v459_v63 = vld [vmem:[#allocation5 + $0x30] sm:$0xff] }
 0x18a   :  { %v368_v51 = vsel %vm365_vm11, %v367_v44, %v363_v50  ;;  %v460_v44 = vld [vmem:[#allocation5 + $0x38] sm:$0xff] }
 0x18b   :  { %v391_v60 = vmul.f32 %v390_v42, %v368_v51 }
 0x18d   :  { %v392_v36 = vadd.f32 %v391_v60, %v349_v39  ;;  %v5612_v39 = vld [vmem:[#allocation23_spill] sm:$0xff] }
 0x18f   :  { %3490 = vtanh.f32 %v392_v36  ;;  %v5610_v36 = vld [vmem:[#allocation26_spill] sm:$0xff] }
 0x195   :  { %v3491_v55 = vpop.eup %3490 }
 0x196   :  { %v395_v58 = vmul.f32 %v3491_v55, %v394_v62 }
 0x198   :  { %v4236_v56 = vadd.f32 %v396_v48, %v395_v58 }
 0x19a   :  { %414 = vmatmul.f32.vlgmr.msrb.gmra.mxu2 %v4236_v56  ;;  %434 = vmatmul.f32.vlgmr.msrb.gmra.mxu3 %v4236_v56 }
 0x19b   :  { %454 = vmatmul.f32.vlgmr.msra.gmra.mxu0 %v4236_v56  ;;  %662 = vmatpush.msrb.mxu2 %v3935_v12 }
 0x19c   :  { %734 = vmatpush.msrb.mxu3 %v3900_v0  ;;  %754 = vmatpush.msra.mxu0 %v3902_v1 }
 0x19d   :  { %663 = vmatpush.msrb.mxu2 %v3940_v13 }
 0x19e   :  { %735 = vmatpush.msrb.mxu3 %v3904_v2  ;;  %755 = vmatpush.msra.mxu0 %v3908_v3 }
 0x19f   :  { %664 = vmatpush.msrb.mxu2 %v3950_v16 }
 0x1a0   :  { %736 = vmatpush.msrb.mxu3 %v3910_v4  ;;  %756 = vmatpush.msra.mxu0 %v3912_v5 }
 0x1a1   :  { %665 = vmatpush.msrb.mxu2 %v3960_v19 }
 0x1a2   :  { %737 = vmatpush.msrb.mxu3 %v3917_v6  ;;  %757 = vmatpush.msra.mxu0 %v3919_v7 }
 0x1a3   :  { %666 = vmatpush.msrb.mxu2 %v3974_v24 }
 0x1a4   :  { %738 = vmatpush.msrb.mxu3 %v3924_v8  ;;  %758 = vmatpush.msra.mxu0 %v3926_v9 }
 0x1a5   :  { %667 = vmatpush.msrb.mxu2 %v3980_v25 }
 0x1a6   :  { %739 = vmatpush.msrb.mxu3 %v3931_v10  ;;  %759 = vmatpush.msra.mxu0 %v3933_v11 }
 0x1a7   :  { %668 = vmatpush.msrb.mxu2 %v3990_v28 }
 0x1a8   :  { %740 = vmatpush.msrb.mxu3 %v3942_v14  ;;  %760 = vmatpush.msra.mxu0 %v3944_v15 }
 0x1a9   :  { %669 = vmatpush.msrb.mxu2 %v4000_v31 }
 0x1aa   :  { %741 = vmatpush.msrb.mxu3 %v3952_v17  ;;  %761 = vmatpush.msra.mxu0 %v3954_v18 }
 0x1ab   :  { %670 = vmatpush.msrb.mxu2 %v4010_v34 }
 0x1ac   :  { %742 = vmatpush.msrb.mxu3 %v3962_v20  ;;  %762 = vmatpush.msra.mxu0 %v3964_v21 }
 0x1ad   :  { %671 = vmatpush.msrb.mxu2 %v4020_v37 }
 0x1ae   :  { %743 = vmatpush.msrb.mxu3 %v3970_v22  ;;  %763 = vmatpush.msra.mxu0 %v3972_v23 }
 0x1af   :  { %672 = vmatpush.msrb.mxu2 %v4030_v40 }
 0x1b0   :  { %744 = vmatpush.msrb.mxu3 %v3982_v26  ;;  %764 = vmatpush.msra.mxu0 %v3984_v27 }
 0x1b1   :  { %673 = vmatpush.msrb.mxu2 %v4041_v43 }
 0x1b2   :  { %745 = vmatpush.msrb.mxu3 %v3992_v29  ;;  %765 = vmatpush.msra.mxu0 %v3994_v30 }
 0x1b3   :  { %674 = vmatpush.msrb.mxu2 %v4048_v45 }
 0x1b4   :  { %746 = vmatpush.msrb.mxu3 %v4002_v32  ;;  %766 = vmatpush.msra.mxu0 %v4004_v33 }
 0x1b5   :  { %675 = vmatpush.msrb.mxu2 %v4052_v46 }
 0x1b6   :  { %747 = vmatpush.msrb.mxu3 %v5608_v35  ;;  %767 = vmatpush.msra.mxu0 %v5609_v54 }
 0x1b7   :  { %676 = vmatpush.msrb.mxu2 %v5610_v36 }
 0x1b8   :  { %748 = vmatpush.msrb.mxu3 %v5611_v38  ;;  %768 = vmatpush.msra.mxu0 %v5612_v39 }
 0x1b9   :  { %677 = vmatpush.msrb.mxu2 %v5613_v59 }
 0x1ba   :  { %749 = vmatpush.msrb.mxu3 %v5614_v52  ;;  %769 = vmatpush.msra.mxu0 %v5615_v57 }
 0x21d   :  { %v415_v42 = vpop.f32.mrf.mxu2  ;;  %v435_v50 = vpop.f32.mrf.mxu3 }
 0x21e   :  { %v462_v51 = vadd.f32 %v459_v63, %v415_v42  ;;  %v482_v61 = vadd.f32 %v460_v44, %v435_v50  ;;  %v455_v44 = vpop.f32.mrf.mxu0 }
 0x220   :  { %v3394_v60 = vmul.f32 -1.442695, %v462_v51  ;;  %v3395_v41 = vmul.f32 -1.442695, %v482_v61  ;;  %v502_v61 = vadd.f32 %v4178_v49, %v455_v44 }
 0x222   :  { %3492 = vpow2.f32 %v3394_v60 }
 0x223   :  { %3494 = vpow2.f32 %v3395_v41 }
 0x228   :  { %v3493_v47 = vpop.eup %3492 }
 0x229   :  { %v3495_v53 = vpop.eup %3494  ;;  %v466_v62 = vadd.f32 1.0, %v3493_v47  ;;  %v461_v47 = vld [vmem:[#allocation5 + $0x40] sm:$0xff] }
 0x22a   :  { %v486_v55 = vadd.f32 1.0, %v3495_v53 }
 0x22b   :  { %3496 = vrcp.f32 %v466_v62  ;;  %v478_v39 = vand.u32 2147483648, %v466_v62  ;;  %v476_v63 = vand.u32 2147483647, %v466_v62  ;;  %vm472_vm1 = vweird.f32 %v466_v62 }
 0x22c   :  { %3498 = vrcp.f32 %v486_v55  ;;  %vm492_vm5 = vweird.f32 %v486_v55 }
 0x22d   :  { %v479_v51 = vor.u32 1.1754944e-38, %v478_v39  ;;  %vm477_vm3 = vcmp.eq.f32.partialorder %v476_v63, 8.507059e+37 }
 0x231   :  { %v3497_v58 = vpop.eup %3496 }
 0x232   :  { %v3499_v48 = vpop.eup %3498  ;;  %v468_v52 = vmul.f32 %v3497_v58, %v466_v62  ;;  %vm473_vm0 = vweird.f32 %v3497_v58 }
 0x233   :  { %v488_v57 = vmul.f32 %v3499_v48, %v486_v55  ;;  %vm474_vm2 = vmor %vm472_vm1, %vm473_vm0  ;;  %vm493_vm4 = vweird.f32 %v3499_v48 }
 0x234   :  { %v469_v59 = vsub.f32 1.0, %v468_v52  ;;  %v498_v52 = vand.u32 2147483648, %v486_v55  ;;  %vm494_vm6 = vmor %vm492_vm5, %vm493_vm4 }
 0x235   :  { %v489_v38 = vsub.f32 1.0, %v488_v57 }
 0x236   :  { %v470_v36 = vmul.f32 %v3497_v58, %v469_v59  ;;  %v496_v59 = vand.u32 2147483647, %v486_v55 }
 0x237   :  { %v490_v42 = vmul.f32 %v3499_v48, %v489_v38  ;;  %v499_v38 = vor.u32 1.1754944e-38, %v498_v52  ;;  %v3614_v52 = vld [vmem:[#allocation8 + $0x148] sm:$0xff] }
 0x238   :  { %v471_v50 = vadd.f32 %v3497_v58, %v470_v36  ;;  %vm497_vm7 = vcmp.eq.f32.partialorder %v496_v59, 8.507059e+37  ;;  %v3615_v59 = vld [vmem:[#allocation8 + $0x130] sm:$0xff] }
 0x239   :  { %v491_v53 = vadd.f32 %v3499_v48, %v490_v42 }
 0x23a   :  { %v475_v60 = vsel %vm474_vm2, %v3497_v58, %v471_v50 }
 0x23b   :  { %v480_v41 = vsel %vm477_vm3, %v479_v51, %v475_v60  ;;  %v495_v35 = vsel %vm494_vm6, %v3499_v48, %v491_v53  ;;  %v3613_v53 = vld [vmem:[#allocation8 + $0x160] sm:$0xff] }
 0x23c   :  { %v503_v54 = vmul.f32 %v502_v61, %v480_v41  ;;  %v500_v36 = vsel %vm497_vm7, %v499_v38, %v495_v35  ;;  %v3617_v38 = vld [vmem:[#allocation8 + $0x100] sm:$0xff] }
 0x23d   :  { %v506_v39 = vsub.f32 1.0, %v500_v36  ;;  %v508_v58 = vmul.f32 %v500_v36, %v4236_v56  ;;  %v3618_v36 = vld [vmem:[#allocation8 + $0xe8] sm:$0xff] }
 0x23e   :  { %v504_v57 = vadd.f32 %v503_v54, %v461_v47  ;;  %v3612_v47 = vld [vmem:[#allocation8 + $0x178] sm:$0xff] }
 0x240   :  { %3500 = vtanh.f32 %v504_v57  ;;  %v3616_v57 = vld [vmem:[#allocation8 + $0x118] sm:$0xff] }
 0x246   :  { %v3501_v62 = vpop.eup %3500 }
 0x247   :  { %v507_v44 = vmul.f32 %v3501_v62, %v506_v39  ;;  %v3619_v39 = vld [vmem:[#allocation8 + $0xd0] sm:$0xff]  ;;  %v3620_v62 = vld [vmem:[#allocation8 + $0xb8] sm:$0xff] }
 0x249   :  { %v4291_v63 = vadd.f32 %v508_v58, %v507_v44  ;;  %v3621_v44 = vld [vmem:[#allocation8 + $0xa0] sm:$0xff]  ;;  %v3622_v58 = vld [vmem:[#allocation8 + $0x88] sm:$0xff] }
 0x24b   :  { %526 = vmatmul.f32.vlgmr.msra.gmra.mxu1 %v4291_v63  ;;  %546 = vmatmul.f32.vlgmr.msra.gmra.mxu2 %v4291_v63 }
 0x24c   :  { %566 = vmatmul.f32.vlgmr.msra.gmra.mxu3 %v4291_v63  ;;  %774 = vmatpush.msra.mxu1 %v3935_v12  ;;  %v572_v12 = vld [vmem:[#allocation5 + $0x50] sm:$0xff] }
 0x24d   :  { %846 = vmatpush.msra.mxu2 %v3900_v0  ;;  %866 = vmatpush.msra.mxu3 %v3902_v1  ;;  %v5616_v0 = vld [vmem:[#allocation20_spill] sm:$0xff]  ;;  %v5617_v1 = vld [vmem:[#allocation21_spill] sm:$0xff] }
 0x24e   :  { %775 = vmatpush.msra.mxu1 %v3940_v13 }
 0x24f   :  { %847 = vmatpush.msra.mxu2 %v3904_v2  ;;  %867 = vmatpush.msra.mxu3 %v3908_v3  ;;  %v5618_v2 = vld [vmem:[#allocation26_spill] sm:$0xff] }
 0x250   :  { %776 = vmatpush.msra.mxu1 %v3950_v16  ;;  %v5619_v3 = vld [vmem:[#allocation22_spill] sm:$0xff] }
 0x251   :  { %848 = vmatpush.msra.mxu2 %v3910_v4  ;;  %868 = vmatpush.msra.mxu3 %v3912_v5  ;;  %v5620_v4 = vld [vmem:[#allocation23_spill] sm:$0xff] }
 0x252   :  { %777 = vmatpush.msra.mxu1 %v3960_v19  ;;  %v5621_v5 = vld [vmem:[#allocation27_spill] sm:$0xff] }
 0x253   :  { %849 = vmatpush.msra.mxu2 %v3917_v6  ;;  %869 = vmatpush.msra.mxu3 %v3919_v7  ;;  %v5622_v6 = vld [vmem:[#allocation24_spill] sm:$0xff]  ;;  %v5623_v7 = vld [vmem:[#allocation25_spill] sm:$0xff] }
 0x254   :  { %778 = vmatpush.msra.mxu1 %v3974_v24 }
 0x255   :  { %850 = vmatpush.msra.mxu2 %v3924_v8  ;;  %870 = vmatpush.msra.mxu3 %v3926_v9  ;;  %v571_v8 = vld [vmem:[#allocation5 + $0x48] sm:$0xff] }
 0x256   :  { %779 = vmatpush.msra.mxu1 %v3980_v25 }
 0x257   :  { %851 = vmatpush.msra.mxu2 %v3931_v10  ;;  %871 = vmatpush.msra.mxu3 %v3933_v11 }
 0x258   :  { %780 = vmatpush.msra.mxu1 %v3990_v28 }
 0x259   :  { %852 = vmatpush.msra.mxu2 %v3942_v14  ;;  %872 = vmatpush.msra.mxu3 %v3944_v15 }
 0x25a   :  { %781 = vmatpush.msra.mxu1 %v4000_v31 }
 0x25b   :  { %853 = vmatpush.msra.mxu2 %v3952_v17  ;;  %873 = vmatpush.msra.mxu3 %v3954_v18 }
 0x25c   :  { %782 = vmatpush.msra.mxu1 %v4010_v34  ;;  %v573_v34 = vld [vmem:[#allocation5 + $0x58] sm:$0xff] }
 0x25d   :  { %854 = vmatpush.msra.mxu2 %v3962_v20  ;;  %874 = vmatpush.msra.mxu3 %v3964_v21 }
 0x25e   :  { %783 = vmatpush.msra.mxu1 %v4020_v37 }
 0x25f   :  { %855 = vmatpush.msra.mxu2 %v3970_v22  ;;  %875 = vmatpush.msra.mxu3 %v3972_v23 }
 0x260   :  { %784 = vmatpush.msra.mxu1 %v4030_v40 }
 0x261   :  { %856 = vmatpush.msra.mxu2 %v3982_v26  ;;  %876 = vmatpush.msra.mxu3 %v3984_v27 }
 0x262   :  { %785 = vmatpush.msra.mxu1 %v4041_v43 }
 0x263   :  { %857 = vmatpush.msra.mxu2 %v3992_v29  ;;  %877 = vmatpush.msra.mxu3 %v3994_v30 }
 0x264   :  { %786 = vmatpush.msra.mxu1 %v4048_v45 }
 0x265   :  { %858 = vmatpush.msra.mxu2 %v4002_v32  ;;  %878 = vmatpush.msra.mxu3 %v4004_v33 }
 0x266   :  { %787 = vmatpush.msra.mxu1 %v4052_v46 }
 0x267   :  { %859 = vmatpush.msra.mxu2 %v5616_v0  ;;  %879 = vmatpush.msra.mxu3 %v5617_v1  ;;  %v3624_v0 = vld [vmem:[#allocation8 + $0x58] sm:$0xff] }
 0x268   :  { %788 = vmatpush.msra.mxu1 %v5618_v2  ;;  %v683_v1 = vld [vmem:[#allocation5 + $0x60] sm:$0xff] }
 0x269   :  { %860 = vmatpush.msra.mxu2 %v5619_v3  ;;  %880 = vmatpush.msra.mxu3 %v5620_v4  ;;  %v684_v3 = vld [vmem:[#allocation5 + $0x68] sm:$0xff] }
 0x26a   :  { %789 = vmatpush.msra.mxu1 %v5621_v5 }
 0x26b   :  { %861 = vmatpush.msra.mxu2 %v5622_v6  ;;  %881 = vmatpush.msra.mxu3 %v5623_v7 }
 0x2c8   :  { %v527_v9 = vpop.f32.mrf.mxu1 }
 0x2c9   :  { %v574_v10 = vadd.f32 %v571_v8, %v527_v9 }
 0x2cb   :  { %v3396_v11 = vmul.f32 -1.442695, %v574_v10 }
 0x2cd   :  { %3502 = vpow2.f32 %v3396_v11 }
 0x2ce   :  { %v547_v13 = vpop.f32.mrf.mxu2 }
 0x2cf   :  { %v594_v14 = vadd.f32 %v572_v12, %v547_v13  ;;  %v567_v27 = vpop.f32.mrf.mxu3 }
 0x2d0   :  { %v614_v33 = vadd.f32 %v4178_v49, %v567_v27  ;;  %v685_v27 = vld [vmem:[#allocation5 + $0x70] sm:$0xff] }
 0x2d1   :  { %v3397_v15 = vmul.f32 -1.442695, %v594_v14 }
 0x2d3   :  { %v3503_v16 = vpop.eup %3502  ;;  %3504 = vpow2.f32 %v3397_v15 }
 0x2d4   :  { %v578_v17 = vadd.f32 1.0, %v3503_v16 }
 0x2d6   :  { %3506 = vrcp.f32 %v578_v17  ;;  %v590_v23 = vand.u32 2147483648, %v578_v17  ;;  %v588_v25 = vand.u32 2147483647, %v578_v17  ;;  %vm584_vm9 = vweird.f32 %v578_v17 }
 0x2d8   :  { %v591_v30 = vor.u32 1.1754944e-38, %v590_v23  ;;  %vm589_vm11 = vcmp.eq.f32.partialorder %v588_v25, 8.507059e+37 }
 0x2d9   :  { %v3505_v18 = vpop.eup %3504 }
 0x2da   :  { %v598_v19 = vadd.f32 1.0, %v3505_v18 }
 0x2dc   :  { %v3507_v20 = vpop.eup %3506  ;;  %3508 = vrcp.f32 %v598_v19  ;;  %v610_v45 = vand.u32 2147483648, %v598_v19  ;;  %v608_v56 = vand.u32 2147483647, %v598_v19  ;;  %vm604_vm13 = vweird.f32 %v598_v19 }
 0x2dd   :  { %v580_v21 = vmul.f32 %v3507_v20, %v578_v17  ;;  %vm585_vm8 = vweird.f32 %v3507_v20 }
 0x2de   :  { %vm586_vm10 = vmor %vm584_vm9, %vm585_vm8  ;;  %v611_v48 = vor.u32 1.1754944e-38, %v610_v45  ;;  %vm609_vm15 = vcmp.eq.f32.partialorder %v608_v56, 8.507059e+37 }
 0x2df   :  { %v581_v22 = vsub.f32 1.0, %v580_v21 }
 0x2e1   :  { %v582_v24 = vmul.f32 %v3507_v20, %v581_v22 }
 0x2e2   :  { %v3509_v26 = vpop.eup %3508 }
 0x2e3   :  { %v600_v28 = vmul.f32 %v3509_v26, %v598_v19  ;;  %v583_v29 = vadd.f32 %v3507_v20, %v582_v24  ;;  %vm605_vm12 = vweird.f32 %v3509_v26 }
 0x2e4   :  { %vm606_vm14 = vmor %vm604_vm13, %vm605_vm12 }
 0x2e5   :  { %v601_v31 = vsub.f32 1.0, %v600_v28  ;;  %v587_v32 = vsel %vm586_vm10, %v3507_v20, %v583_v29 }
 0x2e6   :  { %v592_v37 = vsel %vm589_vm11, %v591_v30, %v587_v32 }
 0x2e7   :  { %v602_v40 = vmul.f32 %v3509_v26, %v601_v31  ;;  %v615_v43 = vmul.f32 %v614_v33, %v592_v37 }
 0x2e9   :  { %v616_v35 = vadd.f32 %v615_v43, %v573_v34  ;;  %v603_v54 = vadd.f32 %v3509_v26, %v602_v40 }
 0x2eb   :  { %3510 = vtanh.f32 %v616_v35  ;;  %v607_v55 = vsel %vm606_vm14, %v3509_v26, %v603_v54 }
 0x2ec   :  { %v612_v42 = vsel %vm609_vm15, %v611_v48, %v607_v55  ;;  %v796_v55 = vld [vmem:[#allocation5 + $0x80] sm:$0xff] }
 0x2ed   :  { %v618_v50 = vsub.f32 1.0, %v612_v42  ;;  %v620_v60 = vmul.f32 %v612_v42, %v4291_v63  ;;  %v3623_v63 = vld [vmem:[#allocation8 + $0x70] sm:$0xff] }
 0x2f1   :  { %v3511_v51 = vpop.eup %3510 }
 0x2f2   :  { %v619_v61 = vmul.f32 %v3511_v51, %v618_v50  ;;  %v795_v51 = vld [vmem:[#allocation5 + $0x78] sm:$0xff] }
 0x2f4   :  { %v4346_v41 = vadd.f32 %v620_v60, %v619_v61 }
 0x2f6   :  { %638 = vmatmul.f32.vlgmr.msrb.gmra.mxu0 %v4346_v41  ;;  %658 = vmatmul.f32.vlgmr.msrb.gmra.mxu1 %v4346_v41 }
 0x2f7   :  { %678 = vmatmul.f32.vlgmr.msrb.gmra.mxu2 %v4346_v41  ;;  %886 = vmatpush.msrb.mxu0 %v3612_v47 }
 0x2f9   :  { %887 = vmatpush.msrb.mxu0 %v3613_v53 }
 0x2fb   :  { %888 = vmatpush.msrb.mxu0 %v3614_v52 }
 0x2fd   :  { %889 = vmatpush.msrb.mxu0 %v3615_v59 }
 0x2ff   :  { %890 = vmatpush.msrb.mxu0 %v3616_v57 }
 0x301   :  { %891 = vmatpush.msrb.mxu0 %v3617_v38  ;;  %v4361_v38 = vld [vmem:[#allocation10 + $0x168] sm:$0xff] }
 0x302   :  { %1028 = vmatpush.msrb.mxu1 %v4361_v38 }
 0x303   :  { %892 = vmatpush.msrb.mxu0 %v3618_v36  ;;  %v4363_v36 = vld [vmem:[#allocation10 + $0x170] sm:$0xff] }
 0x304   :  { %1048 = vmatpush.msrb.mxu2 %v4363_v36 }
 0x305   :  { %893 = vmatpush.msrb.mxu0 %v3619_v39  ;;  %v4365_v39 = vld [vmem:[#allocation10 + $0x150] sm:$0xff] }
 0x306   :  { %1029 = vmatpush.msrb.mxu1 %v4365_v39 }
 0x307   :  { %894 = vmatpush.msrb.mxu0 %v3620_v62  ;;  %v4369_v62 = vld [vmem:[#allocation10 + $0x158] sm:$0xff] }
 0x308   :  { %1049 = vmatpush.msrb.mxu2 %v4369_v62 }
 0x309   :  { %895 = vmatpush.msrb.mxu0 %v3621_v44  ;;  %v4371_v44 = vld [vmem:[#allocation10 + $0x138] sm:$0xff] }
 0x30a   :  { %1030 = vmatpush.msrb.mxu1 %v4371_v44 }
 0x30b   :  { %896 = vmatpush.msrb.mxu0 %v3622_v58  ;;  %v4373_v58 = vld [vmem:[#allocation10 + $0x140] sm:$0xff] }
 0x30c   :  { %1050 = vmatpush.msrb.mxu2 %v4373_v58 }
 0x30d   :  { %897 = vmatpush.msrb.mxu0 %v3623_v63 }
 0x30f   :  { %898 = vmatpush.msrb.mxu0 %v3624_v0  ;;  %v4377_v0 = vld [vmem:[#allocation10 + $0x120] sm:$0xff] }
 0x310   :  { %1031 = vmatpush.msrb.mxu1 %v4377_v0 }
 0x311   :  { %899 = vmatpush.msrb.mxu0 %v4052_v46 }
 0x313   :  { %900 = vmatpush.msrb.mxu0 %v5618_v2 }
 0x315   :  { %901 = vmatpush.msrb.mxu0 %v5621_v5 }
 0x373   :  { %v639_v4 = vpop.f32.mrf.mxu0  ;;  %v659_v6 = vpop.f32.mrf.mxu1 }
 0x374   :  { %v686_v7 = vadd.f32 %v683_v1, %v639_v4  ;;  %v706_v8 = vadd.f32 %v684_v3, %v659_v6  ;;  %v4379_v1 = vld [vmem:[#allocation10 + $0x128] sm:$0xff] }
 0x375   :  { %v4383_v6 = vld [vmem:[#allocation10 + $0x108] sm:$0xff]  ;;  %1051 = vmatpush.msrb.mxu2 %v4379_v1 }
 0x376   :  { %v3398_v9 = vmul.f32 -1.442695, %v686_v7  ;;  %v3399_v10 = vmul.f32 -1.442695, %v706_v8  ;;  %v4385_v7 = vld [vmem:[#allocation10 + $0x110] sm:$0xff]  ;;  %1032 = vmatpush.msrb.mxu1 %v4383_v6 }
 0x377   :  { %1052 = vmatpush.msrb.mxu2 %v4385_v7 }
 0x378   :  { %3512 = vpow2.f32 %v3398_v9 }
 0x379   :  { %3514 = vpow2.f32 %v3399_v10 }
 0x37a   :  { %v679_v22 = vpop.f32.mrf.mxu2 }
 0x37b   :  { %v726_v26 = vadd.f32 %v4178_v49, %v679_v22 }
 0x37e   :  { %v3513_v11 = vpop.eup %3512 }
 0x37f   :  { %v3515_v12 = vpop.eup %3514  ;;  %v690_v13 = vadd.f32 1.0, %v3513_v11 }
 0x380   :  { %v710_v14 = vadd.f32 1.0, %v3515_v12 }
 0x381   :  { %3516 = vrcp.f32 %v690_v13  ;;  %v702_v18 = vand.u32 2147483648, %v690_v13  ;;  %v700_v20 = vand.u32 2147483647, %v690_v13  ;;  %vm696_vm1 = vweird.f32 %v690_v13 }
 0x382   :  { %3518 = vrcp.f32 %v710_v14  ;;  %v722_v31 = vand.u32 2147483648, %v710_v14  ;;  %vm716_vm5 = vweird.f32 %v710_v14  ;;  %v720_v32 = vand.u32 2147483647, %v710_v14 }
 0x383   :  { %v703_v24 = vor.u32 1.1754944e-38, %v702_v18  ;;  %vm701_vm3 = vcmp.eq.f32.partialorder %v700_v20, 8.507059e+37 }
 0x384   :  { %v723_v37 = vor.u32 1.1754944e-38, %v722_v31  ;;  %vm721_vm7 = vcmp.eq.f32.partialorder %v720_v32, 8.507059e+37  ;;  %v4400_v31 = vld [vmem:[#allocation10 + $0xf8] sm:$0xff] }
 0x385   :  { %1053 = vmatpush.msrb.mxu2 %v4400_v31  ;;  %v4404_v32 = vld [vmem:[#allocation10 + $0xd8] sm:$0xff] }
 0x387   :  { %v3517_v46 = vpop.eup %3516 }
 0x388   :  { %v3519_v2 = vpop.eup %3518  ;;  %v692_v15 = vmul.f32 %v3517_v46, %v690_v13  ;;  %vm697_vm0 = vweird.f32 %v3517_v46 }
 0x389   :  { %v712_v5 = vmul.f32 %v3519_v2, %v710_v14  ;;  %vm698_vm2 = vmor %vm696_vm1, %vm697_vm0  ;;  %vm717_vm4 = vweird.f32 %v3519_v2 }
 0x38a   :  { %v693_v16 = vsub.f32 1.0, %v692_v15  ;;  %vm718_vm6 = vmor %vm716_vm5, %vm717_vm4 }
 0x38b   :  { %v713_v17 = vsub.f32 1.0, %v712_v5 }
 0x38c   :  { %v694_v19 = vmul.f32 %v3517_v46, %v693_v16 }
 0x38d   :  { %v714_v21 = vmul.f32 %v3519_v2, %v713_v17  ;;  %v797_v17 = vld [vmem:[#allocation5 + $0x88] sm:$0xff] }
 0x38e   :  { %v695_v23 = vadd.f32 %v3517_v46, %v694_v19 }
 0x38f   :  { %v715_v29 = vadd.f32 %v3519_v2, %v714_v21 }
 0x390   :  { %v699_v25 = vsel %vm698_vm2, %v3517_v46, %v695_v23 }
 0x391   :  { %v704_v28 = vsel %vm701_vm3, %v703_v24, %v699_v25  ;;  %v719_v34 = vsel %vm718_vm6, %v3519_v2, %v715_v29 }
 0x392   :  { %v727_v30 = vmul.f32 %v726_v26, %v704_v28  ;;  %v724_v40 = vsel %vm721_vm7, %v723_v37, %v719_v34  ;;  %v4408_v34 = vld [vmem:[#allocation10 + $0xc0] sm:$0xff]  ;;  %v4412_v37 = vld [vmem:[#allocation10 + $0xc8] sm:$0xff] }
 0x393   :  { %v730_v43 = vsub.f32 1.0, %v724_v40  ;;  %v732_v35 = vmul.f32 %v724_v40, %v4346_v41  ;;  %v4416_v40 = vld [vmem:[#allocation10 + $0xa8] sm:$0xff] }
 0x394   :  { %v728_v33 = vadd.f32 %v727_v30, %v685_v27  ;;  %v4398_v30 = vld [vmem:[#allocation10 + $0xf0] sm:$0xff] }
 0x395   :  { %1033 = vmatpush.msrb.mxu1 %v4398_v30 }
 0x396   :  { %3520 = vtanh.f32 %v728_v33  ;;  %v4406_v33 = vld [vmem:[#allocation10 + $0xe0] sm:$0xff] }
 0x397   :  { %1034 = vmatpush.msrb.mxu1 %v4404_v32  ;;  %1054 = vmatpush.msrb.mxu2 %v4406_v33 }
 0x399   :  { %1035 = vmatpush.msrb.mxu1 %v4408_v34  ;;  %1055 = vmatpush.msrb.mxu2 %v4412_v37 }
 0x39b   :  { %1036 = vmatpush.msrb.mxu1 %v4416_v40 }
 0x39c   :  { %v3521_v45 = vpop.eup %3520 }
 0x39d   :  { %v731_v56 = vmul.f32 %v3521_v45, %v730_v43  ;;  %v4418_v43 = vld [vmem:[#allocation10 + $0xb0] sm:$0xff] }
 0x39e   :  { %1056 = vmatpush.msrb.mxu2 %v4418_v43  ;;  %v4422_v45 = vld [vmem:[#allocation10 + $0x90] sm:$0xff] }
 0x39f   :  { %v4356_v54 = vadd.f32 %v732_v35, %v731_v56  ;;  %v4424_v56 = vld [vmem:[#allocation10 + $0x98] sm:$0xff]  ;;  %1037 = vmatpush.msrb.mxu1 %v4422_v45 }
 0x3a0   :  { %1057 = vmatpush.msrb.mxu2 %v4424_v56  ;;  %v4428_v35 = vld [vmem:[#allocation10 + $0x78] sm:$0xff] }
 0x3a1   :  { %750 = vmatmul.f32.vlgmr.msrb.gmra.mxu3 %v4356_v54  ;;  %770 = vmatmul.f32.vlgmr.msra.gmra.mxu0 %v4356_v54 }
 0x3a2   :  { %790 = vmatmul.f32.vlgmr.msra.gmra.mxu1 %v4356_v54 }
 0x3a3   :  { %1038 = vmatpush.msrb.mxu1 %v4428_v35 }
 0x41e   :  { %v771_v48 = vpop.f32.mrf.mxu0 }
 0x41f   :  { %v818_v42 = vadd.f32 %v796_v55, %v771_v48  ;;  %v791_v14 = vpop.f32.mrf.mxu1  ;;  %v4434_v55 = vld [vmem:[#allocation10 + $0x60] sm:$0xff]  ;;  %v4436_v48 = vld [vmem:[#allocation10 + $0x68] sm:$0xff] }
 0x420   :  { %v838_v15 = vadd.f32 %v4178_v49, %v791_v14  ;;  %1039 = vmatpush.msrb.mxu1 %v4434_v55  ;;  %v4502_v14 = vld [vmem:[#allocation11 + $0x108] sm:$0xff] }
 0x421   :  { %v3401_v50 = vmul.f32 -1.442695, %v818_v42  ;;  %v4440_v42 = vld [vmem:[#allocation10 + $0x48] sm:$0xff]  ;;  %5628 = vst [vmem:[#allocation23_spill] sm:$0xff] %v4502_v14 }
 0x422   :  { %1040 = vmatpush.msrb.mxu1 %v4440_v42 }
 0x423   :  { %3522 = vpow2.f32 %v3401_v50  ;;  %v4442_v50 = vld [vmem:[#allocation10 + $0x50] sm:$0xff] }
 0x424   :  { %v751_v61 = vpop.f32.mrf.mxu3 }
 0x425   :  { %v798_v60 = vadd.f32 %v795_v51, %v751_v61  ;;  %v4446_v51 = vld [vmem:[#allocation10 + $0x30] sm:$0xff]  ;;  %v4448_v61 = vld [vmem:[#allocation10 + $0x38] sm:$0xff] }
 0x426   :  { %1041 = vmatpush.msrb.mxu1 %v4446_v51 }
 0x427   :  { %v3400_v47 = vmul.f32 -1.442695, %v798_v60  ;;  %v4452_v60 = vld [vmem:[#allocation10 + $0x18] sm:$0xff] }
 0x428   :  { %1042 = vmatpush.msrb.mxu1 %v4452_v60 }
 0x429   :  { %v3523_v53 = vpop.eup %3522  ;;  %3524 = vpow2.f32 %v3400_v47  ;;  %v4454_v47 = vld [vmem:[#allocation10 + $0x20] sm:$0xff] }
 0x42a   :  { %v822_v41 = vadd.f32 1.0, %v3523_v53  ;;  %v4458_v53 = vld [vmem:[#allocation10] sm:$0xff] }
 0x42b   :  { %1043 = vmatpush.msrb.mxu1 %v4458_v53 }
 0x42c   :  { %3526 = vrcp.f32 %v822_v41  ;;  %v834_v19 = vand.u32 2147483648, %v822_v41  ;;  %vm828_vm13 = vweird.f32 %v822_v41  ;;  %v832_v21 = vand.u32 2147483647, %v822_v41 }
 0x42e   :  { %v835_v24 = vor.u32 1.1754944e-38, %v834_v19  ;;  %vm833_vm15 = vcmp.eq.f32.partialorder %v832_v21, 8.507059e+37  ;;  %v4526_v19 = vld [vmem:[#allocation11 + $0xe8] sm:$0xff]  ;;  %v908_v21 = vld [vmem:[#allocation5 + $0x98] sm:$0xff] }
 0x42f   :  { %v3525_v52 = vpop.eup %3524  ;;  %5632 = vst [vmem:[#allocation28_spill] sm:$0xff] %v4526_v19 }
 0x430   :  { %v802_v59 = vadd.f32 1.0, %v3525_v52  ;;  %v4464_v52 = vld [vmem:[#allocation11 + $0x168] sm:$0xff] }
 0x431   :  { %5624 = vst [vmem:[#allocation20_spill] sm:$0xff] %v4464_v52  ;;  %1136 = vmatpush.msra.mxu0 %v4464_v52 }
 0x432   :  { %3528 = vrcp.f32 %v802_v59  ;;  %v3527_v57 = vpop.eup %3526  ;;  %v814_v10 = vand.u32 2147483648, %v802_v59  ;;  %v812_v12 = vand.u32 2147483647, %v802_v59  ;;  %vm808_vm9 = vweird.f32 %v802_v59 }
 0x433   :  { %v824_v63 = vmul.f32 %v3527_v57, %v822_v41  ;;  %vm829_vm12 = vweird.f32 %v3527_v57  ;;  %v4460_v41 = vld [vmem:[#allocation10 + $0x8] sm:$0xff] }
 0x434   :  { %v815_v2 = vor.u32 1.1754944e-38, %v814_v10  ;;  %vm813_vm11 = vcmp.eq.f32.partialorder %v812_v12, 8.507059e+37  ;;  %vm830_vm14 = vmor %vm828_vm13, %vm829_vm12  ;;  %v4486_v10 = vld [vmem:[#allocation11 + $0x148] sm:$0xff] }
 0x435   :  { %v825_v8 = vsub.f32 1.0, %v824_v63  ;;  %v4473_v63 = vld [vmem:[#allocation11 + $0x150] sm:$0xff]  ;;  %v4493_v12 = vld [vmem:[#allocation11 + $0x128] sm:$0xff] }
 0x436   :  { %5625 = vst [vmem:[#allocation21_spill] sm:$0xff] %v4473_v63  ;;  %1137 = vmatpush.msra.mxu0 %v4473_v63 }
 0x437   :  { %v826_v13 = vmul.f32 %v3527_v57, %v825_v8  ;;  %v4482_v8 = vld [vmem:[#allocation11 + $0x138] sm:$0xff] }
 0x438   :  { %v3529_v3 = vpop.eup %3528  ;;  %5626 = vst [vmem:[#allocation26_spill] sm:$0xff] %v4482_v8  ;;  %1138 = vmatpush.msra.mxu0 %v4482_v8 }
 0x439   :  { %v804_v4 = vmul.f32 %v3529_v3, %v802_v59  ;;  %vm809_vm8 = vweird.f32 %v3529_v3  ;;  %v827_v18 = vadd.f32 %v3527_v57, %v826_v13  ;;  %v4466_v59 = vld [vmem:[#allocation11 + $0x170] sm:$0xff] }
 0x43a   :  { %vm810_vm10 = vmor %vm808_vm9, %vm809_vm8  ;;  %1156 = vmatpush.msra.mxu1 %v4466_v59  ;;  %v4495_v13 = vld [vmem:[#allocation11 + $0x130] sm:$0xff] }
 0x43b   :  { %v805_v9 = vsub.f32 1.0, %v804_v4  ;;  %v831_v23 = vsel %vm830_vm14, %v3527_v57, %v827_v18  ;;  %v4468_v57 = vld [vmem:[#allocation11 + $0x178] sm:$0xff]  ;;  %v4477_v4 = vld [vmem:[#allocation11 + $0x160] sm:$0xff] }
 0x43c   :  { %v836_v25 = vsel %vm833_vm15, %v835_v24, %v831_v23  ;;  %v4524_v18 = vld [vmem:[#allocation11 + $0xe0] sm:$0xff]  ;;  %v4533_v23 = vld [vmem:[#allocation11 + $0xc8] sm:$0xff]  ;;  %v4535_v24 = vld [vmem:[#allocation11 + $0xd0] sm:$0xff] }
 0x43d   :  { %v806_v11 = vmul.f32 %v3529_v3, %v805_v9  ;;  %v842_v26 = vsub.f32 1.0, %v836_v25  ;;  %v844_v28 = vmul.f32 %v836_v25, %v4356_v54  ;;  %v4430_v54 = vld [vmem:[#allocation10 + $0x80] sm:$0xff]  ;;  %5631 = vst [vmem:[#allocation25_spill] sm:$0xff] %v4524_v18  ;;  %v4539_v25 = vld [vmem:[#allocation11 + $0xa8] sm:$0xff] }
 0x43e   :  { %1058 = vmatpush.msrb.mxu2 %v4430_v54  ;;  %v4484_v9 = vld [vmem:[#allocation11 + $0x140] sm:$0xff]  ;;  %5634 = vst [vmem:[#allocation30_spill] sm:$0xff] %v4533_v23 }
 0x43f   :  { %v807_v46 = vadd.f32 %v3529_v3, %v806_v11  ;;  %v4491_v11 = vld [vmem:[#allocation11 + $0x120] sm:$0xff]  ;;  %5635 = vst [vmem:[#allocation31_spill] sm:$0xff] %v4535_v24 }
 0x440   :  { %1059 = vmatpush.msrb.mxu2 %v4436_v48  ;;  %5627 = vst [vmem:[#allocation22_spill] sm:$0xff] %v4491_v11  ;;  %1139 = vmatpush.msra.mxu0 %v4491_v11 }
 0x441   :  { %v811_v5 = vsel %vm810_vm10, %v3529_v3, %v807_v46  ;;  %v4475_v3 = vld [vmem:[#allocation11 + $0x158] sm:$0xff]  ;;  %v4504_v46 = vld [vmem:[#allocation11 + $0x110] sm:$0xff]  ;;  %5636 = vst [vmem:[#allocation32_spill] sm:$0xff] %v4539_v25 }
 0x442   :  { %v816_v16 = vsel %vm813_vm11, %v815_v2, %v811_v5  ;;  %1060 = vmatpush.msrb.mxu2 %v4442_v50  ;;  %1157 = vmatpush.msra.mxu1 %v4475_v3  ;;  %v4506_v2 = vld [vmem:[#allocation11 + $0x118] sm:$0xff] }
 0x443   :  { %v839_v20 = vmul.f32 %v838_v15, %v816_v16  ;;  %1140 = vmatpush.msra.mxu0 %v4502_v14  ;;  %v4513_v15 = vld [vmem:[#allocation11 + $0xf0] sm:$0xff]  ;;  %v4515_v5 = vld [vmem:[#allocation11 + $0xf8] sm:$0xff]  ;;  %v4517_v16 = vld [vmem:[#allocation11 + $0x100] sm:$0xff]  ;;  %v973_v14 = vstv %s4508_s24  ;;  %s2004_s24 = scalar_select %p2003_p2, 1, 0 }
 0x444   :  { %1061 = vmatpush.msrb.mxu2 %v4448_v61  ;;  %1158 = vmatpush.msra.mxu1 %v4484_v9  ;;  %5629 = vst [vmem:[#allocation27_spill] sm:$0xff] %v4513_v15 }
 0x445   :  { %v840_v22 = vadd.f32 %v839_v20, %v797_v17  ;;  %1141 = vmatpush.msra.mxu0 %v4513_v15  ;;  %v4522_v17 = vld [vmem:[#allocation11 + $0xd8] sm:$0xff]  ;;  %v907_v20 = vld [vmem:[#allocation5 + $0x90] sm:$0xff]  ;;  %v965_v15 = vstv %s4499_s1  ;;  %s3428_s1 = sld [smem:[#allocation4 + $0x7]]  ;;  %s2005_s25 = scvt.s32.f32 %s2004_s24 }
 0x446   :  { %1062 = vmatpush.msrb.mxu2 %v4454_v47  ;;  %1159 = vmatpush.msra.mxu1 %v4493_v12  ;;  %5630 = vst [vmem:[#allocation24_spill] sm:$0xff] %v4522_v17 }
 0x447   :  { %3530 = vtanh.f32 %v840_v22  ;;  %1142 = vmatpush.msra.mxu0 %v4522_v17  ;;  %v4531_v22 = vld [vmem:[#allocation11 + $0xc0] sm:$0xff]  ;;  %v4548_v17 = vld [vmem:[#allocation11 + $0x98] sm:$0xff]  ;;  %s2022_s26 = ssub.f32 1.0, %s2005_s25 }
 0x448   :  { %1063 = vmatpush.msrb.mxu2 %v4460_v41  ;;  %1160 = vmatpush.msra.mxu1 %v4504_v46  ;;  %5633 = vst [vmem:[#allocation29_spill] sm:$0xff] %v4531_v22 }
 0x449   :  { %1143 = vmatpush.msra.mxu0 %v4531_v22  ;;  %v4554_v22 = vld [vmem:[#allocation11 + $0xa0] sm:$0xff] }
 0x44a   :  { %1161 = vmatpush.msra.mxu1 %v4515_v5 }
 0x44b   :  { %1144 = vmatpush.msra.mxu0 %v4539_v25  ;;  %v4567_v25 = vld [vmem:[#allocation11 + $0x88] sm:$0xff] }
 0x44c   :  { %1162 = vmatpush.msra.mxu1 %v4524_v18  ;;  %v4563_v18 = vld [vmem:[#allocation11 + $0x80] sm:$0xff]  ;;  %5643 = vst [vmem:[#allocation39_spill] sm:$0xff] %v4567_v25 }
 0x44d   :  { %v3531_v27 = vpop.eup %3530  ;;  %5642 = vst [vmem:[#allocation38_spill] sm:$0xff] %v4563_v18 }
 0x44e   :  { %v843_v49 = vmul.f32 %v3531_v27, %v842_v26  ;;  %1163 = vmatpush.msra.mxu1 %v4533_v23  ;;  %v4541_v26 = vld [vmem:[#allocation11 + $0xb0] sm:$0xff]  ;;  %v4543_v27 = vld [vmem:[#allocation11 + $0xb8] sm:$0xff] }
 0x44f   :  { %5637 = vst [vmem:[#allocation33_spill] sm:$0xff] %v4541_v26 }
 0x450   :  { %v4393_v29 = vadd.f32 %v844_v28, %v843_v49  ;;  %v960_v49 = vlaneseq  ;;  %v4546_v28 = vld [vmem:[#allocation11 + $0x90] sm:$0xff]  ;;  %1164 = vmatpush.msra.mxu1 %v4541_v26  ;;  %v4569_v26 = vld [vmem:[#allocation11 + $0x60] sm:$0xff] }
 0x451   :  { %5638 = vst [vmem:[#allocation34_spill] sm:$0xff] %v4546_v28  ;;  %1145 = vmatpush.msra.mxu0 %v4546_v28  ;;  %v4595_v28 = vld [vmem:[#allocation11 + $0x50] sm:$0xff] }
 0x452   :  { %862 = vmatmul.f32.vlgmr.msra.gmra.mxu2 %v4393_v29  ;;  %882 = vmatmul.f32.vlgmr.msra.gmra.mxu3 %v4393_v29  ;;  %v4556_v63 = vand.u32 127, %v960_v49  ;;  %v4558_v52 = vshrl.u32 %v960_v49, 7  ;;  %5644 = vst [vmem:[#allocation40_spill] sm:$0xff] %v4569_v26  ;;  %v5647_v49 = vmov 0.0  }
 0x453   :  { %902 = vmatmul.f32.vlgmr.msrb.gmra.mxu0 %v4393_v29  ;;  %1176 = vmatpush.msra.mxu2 %v4468_v57  ;;  %5649 = vst [vmem:[#allocation44_spill] sm:$0xff] %v4595_v28 }
 0x454   :  { %5639 = vst [vmem:[#allocation35_spill] sm:$0xff] %v4556_v63  ;;  %1165 = vmatpush.msra.mxu1 %v4548_v17  ;;  %vm966_vm0 = vcmp.eq.s32.totalorder %v4556_v63, %v965_v15  ;;  %vm967_vm1 = vcmp.eq.s32.totalorder %v4558_v52, 0  ;;  %vm974_vm2 = vcmp.eq.s32.totalorder %v4556_v63, %v973_v14  ;;  %vm975_vm3 = vcmp.eq.s32.totalorder %v4558_v52, 1  ;;  %v4582_v15 = vld [vmem:[#allocation11 + $0x70] sm:$0xff] }
 0x455   :  { %1177 = vmatpush.msra.mxu2 %v4477_v4  ;;  %5640 = vst [vmem:[#allocation36_spill] sm:$0xff] %v4558_v52  ;;  %vm968_vm4 = vmand %vm966_vm0, %vm967_vm1  ;;  %v1021_v52 = vld [vmem:[#allocation10 + $0x148] sm:$0xff] }
 0x456   :  { %1166 = vmatpush.msra.mxu1 %v4563_v18  ;;  %5646 = vst [vmem:[#allocation42_spill] sm:$0xff] %v4582_v15  ;;  %v3404_v14 = vsel %vm968_vm4, 1.0, %v5647_v49  ;;  %vm976_vm5 = vmand %vm974_vm2, %vm975_vm3 }
 0x457   :  { %1178 = vmatpush.msra.mxu2 %v4486_v10 }
 0x459   :  { %1179 = vmatpush.msra.mxu2 %v4495_v13 }
 0x45b   :  { %1180 = vmatpush.msra.mxu2 %v4506_v2 }
 0x45d   :  { %1181 = vmatpush.msra.mxu2 %v4517_v16 }
 0x45f   :  { %1182 = vmatpush.msra.mxu2 %v4526_v19  ;;  %v4561_v19 = vld [vmem:[#allocation11 + $0x78] sm:$0xff] }
 0x460   :  { %5641 = vst [vmem:[#allocation37_spill] sm:$0xff] %v4561_v19  ;;  %1146 = vmatpush.msra.mxu0 %v4561_v19  ;;  %v4593_v19 = vld [vmem:[#allocation11 + $0x48] sm:$0xff] }
 0x461   :  { %1183 = vmatpush.msra.mxu2 %v4535_v24  ;;  %5648 = vst [vmem:[#allocation43_spill] sm:$0xff] %v4593_v19 }
 0x462   :  { %1147 = vmatpush.msra.mxu0 %v4569_v26  ;;  %v4613_v26 = vld [vmem:[#allocation11 + $0x20] sm:$0xff] }
 0x463   :  { %1184 = vmatpush.msra.mxu2 %v4543_v27 }
 0x464   :  { %1148 = vmatpush.msra.mxu0 %v4593_v19 }
 0x465   :  { %1185 = vmatpush.msra.mxu2 %v4554_v22 }
 0x467   :  { %1186 = vmatpush.msra.mxu2 %v4567_v25 }
 0x469   :  { %1187 = vmatpush.msra.mxu2 %v4582_v15 }
 0x4d5   :  { %v863_v11 = vpop.f32.mrf.mxu2  ;;  %v883_v8 = vpop.f32.mrf.mxu3 }
 0x4d6   :  { %v910_v23 = vadd.f32 %v907_v20, %v863_v11  ;;  %v930_v24 = vadd.f32 %v908_v21, %v883_v8  ;;  %v4576_v20 = vld [vmem:[#allocation11 + $0x68] sm:$0xff]  ;;  %v1027_v21 = vld [vmem:[#allocation10 + $0x178] sm:$0xff] }
 0x4d7   :  { %5645 = vst [vmem:[#allocation41_spill] sm:$0xff] %v4576_v20  ;;  %1068 = vmatpush.msrb.mxu3 %v1027_v21  ;;  %1167 = vmatpush.msra.mxu1 %v4576_v20  ;;  %v4617_v20 = vld [vmem:[#allocation11 + $0x28] sm:$0xff] }
 0x4d8   :  { %v3402_v8 = vmul.f32 -1.442695, %v910_v23  ;;  %v3403_v11 = vmul.f32 -1.442695, %v930_v24  ;;  %v3406_v23 = vsel %vm976_vm5, 1.0, %v5647_v49  ;;  %v1024_v24 = vld [vmem:[#allocation10 + $0x160] sm:$0xff] }
 0x4d9   :  { %v4591_v63 = vadd.f32 %v3406_v23, %v3404_v14  ;;  %1069 = vmatpush.msrb.mxu3 %v1024_v24  ;;  %v4604_v49 = vld [vmem:[#allocation11 + $0x38] sm:$0xff]  ;;  %1168 = vmatpush.msra.mxu1 %v4595_v28  ;;  %v4608_v14 = vld [vmem:[#allocation11 + $0x40] sm:$0xff]  ;;  %5654 = vst [vmem:[#allocation49_spill] sm:$0xff] %v4617_v20 }
 0x4da   :  { %3532 = vpow2.f32 %v3402_v8  ;;  %v4598_v8 = vld [vmem:[#allocation11 + $0x58] sm:$0xff]  ;;  %5652 = vst [vmem:[#allocation47_spill] sm:$0xff] %v4608_v14  ;;  %v4622_v28 = vld [vmem:[#allocation11] sm:$0xff] }
 0x4db   :  { %3534 = vpow2.f32 %v3403_v11  ;;  %5650 = vst [vmem:[#allocation45_spill] sm:$0xff] %v4598_v8  ;;  %1044 = vmatmul.f32.vlgmr.msrb.gmra.mxu1 %v4591_v63  ;;  %1064 = vmatmul.f32.vlgmr.msrb.gmra.mxu2 %v4591_v63  ;;  %v4602_v11 = vld [vmem:[#allocation11 + $0x30] sm:$0xff]  ;;  %v4611_v23 = vld [vmem:[#allocation11 + $0x18] sm:$0xff] }
 0x4dc   :  { %5651 = vst [vmem:[#allocation46_spill] sm:$0xff] %v4602_v11  ;;  %1188 = vmatpush.msra.mxu2 %v4598_v8  ;;  %1070 = vmatpush.msrb.mxu3 %v1021_v52  ;;  %v4624_v8 = vld [vmem:[#allocation11 + $0x8] sm:$0xff] }
 0x4dd   :  { %5653 = vst [vmem:[#allocation48_spill] sm:$0xff] %v4611_v23  ;;  %1149 = vmatpush.msra.mxu0 %v4602_v11  ;;  %1169 = vmatpush.msra.mxu1 %v4604_v49  ;;  %v4630_v11 = vld [vmem:[#allocation11 + $0x10] sm:$0xff] }
 0x4de   :  { %1189 = vmatpush.msra.mxu2 %v4608_v14  ;;  %5655 = vst [vmem:[#allocation50_spill] sm:$0xff] %v4622_v28  ;;  %v1015_v14 = vld [vmem:[#allocation10 + $0x118] sm:$0xff] }
 0x4df   :  { %5656 = vst [vmem:[#allocation51_spill] sm:$0xff] %v4624_v8  ;;  %1150 = vmatpush.msra.mxu0 %v4611_v23  ;;  %1170 = vmatpush.msra.mxu1 %v4613_v26  ;;  %v1009_v23 = vld [vmem:[#allocation10 + $0xe8] sm:$0xff] }
 0x4e0   :  { %v3533_v15 = vpop.eup %3532  ;;  %5657 = vst [vmem:[#allocation52_spill] sm:$0xff] %v4630_v11  ;;  %1190 = vmatpush.msra.mxu2 %v4617_v20  ;;  %v1006_v20 = vld [vmem:[#allocation10 + $0xd0] sm:$0xff] }
 0x4e1   :  { %v3535_v25 = vpop.eup %3534  ;;  %v4619_v19 = vadd.f32 1.0, %v3533_v15  ;;  %1151 = vmatpush.msra.mxu0 %v4622_v28  ;;  %1171 = vmatpush.msra.mxu1 %v4624_v8  ;;  %v1018_v15 = vld [vmem:[#allocation10 + $0x130] sm:$0xff] }
 0x4e2   :  { %v4626_v18 = vadd.f32 1.0, %v3535_v25  ;;  %1191 = vmatpush.msra.mxu2 %v4630_v11  ;;  %1071 = vmatpush.msrb.mxu3 %v1018_v15  ;;  %v1012_v25 = vld [vmem:[#allocation10 + $0x100] sm:$0xff] }
 0x4e3   :  { %3536 = vrcp.f32 %v4619_v19  ;;  %1380 = vmatpush.msrb.mxu0 %v4361_v38  ;;  %1400 = vmatpush.msrb.mxu1 %v4363_v36  ;;  %vm920_vm7 = vweird.f32 %v4619_v19 }
 0x4e4   :  { %3538 = vrcp.f32 %v4626_v18  ;;  %1072 = vmatpush.msrb.mxu3 %v1015_v14  ;;  %1420 = vmatpush.msrb.mxu2 %v1027_v21  ;;  %vm940_vm11 = vweird.f32 %v4626_v18 }
 0x4e5   :  { %1381 = vmatpush.msrb.mxu0 %v4365_v39  ;;  %1401 = vmatpush.msrb.mxu1 %v4369_v62  ;;  %v1003_v39 = vld [vmem:[#allocation10 + $0xb8] sm:$0xff]  ;;  %v926_v62 = vand.u32 2147483648, %v4619_v19 }
 0x4e6   :  { %1073 = vmatpush.msrb.mxu3 %v1012_v25  ;;  %1421 = vmatpush.msrb.mxu2 %v1024_v24 }
 0x4e7   :  { %1382 = vmatpush.msrb.mxu0 %v4371_v44  ;;  %1402 = vmatpush.msrb.mxu1 %v4373_v58  ;;  %v924_v44 = vand.u32 2147483647, %v4619_v19  ;;  %v1000_v58 = vld [vmem:[#allocation10 + $0xa0] sm:$0xff] }
 0x4e8   :  { %1074 = vmatpush.msrb.mxu3 %v1009_v23  ;;  %1422 = vmatpush.msrb.mxu2 %v1021_v52  ;;  %v903_v52 = vpop.f32.mrf.mxu0 }
 0x4e9   :  { %v3537_v28 = vpop.eup %3536  ;;  %1383 = vmatpush.msrb.mxu0 %v4377_v0  ;;  %1403 = vmatpush.msrb.mxu1 %v4379_v1  ;;  %v997_v1 = vld [vmem:[#allocation10 + $0x88] sm:$0xff]  ;;  %vm925_vm9 = vcmp.eq.f32.partialorder %v924_v44, 8.507059e+37  ;;  %v5676_v44 = vld [vmem:[#allocation21_spill] sm:$0xff] }
 0x4ea   :  { %v4642_v8 = vpop.eup %3538  ;;  %v916_v11 = vmul.f32 %v3537_v28, %v4619_v19  ;;  %1075 = vmatpush.msrb.mxu3 %v1006_v20  ;;  %1423 = vmatpush.msrb.mxu2 %v1018_v15  ;;  %vm921_vm6 = vweird.f32 %v3537_v28  ;;  %v927_v15 = vor.u32 1.1754944e-38, %v926_v62  ;;  %v991_v62 = vld [vmem:[#allocation10 + $0x58] sm:$0xff] }
 0x4eb   :  { %v936_v38 = vmul.f32 %v4642_v8, %v4626_v18  ;;  %1384 = vmatpush.msrb.mxu0 %v4383_v6  ;;  %1404 = vmatpush.msrb.mxu1 %v4385_v7  ;;  %vm922_vm8 = vmor %vm920_vm7, %vm921_vm6  ;;  %v3625_v6 = vld [vmem:[%s5491_s4] ss:$0 sm:$0xff]  ;;  %vm941_vm10 = vweird.f32 %v4642_v8  ;;  %s5295_s4 = sld [smem:[#allocation3 + $0x3]] }
 0x4ec   :  { %v917_v36 = vsub.f32 1.0, %v916_v11  ;;  %1076 = vmatpush.msrb.mxu3 %v1003_v39  ;;  %1424 = vmatpush.msrb.mxu2 %v1015_v14  ;;  %v950_v7 = vadd.f32 %v3625_v6, %v903_v52  ;;  %v994_v14 = vld [vmem:[#allocation10 + $0x70] sm:$0xff]  ;;  %vm4671_vm12 = vmor %vm940_vm11, %vm941_vm10  ;;  %v5678_v52 = vld [vmem:[#allocation22_spill] sm:$0xff] }
 0x4ed   :  { %v937_v21 = vsub.f32 1.0, %v936_v38  ;;  %1385 = vmatpush.msrb.mxu0 %v4398_v30  ;;  %1405 = vmatpush.msrb.mxu1 %v4400_v31  ;;  %v909_v30 = vld [vmem:[#allocation5 + $0xa0] sm:$0xff] }
 0x4ee   :  { %v918_v24 = vmul.f32 %v3537_v28, %v917_v36  ;;  %1077 = vmatpush.msrb.mxu3 %v1000_v58  ;;  %1425 = vmatpush.msrb.mxu2 %v1012_v25  ;;  %v946_v25 = vand.u32 2147483648, %v4626_v18 }
 0x4ef   :  { %v938_v11 = vmul.f32 %v4642_v8, %v937_v21  ;;  %1386 = vmatpush.msrb.mxu0 %v4404_v32  ;;  %1406 = vmatpush.msrb.mxu1 %v4406_v33  ;;  %v944_v32 = vand.u32 2147483647, %v4626_v18  ;;  %v985_v18 = vld [vmem:[#allocation10 + $0x28] sm:$0xff]  ;;  %v1247_v21 = vld [vmem:[#allocation13] sm:$0xff] }
 0x4f0   :  { %v919_v0 = vadd.f32 %v3537_v28, %v918_v24  ;;  %1078 = vmatpush.msrb.mxu3 %v997_v1  ;;  %1426 = vmatpush.msrb.mxu2 %v1009_v23  ;;  %v988_v23 = vld [vmem:[#allocation10 + $0x40] sm:$0xff]  ;;  %v5675_v24 = vld [vmem:[#allocation20_spill] sm:$0xff] }
 0x4f1   :  { %v939_v31 = vadd.f32 %v4642_v8, %v938_v11  ;;  %1387 = vmatpush.msrb.mxu0 %v4408_v34  ;;  %1407 = vmatpush.msrb.mxu1 %v4412_v37  ;;  %v947_v37 = vor.u32 1.1754944e-38, %v946_v25  ;;  %vm945_vm13 = vcmp.eq.f32.partialorder %v944_v32, 8.507059e+37  ;;  %v5683_v25 = vld [vmem:[#allocation32_spill] sm:$0xff]  ;;  %p2350_p3 = scmp.eq.s32.totalorder %s5295_s4, 1 }
 0x4f2   :  { %v923_v38 = vsel %vm922_vm8, %v3537_v28, %v919_v0  ;;  %1079 = vmatpush.msrb.mxu3 %v994_v14  ;;  %1427 = vmatpush.msrb.mxu2 %v1006_v20 }
 0x4f3   :  { %v928_v19 = vsel %vm925_vm9, %v927_v15, %v923_v38  ;;  %1388 = vmatpush.msrb.mxu0 %v4416_v40  ;;  %1408 = vmatpush.msrb.mxu1 %v4418_v43  ;;  %v943_v34 = vsel %vm4671_vm12, %v4642_v8, %v939_v31  ;;  %v982_v40 = vld [vmem:[#allocation10 + $0x10] sm:$0xff]  ;;  %v5682_v31 = vld [vmem:[#allocation29_spill] sm:$0xff]  ;;  %s2351_s29 = scalar_select %p2350_p3, 1, 0 }
 0x4f4   :  { %v951_v36 = vmul.f32 %v950_v7, %v928_v19  ;;  %1080 = vmatpush.msrb.mxu3 %v991_v62  ;;  %1428 = vmatpush.msrb.mxu2 %v1003_v39  ;;  %v948_v20 = vsel %vm945_vm13, %v947_v37, %v943_v34  ;;  %v5679_v15 = vld [vmem:[#allocation23_spill] sm:$0xff]  ;;  %v5686_v34 = vld [vmem:[#allocation40_spill] sm:$0xff] }
 0x4f5   :  { %1389 = vmatpush.msrb.mxu0 %v4422_v45  ;;  %1409 = vmatpush.msrb.mxu1 %v4424_v56  ;;  %v954_v43 = vsub.f32 1.0, %v948_v20  ;;  %v956_v8 = vmul.f32 %v948_v20, %v4393_v29  ;;  %v5660_v29 = vld [vmem:[#allocation25_spill] sm:$0xff]  ;;  %v5680_v38 = vld [vmem:[#allocation27_spill] sm:$0xff]  ;;  %s2352_s30 = scvt.s32.f32 %s2351_s29 }
 0x4f6   :  { %v952_v28 = vadd.f32 %v951_v36, %v909_v30  ;;  %1081 = vmatpush.msrb.mxu3 %v988_v23  ;;  %1429 = vmatpush.msrb.mxu2 %v1000_v58  ;;  %v5677_v58 = vld [vmem:[#allocation26_spill] sm:$0xff]  ;;  %v5681_v30 = vld [vmem:[#allocation24_spill] sm:$0xff]  ;;  %v5687_v37 = vld [vmem:[#allocation43_spill] sm:$0xff] }
 0x4f7   :  { %1390 = vmatpush.msrb.mxu0 %v4428_v35  ;;  %1410 = vmatpush.msrb.mxu1 %v4430_v54  ;;  %v5661_v54 = vld [vmem:[#allocation28_spill] sm:$0xff]  ;;  %v5684_v36 = vld [vmem:[#allocation34_spill] sm:$0xff] }
 0x4f8   :  { %3540 = vtanh.f32 %v952_v28  ;;  %1082 = vmatpush.msrb.mxu3 %v985_v18  ;;  %1430 = vmatpush.msrb.mxu2 %v997_v1  ;;  %v5685_v28 = vld [vmem:[#allocation37_spill] sm:$0xff] }
 0x4f9   :  { %1391 = vmatpush.msrb.mxu0 %v4434_v55  ;;  %1411 = vmatpush.msrb.mxu1 %v4436_v48  ;;  %v5662_v55 = vld [vmem:[#allocation30_spill] sm:$0xff]  ;;  %v5663_v48 = vld [vmem:[#allocation31_spill] sm:$0xff] }
 0x4fa   :  { %1083 = vmatpush.msrb.mxu3 %v982_v40  ;;  %1431 = vmatpush.msrb.mxu2 %v994_v14 }
 0x4fb   :  { %1084 = vmatmul.f32.vlgmr.msrb.gmra.mxu3 %v4591_v63  ;;  %1392 = vmatpush.msrb.mxu0 %v4440_v42  ;;  %v5664_v42 = vld [vmem:[#allocation33_spill] sm:$0xff]  ;;  %v5674_v63 = vld [vmem:[#allocation52_spill] sm:$0xff] }
 0x4fc   :  { %1412 = vmatpush.msrb.mxu1 %v4442_v50  ;;  %1432 = vmatpush.msrb.mxu2 %v991_v62  ;;  %v5665_v50 = vld [vmem:[#allocation38_spill] sm:$0xff] }
 0x4fd   :  { %1393 = vmatpush.msrb.mxu0 %v4446_v51  ;;  %v5666_v51 = vld [vmem:[#allocation39_spill] sm:$0xff] }
 0x4fe   :  { %v3541_v45 = vpop.eup %3540  ;;  %1413 = vmatpush.msrb.mxu1 %v4448_v61  ;;  %1433 = vmatpush.msrb.mxu2 %v988_v23  ;;  %v5667_v61 = vld [vmem:[#allocation41_spill] sm:$0xff] }
 0x4ff   :  { %v955_v56 = vmul.f32 %v3541_v45, %v954_v43  ;;  %1394 = vmatpush.msrb.mxu0 %v4452_v60  ;;  %v5668_v60 = vld [vmem:[#allocation42_spill] sm:$0xff] }
 0x500   :  { %1414 = vmatpush.msrb.mxu1 %v4454_v47  ;;  %1434 = vmatpush.msrb.mxu2 %v985_v18  ;;  %v5669_v47 = vld [vmem:[#allocation44_spill] sm:$0xff]  ;;  %v5688_v18 = vld [vmem:[#allocation46_spill] sm:$0xff] }
 0x501   :  { %v4691_v35 = vadd.f32 %v956_v8, %v955_v56  ;;  %1395 = vmatpush.msrb.mxu0 %v4458_v53  ;;  %v5670_v53 = vld [vmem:[#allocation45_spill] sm:$0xff]  ;;  %v5690_v8 = vld [vmem:[#allocation50_spill] sm:$0xff] }
 0x502   :  { %1415 = vmatpush.msrb.mxu1 %v4460_v41  ;;  %1435 = vmatpush.msrb.mxu2 %v982_v40  ;;  %v5671_v41 = vld [vmem:[#allocation47_spill] sm:$0xff]  ;;  %v5689_v40 = vld [vmem:[#allocation48_spill] sm:$0xff] }
 0x503   :  { %1152 = vmatmul.f32.vlgmr.msra.gmra.mxu0 %v4691_v35  ;;  %1172 = vmatmul.f32.vlgmr.msra.gmra.mxu1 %v4691_v35 }
 0x504   :  { %1192 = vmatmul.f32.vlgmr.msra.gmra.mxu2 %v4691_v35  ;;  %1508 = vmatpush.msra.mxu0 %v4466_v59  ;;  %v5672_v59 = vld [vmem:[#allocation49_spill] sm:$0xff] }
 0x505   :  { %1528 = vmatpush.msra.mxu1 %v4468_v57  ;;  %v5673_v57 = vld [vmem:[#allocation51_spill] sm:$0xff] }
 0x506   :  { %1509 = vmatpush.msra.mxu0 %v4475_v3  ;;  %v1262_v3 = vld [vmem:[#allocation13 + $0x78] sm:$0xff] }
 0x507   :  { %1529 = vmatpush.msra.mxu1 %v4477_v4  ;;  %v1261_v4 = vld [vmem:[#allocation13 + $0x70] sm:$0xff]  ;;  %1266 = vmatpush.msra.mxu3 %v1262_v3 }
 0x508   :  { %1510 = vmatpush.msra.mxu0 %v4484_v9  ;;  %1612 = vmatpush.msra.mxu2 %v1262_v3  ;;  %v1260_v9 = vld [vmem:[#allocation13 + $0x68] sm:$0xff] }
 0x509   :  { %1530 = vmatpush.msra.mxu1 %v4486_v10  ;;  %1267 = vmatpush.msra.mxu3 %v1261_v4  ;;  %v1259_v10 = vld [vmem:[#allocation13 + $0x60] sm:$0xff] }
 0x50a   :  { %1511 = vmatpush.msra.mxu0 %v4493_v12  ;;  %1613 = vmatpush.msra.mxu2 %v1261_v4  ;;  %v1258_v12 = vld [vmem:[#allocation13 + $0x58] sm:$0xff] }
 0x50b   :  { %1531 = vmatpush.msra.mxu1 %v4495_v13  ;;  %1268 = vmatpush.msra.mxu3 %v1260_v9  ;;  %v1257_v13 = vld [vmem:[#allocation13 + $0x50] sm:$0xff] }
 0x50c   :  { %1512 = vmatpush.msra.mxu0 %v4504_v46  ;;  %1614 = vmatpush.msra.mxu2 %v1260_v9  ;;  %v1256_v46 = vld [vmem:[#allocation13 + $0x48] sm:$0xff] }
 0x50d   :  { %1532 = vmatpush.msra.mxu1 %v4506_v2  ;;  %1269 = vmatpush.msra.mxu3 %v1259_v10  ;;  %v1255_v2 = vld [vmem:[#allocation13 + $0x40] sm:$0xff] }
 0x50e   :  { %1513 = vmatpush.msra.mxu0 %v4515_v5  ;;  %1615 = vmatpush.msra.mxu2 %v1259_v10  ;;  %v1254_v5 = vld [vmem:[#allocation13 + $0x38] sm:$0xff] }
 0x50f   :  { %1533 = vmatpush.msra.mxu1 %v4517_v16  ;;  %1270 = vmatpush.msra.mxu3 %v1258_v12  ;;  %v1253_v16 = vld [vmem:[#allocation13 + $0x30] sm:$0xff] }
 0x510   :  { %1514 = vmatpush.msra.mxu0 %v5660_v29  ;;  %1616 = vmatpush.msra.mxu2 %v1258_v12 }
 0x511   :  { %1534 = vmatpush.msra.mxu1 %v5661_v54  ;;  %1271 = vmatpush.msra.mxu3 %v1257_v13 }
 0x512   :  { %1515 = vmatpush.msra.mxu0 %v5662_v55  ;;  %1617 = vmatpush.msra.mxu2 %v1257_v13 }
 0x513   :  { %1535 = vmatpush.msra.mxu1 %v5663_v48  ;;  %1272 = vmatpush.msra.mxu3 %v1256_v46  ;;  %v4752_v48 = vld [vmem:[%s5494_s7] ss:$0 sm:$0xff] }
 0x514   :  { %1516 = vmatpush.msra.mxu0 %v5664_v42  ;;  %1618 = vmatpush.msra.mxu2 %v1256_v46 }
 0x515   :  { %1536 = vmatpush.msra.mxu1 %v4543_v27  ;;  %1273 = vmatpush.msra.mxu3 %v1255_v2  ;;  %v1249_v27 = vld [vmem:[#allocation13 + $0x10] sm:$0xff] }
 0x516   :  { %1517 = vmatpush.msra.mxu0 %v4548_v17  ;;  %1619 = vmatpush.msra.mxu2 %v1255_v2  ;;  %v1252_v17 = vld [vmem:[#allocation13 + $0x28] sm:$0xff] }
 0x517   :  { %1537 = vmatpush.msra.mxu1 %v4554_v22  ;;  %1274 = vmatpush.msra.mxu3 %v1254_v5  ;;  %v1251_v22 = vld [vmem:[#allocation13 + $0x20] sm:$0xff] }
 0x518   :  { %1518 = vmatpush.msra.mxu0 %v5665_v50  ;;  %1620 = vmatpush.msra.mxu2 %v1254_v5 }
 0x519   :  { %1538 = vmatpush.msra.mxu1 %v5666_v51  ;;  %1275 = vmatpush.msra.mxu3 %v1253_v16 }
 0x51a   :  { %1519 = vmatpush.msra.mxu0 %v5667_v61  ;;  %1621 = vmatpush.msra.mxu2 %v1253_v16 }
 0x51b   :  { %1539 = vmatpush.msra.mxu1 %v5668_v60  ;;  %1276 = vmatpush.msra.mxu3 %v1252_v17 }
 0x51c   :  { %1520 = vmatpush.msra.mxu0 %v5669_v47  ;;  %1622 = vmatpush.msra.mxu2 %v1252_v17 }
 0x51d   :  { %1540 = vmatpush.msra.mxu1 %v5670_v53  ;;  %1277 = vmatpush.msra.mxu3 %v1251_v22 }
 0x51e   :  { %1521 = vmatpush.msra.mxu0 %v4604_v49  ;;  %1623 = vmatpush.msra.mxu2 %v1251_v22  ;;  %v1248_v49 = vld [vmem:[#allocation13 + $0x8] sm:$0xff] }
 0x51f   :  { %1541 = vmatpush.msra.mxu1 %v5671_v41 }
 0x520   :  { %1522 = vmatpush.msra.mxu0 %v4613_v26  ;;  %v1250_v26 = vld [vmem:[#allocation13 + $0x18] sm:$0xff] }
 0x521   :  { %1542 = vmatpush.msra.mxu1 %v5672_v59  ;;  %1278 = vmatpush.msra.mxu3 %v1250_v26 }
 0x522   :  { %1523 = vmatpush.msra.mxu0 %v5673_v57  ;;  %1624 = vmatpush.msra.mxu2 %v1250_v26  ;;  %v4763_v26 = vld [vmem:[%s5496_s9] ss:$0 sm:$0xff] }
 0x523   :  { %1543 = vmatpush.msra.mxu1 %v5674_v63  ;;  %1279 = vmatpush.msra.mxu3 %v1249_v27 }
 0x524   :  { %1625 = vmatpush.msra.mxu2 %v1249_v27 }
 0x525   :  { %1280 = vmatpush.msra.mxu3 %v1248_v49 }
 0x526   :  { %1626 = vmatpush.msra.mxu2 %v1248_v49 }
 0x527   :  { %1281 = vmatpush.msra.mxu3 %v1247_v21 }
 0x528   :  { %1627 = vmatpush.msra.mxu2 %v1247_v21  ;;  %v5691_v21 = vld [vmem:[#allocation35_spill] sm:$0xff] }
 0x529   :  { %1488 = vmatpush.msrb.mxu3 %v5675_v24 }
 0x52b   :  { %1489 = vmatpush.msrb.mxu3 %v5676_v44 }
 0x52d   :  { %1490 = vmatpush.msrb.mxu3 %v5677_v58 }
 0x52f   :  { %1491 = vmatpush.msrb.mxu3 %v5678_v52 }
 0x531   :  { %1492 = vmatpush.msrb.mxu3 %v5679_v15  ;;  %v1320_v15 = vstv %s3412_s12 }
 0x532   :  { %vm1321_vm11 = vcmp.eq.s32.totalorder %v5691_v21, %v1320_v15 }
 0x533   :  { %1493 = vmatpush.msrb.mxu3 %v5680_v38  ;;  %vm1322_vm13 = vmand %vm1321_vm11, %vm975_vm3  ;;  %v5693_v38 = vmov 0.0  }
 0x535   :  { %1494 = vmatpush.msrb.mxu3 %v5681_v30 }
 0x537   :  { %1495 = vmatpush.msrb.mxu3 %v5682_v31 }
 0x539   :  { %1496 = vmatpush.msrb.mxu3 %v5683_v25 }
 0x53b   :  { %1497 = vmatpush.msrb.mxu3 %v5684_v36 }
 0x53d   :  { %1498 = vmatpush.msrb.mxu3 %v5685_v28 }
 0x53f   :  { %1499 = vmatpush.msrb.mxu3 %v5686_v34 }
 0x541   :  { %1500 = vmatpush.msrb.mxu3 %v5687_v37 }
 0x543   :  { %1501 = vmatpush.msrb.mxu3 %v5688_v18 }
 0x545   :  { %1502 = vmatpush.msrb.mxu3 %v5689_v40 }
 0x547   :  { %1503 = vmatpush.msrb.mxu3 %v5690_v8 }
 0x558   :  { %v1045_v39 = vpop.f32.mrf.mxu1 }
 0x55e   :  { %v1065_v11 = vpop.f32.mrf.mxu2 }
 0x57e   :  { %v1085_v59 = vpop.f32.mrf.mxu3 }
 0x580   :  { %v1153_v0 = vpop.f32.mrf.mxu0  ;;  %v1173_v1 = vpop.f32.mrf.mxu1 }
 0x581   :  { %v1196_v6 = vadd.f32 %v1153_v0, %v1045_v39  ;;  %v1216_v7 = vadd.f32 %v1173_v1, %v1065_v11  ;;  %v1313_v1 = vstv %s3410_s11  ;;  %s2369_s11 = ssub.f32 1.0, %s2352_s30 }
 0x582   :  { %vm1314_vm10 = vcmp.eq.s32.totalorder %v5691_v21, %v1313_v1 }
 0x583   :  { %v3407_v14 = vmul.f32 -1.442695, %v1196_v6  ;;  %v3408_v19 = vmul.f32 -1.442695, %v1216_v7  ;;  %vm1315_vm12 = vmand %vm1314_vm10, %vm967_vm1 }
 0x585   :  { %3542 = vpow2.f32 %v3407_v14  ;;  %v3411_v14 = vsel %vm1315_vm12, 1.0, %v5693_v38 }
 0x586   :  { %3544 = vpow2.f32 %v3408_v19  ;;  %v3413_v19 = vsel %vm1322_vm13, 1.0, %v5693_v38 }
 0x587   :  { %v1193_v61 = vpop.f32.mrf.mxu2  ;;  %v1325_v36 = vadd.f32 %v3413_v19, %v3411_v14 }
 0x588   :  { %v1239_v53 = vadd.f32 %v4752_v48, %v1193_v61  ;;  %v4797_v61 = vld [vmem:[#allocation11 + $0xd8] sm:$0xff] }
 0x589   :  { %5700 = vst [vmem:[#allocation39_spill] sm:$0xff] %v4797_v61 }
 0x58b   :  { %v3543_v62 = vpop.eup %3542 }
 0x58c   :  { %v3545_v32 = vpop.eup %3544  ;;  %v1200_v33 = vadd.f32 1.0, %v3543_v62  ;;  %v1326_v62 = vstv %s1311_s3 }
 0x58d   :  { %v1220_v23 = vadd.f32 1.0, %v3545_v32  ;;  %v1327_v28 = vmul.f32 %v1326_v62, %v1325_v36 }
 0x58e   :  { %3546 = vrcp.f32 %v1200_v33  ;;  %v1212_v55 = vand.u32 2147483648, %v1200_v33  ;;  %v1210_v50 = vand.u32 2147483647, %v1200_v33  ;;  %vm1206_vm15 = vweird.f32 %v1200_v33 }
 0x58f   :  { %3548 = vrcp.f32 %v1220_v23  ;;  %v1232_v3 = vand.u32 2147483648, %v1220_v23  ;;  %vm1226_vm5 = vweird.f32 %v1220_v23  ;;  %v1230_v9 = vand.u32 2147483647, %v1220_v23 }
 0x590   :  { %v1213_v47 = vor.u32 1.1754944e-38, %v1212_v55  ;;  %vm1211_vm2 = vcmp.eq.f32.partialorder %v1210_v50, 8.507059e+37  ;;  %v4794_v50 = vld [vmem:[#allocation11 + $0xf0] sm:$0xff] }
 0x591   :  { %v1233_v13 = vor.u32 1.1754944e-38, %v1232_v3  ;;  %vm1231_vm7 = vcmp.eq.f32.partialorder %v1230_v9, 8.507059e+37  ;;  %5699 = vst [vmem:[#allocation38_spill] sm:$0xff] %v4794_v50  ;;  %v4811_v9 = vld [vmem:[#allocation11 + $0x60] sm:$0xff] }
 0x592   :  { %5705 = vst [vmem:[#allocation47_spill] sm:$0xff] %v4811_v9 }
 0x594   :  { %v3547_v20 = vpop.eup %3546 }
 0x595   :  { %v3549_v43 = vpop.eup %3548  ;;  %v1202_v45 = vmul.f32 %v3547_v20, %v1200_v33  ;;  %vm1207_vm14 = vweird.f32 %v3547_v20  ;;  %v1329_v33 = vstv %s1328_s14  ;;  %s3441_s14 = sld [smem:[#allocation3 + $0x4]] }
 0x596   :  { %v1222_v56 = vmul.f32 %v3549_v43, %v1220_v23  ;;  %vm1208_vm0 = vmor %vm1206_vm15, %vm1207_vm14  ;;  %vm1227_vm4 = vweird.f32 %v3549_v43 }
 0x597   :  { %v1203_v29 = vsub.f32 1.0, %v1202_v45  ;;  %vm1228_vm6 = vmor %vm1226_vm5, %vm1227_vm4  ;;  %v4785_v45 = vld [vmem:[#allocation11 + $0x138] sm:$0xff] }
 0x598   :  { %v1223_v54 = vsub.f32 1.0, %v1222_v56  ;;  %5696 = vst [vmem:[#allocation30_spill] sm:$0xff] %v4785_v45  ;;  %v4788_v56 = vld [vmem:[#allocation11 + $0x120] sm:$0xff] }
 0x599   :  { %v1204_v42 = vmul.f32 %v3547_v20, %v1203_v29  ;;  %5697 = vst [vmem:[#allocation31_spill] sm:$0xff] %v4788_v56  ;;  %v4791_v29 = vld [vmem:[#allocation11 + $0x108] sm:$0xff] }
 0x59a   :  { %v1224_v51 = vmul.f32 %v3549_v43, %v1223_v54  ;;  %5698 = vst [vmem:[#allocation33_spill] sm:$0xff] %v4791_v29 }
 0x59b   :  { %v1205_v60 = vadd.f32 %v3547_v20, %v1204_v42  ;;  %p2697_p4 = scmp.eq.s32.totalorder %s3441_s14, 1 }
 0x59c   :  { %v1225_v63 = vadd.f32 %v3549_v43, %v1224_v51 }
 0x59d   :  { %v1209_v41 = vsel %vm1208_vm0, %v3547_v20, %v1205_v60  ;;  %v4779_v20 = vld [vmem:[#allocation11 + $0x168] sm:$0xff]  ;;  %v4800_v60 = vld [vmem:[#allocation11 + $0xc0] sm:$0xff] }
 0x59e   :  { %v1214_v57 = vsel %vm1211_vm2, %v1213_v47, %v1209_v41  ;;  %v1229_v12 = vsel %vm1228_vm6, %v3549_v43, %v1225_v63  ;;  %5694 = vst [vmem:[#allocation25_spill] sm:$0xff] %v4779_v20  ;;  %v4782_v43 = vld [vmem:[#allocation11 + $0x150] sm:$0xff]  ;;  %v4803_v47 = vld [vmem:[#allocation11 + $0xa8] sm:$0xff]  ;;  %v4809_v63 = vld [vmem:[#allocation11 + $0x78] sm:$0xff] }
 0x59f   :  { %v1240_v4 = vmul.f32 %v1239_v53, %v1214_v57  ;;  %v1234_v46 = vsel %vm1231_vm7, %v1233_v13, %v1229_v12  ;;  %5695 = vst [vmem:[#allocation28_spill] sm:$0xff] %v4782_v43  ;;  %v4806_v57 = vld [vmem:[#allocation11 + $0x90] sm:$0xff]  ;;  %v4815_v12 = vld [vmem:[#allocation11 + $0x48] sm:$0xff] }
 0x5a0   :  { %v1243_v2 = vsub.f32 1.0, %v1234_v46  ;;  %v1245_v17 = vmul.f32 %v1234_v46, %v4691_v35  ;;  %5701 = vst [vmem:[#allocation41_spill] sm:$0xff] %v4800_v60 }
 0x5a1   :  { %v1241_v10 = vadd.f32 %v1240_v4, %v1085_v59  ;;  %5702 = vst [vmem:[#allocation42_spill] sm:$0xff] %v4803_v47 }
 0x5a2   :  { %5703 = vst [vmem:[#allocation44_spill] sm:$0xff] %v4806_v57 }
 0x5a3   :  { %3550 = vtanh.f32 %v1241_v10  ;;  %5704 = vst [vmem:[#allocation45_spill] sm:$0xff] %v4809_v63 }
 0x5a4   :  { %5706 = vst [vmem:[#allocation49_spill] sm:$0xff] %v4815_v12 }
 0x5a9   :  { %v3551_v5 = vpop.eup %3550 }
 0x5aa   :  { %v1244_v16 = vmul.f32 %v3551_v5, %v1243_v2 }
 0x5ac   :  { %v4756_v22 = vadd.f32 %v1245_v17, %v1244_v16 }
 0x5ae   :  { %1282 = vmatmul.f32.vlgmr.msra.gmra.mxu3 %v4756_v22 }
 0x5b6   :  { %1504 = vmatmul.f32.vlgmr.msrb.gmra.mxu3 %v4756_v22 }
 0x631   :  { %v1283_v27 = vpop.f32.mrf.mxu3 }
 0x632   :  { %v1284_v49 = vadd.f32 %v4763_v26, %v1283_v27 }
 0x634   :  { %1286 = vst [vmem:[#allocation14] sm:$0xff] %v1284_v49  ;;  %1287 = vmax.xlane.f32.xlu0 %v1284_v49 }
 0x639   :  { %v1505_v54 = vpop.f32.mrf.mxu3 }
 0x6a7   :  { %v1288_v39 = vpop.xlane.xlu0 %1287 }
 0x6a8   :  { %vm1289_vm8 = vcmp.eq.f32.partialorder %v1284_v49, %v1288_v39 }
 0x6a9   :  { %v1290_v35 = vsel %vm1289_vm8, %v5691_v21, 128 }
 0x6aa   :  { %v1292_v24 = vshra.s32 %v1290_v35, 16  ;;  %v1291_v58 = vand.u32 65535, %v1290_v35 }
 0x6ac   :  { %v1294_v44 = vcvt.s32.f32 %v1292_v24  ;;  %v1293_v11 = vcvt.s32.f32 %v1291_v58 }
 0x6ae   :  { %1295 = vmin.xlane.f32.xlu0 %v1294_v44 }
 0x721   :  { %v1296_v52 = vpop.xlane.xlu0 %1295 }
 0x722   :  { %vm1297_vm9 = vcmp.eq.f32.partialorder %v1294_v44, %v1296_v52  ;;  %v1302_v7 = vcvt.f32.s32 %v1296_v52 }
 0x723   :  { %v1298_v0 = vsel %vm1297_vm9, %v1293_v11, inf }
 0x724   :  { %1299 = vmin.xlane.f32.xlu1 %v1298_v0  ;;  %v1303_v31 = vshll.u32 %v1302_v7, 16 }
 0x797   :  { %v1300_v30 = vpop.xlane.xlu1 %1299 }
 0x798   :  { %v1301_v25 = vcvt.f32.s32 %v1300_v30 }
 0x79a   :  { %v1304_v32 = vadd.s32 %v1303_v31, %v1301_v25 }
 0x79c   :  { %vm1305_vm14 = vcmp.eq.s32.totalorder %v5691_v21, %v1304_v32 }
 0x79d   :  { %v3409_v23 = vsel %vm1305_vm14, 1.0, %v5693_v38 }
 0x79e   :  { %v1330_v34 = vmul.f32 %v3409_v23, %v1329_v33 }
 0x7a0   :  { %v1331_v37 = vadd.f32 %v1330_v34, %v1327_v28 }
 0x7a2   :  { %1396 = vmatmul.f32.vlgmr.msrb.gmra.mxu0 %v1331_v37  ;;  %1416 = vmatmul.f32.vlgmr.msrb.gmra.mxu1 %v1331_v37 }
 0x7a3   :  { %1436 = vmatmul.f32.vlgmr.msrb.gmra.mxu2 %v1331_v37 }
 0x7a4   :  { %1835 = vmatpush.msrb.mxu2 %v4779_v20  ;;  %v1676_v20 = vstv %s1675_s19  ;;  %s3450_s19 = sld [smem:[#allocation4 + $0xc]] }
 0x7a6   :  { %1836 = vmatpush.msrb.mxu2 %v4782_v43  ;;  %v1673_v43 = vstv %s1658_s18  ;;  %s3449_s18 = sld [smem:[#allocation3 + $0x5]] }
 0x7a8   :  { %1837 = vmatpush.msrb.mxu2 %v4785_v45 }
 0x7aa   :  { %1524 = vmatmul.f32.vlgmr.msra.gmra.mxu0 %v4756_v22  ;;  %1544 = vmatmul.f32.vlgmr.msra.gmra.mxu1 %v4756_v22 }
 0x7ab   :  { %1838 = vmatpush.msrb.mxu2 %v4788_v56 }
 0x7ac   :  { %p3044_p5 = scmp.eq.s32.totalorder %s3449_s18, 1 }
 0x7ad   :  { %1839 = vmatpush.msrb.mxu2 %v4791_v29 }
 0x7ae   :  { %s3045_s21 = scalar_select %p3044_p5, 1, 0 }
 0x7af   :  { %1840 = vmatpush.msrb.mxu2 %v4794_v50  ;;  %v1660_v50 = vstv %s3418_s16  ;;  %s2698_s16 = scalar_select %p2697_p4, 1, 0 }
 0x7b0   :  { %vm1661_vm11 = vcmp.eq.s32.totalorder %v5691_v21, %v1660_v50  ;;  %s3046_s2 = scvt.s32.f32 %s3045_s21 }
 0x7b1   :  { %1841 = vmatpush.msrb.mxu2 %v4797_v61  ;;  %v4982_v61 = vld [vmem:[#allocation11 + $0x10] sm:$0xff]  ;;  %vm1662_vm13 = vmand %vm1661_vm11, %vm967_vm1 }
 0x7b2   :  { %5709 = vst [vmem:[#allocation20_spill] sm:$0xff] %v4982_v61  ;;  %s3063_s22 = ssub.f32 1.0, %s3046_s2 }
 0x7b3   :  { %1842 = vmatpush.msrb.mxu2 %v4800_v60  ;;  %v1788_v60 = vld [vmem:[#allocation11 + $0x8] sm:$0xff] }
 0x7b5   :  { %1843 = vmatpush.msrb.mxu2 %v4803_v47  ;;  %v4979_v47 = vld [vmem:[#allocation11 + $0x28] sm:$0xff] }
 0x7b6   :  { %5708 = vst [vmem:[#allocation52_spill] sm:$0xff] %v4979_v47 }
 0x7b7   :  { %1844 = vmatpush.msrb.mxu2 %v4806_v57  ;;  %v4976_v57 = vld [vmem:[#allocation11 + $0x40] sm:$0xff] }
 0x7b8   :  { %5707 = vst [vmem:[#allocation51_spill] sm:$0xff] %v4976_v57 }
 0x7b9   :  { %1845 = vmatpush.msrb.mxu2 %v4809_v63  ;;  %v4974_v63 = vld [vmem:[#allocation11 + $0x58] sm:$0xff] }
 0x7bb   :  { %1846 = vmatpush.msrb.mxu2 %v4811_v9  ;;  %v4967_v9 = vld [vmem:[#allocation11 + $0x70] sm:$0xff] }
 0x7bd   :  { %1847 = vmatpush.msrb.mxu2 %v4815_v12  ;;  %v1800_v12 = vld [vmem:[#allocation11 + $0x68] sm:$0xff] }
 0x7bf   :  { %1848 = vmatpush.msrb.mxu2 %v5688_v18 }
 0x7c1   :  { %1849 = vmatpush.msrb.mxu2 %v5689_v40 }
 0x7c3   :  { %1850 = vmatpush.msrb.mxu2 %v5690_v8 }
 0x81f   :  { %v1397_v55 = vpop.f32.mrf.mxu0  ;;  %v1417_v53 = vpop.f32.mrf.mxu1 }
 0x820   :  { %v1548_v42 = vadd.f32 %v1505_v54, %v1397_v55 }
 0x822   :  { %v3414_v51 = vmul.f32 -1.442695, %v1548_v42  ;;  %v4835_v42 = vld [vmem:[#allocation10 + $0x170] sm:$0xff] }
 0x823   :  { %1747 = vmatpush.msrb.mxu0 %v4835_v42 }
 0x824   :  { %3552 = vpow2.f32 %v3414_v51  ;;  %v1721_v51 = vld [vmem:[#allocation10 + $0x150] sm:$0xff] }
 0x826   :  { %v1437_v8 = vpop.f32.mrf.mxu2 }
 0x827   :  { %v1525_v41 = vpop.f32.mrf.mxu0  ;;  %v1545_v39 = vpop.f32.mrf.mxu1 }
 0x828   :  { %v1568_v59 = vadd.f32 %v1525_v41, %v1417_v53  ;;  %v1588_v40 = vadd.f32 %v4752_v48, %v1545_v39  ;;  %v1718_v53 = vld [vmem:[#allocation10 + $0x138] sm:$0xff]  ;;  %v4840_v41 = vld [vmem:[#allocation10 + $0x140] sm:$0xff]  ;;  %v4862_v39 = vld [vmem:[#allocation10 + $0xc8] sm:$0xff] }
 0x82a   :  { %v3553_v3 = vpop.eup %3552  ;;  %v3415_v4 = vmul.f32 -1.442695, %v1568_v59  ;;  %v1715_v59 = vld [vmem:[#allocation10 + $0x120] sm:$0xff] }
 0x82b   :  { %v1552_v10 = vadd.f32 1.0, %v3553_v3  ;;  %v4843_v3 = vld [vmem:[#allocation10 + $0x128] sm:$0xff] }
 0x82c   :  { %3554 = vpow2.f32 %v3415_v4  ;;  %v1712_v4 = vld [vmem:[#allocation10 + $0x108] sm:$0xff] }
 0x82d   :  { %3556 = vrcp.f32 %v1552_v10  ;;  %v1564_v17 = vand.u32 2147483648, %v1552_v10  ;;  %v1562_v49 = vand.u32 2147483647, %v1552_v10  ;;  %vm1558_vm0 = vweird.f32 %v1552_v10 }
 0x82f   :  { %v1565_v18 = vor.u32 1.1754944e-38, %v1564_v17  ;;  %vm1563_vm4 = vcmp.eq.f32.partialorder %v1562_v49, 8.507059e+37  ;;  %v4856_v17 = vld [vmem:[#allocation10 + $0xe0] sm:$0xff] }
 0x830   :  { %v1703_v49 = vld [vmem:[#allocation10 + $0xc0] sm:$0xff] }
 0x832   :  { %v3555_v13 = vpop.eup %3554 }
 0x833   :  { %v3557_v46 = vpop.eup %3556  ;;  %v1572_v2 = vadd.f32 1.0, %v3555_v13  ;;  %v1709_v13 = vld [vmem:[#allocation10 + $0xf0] sm:$0xff] }
 0x834   :  { %v1554_v5 = vmul.f32 %v3557_v46, %v1552_v10  ;;  %vm1559_vm15 = vweird.f32 %v3557_v46  ;;  %v4846_v10 = vld [vmem:[#allocation10 + $0x110] sm:$0xff] }
 0x835   :  { %3558 = vrcp.f32 %v1572_v2  ;;  %vm1560_vm2 = vmor %vm1558_vm0, %vm1559_vm15  ;;  %v1584_v1 = vand.u32 2147483648, %v1572_v2  ;;  %v1582_v7 = vand.u32 2147483647, %v1572_v2  ;;  %vm1578_vm6 = vweird.f32 %v1572_v2 }
 0x836   :  { %v1555_v16 = vsub.f32 1.0, %v1554_v5  ;;  %v4854_v5 = vld [vmem:[#allocation10 + $0x160] sm:$0xff] }
 0x837   :  { %v1585_v30 = vor.u32 1.1754944e-38, %v1584_v1  ;;  %vm1583_vm8 = vcmp.eq.f32.partialorder %v1582_v7, 8.507059e+37  ;;  %v1691_v1 = vld [vmem:[#allocation10 + $0x60] sm:$0xff]  ;;  %v4890_v7 = vld [vmem:[#allocation10 + $0xd0] sm:$0xff] }
 0x838   :  { %v1556_v27 = vmul.f32 %v3557_v46, %v1555_v16  ;;  %v1706_v16 = vld [vmem:[#allocation10 + $0xd8] sm:$0xff] }
 0x83a   :  { %v1557_v35 = vadd.f32 %v3557_v46, %v1556_v27  ;;  %v4860_v27 = vld [vmem:[#allocation10 + $0x148] sm:$0xff] }
 0x83b   :  { %v3559_v24 = vpop.eup %3558 }
 0x83c   :  { %v1574_v44 = vmul.f32 %v3559_v24, %v1572_v2  ;;  %v1561_v58 = vsel %vm1560_vm2, %v3557_v46, %v1557_v35  ;;  %vm1579_vm5 = vweird.f32 %v3559_v24  ;;  %v4849_v46 = vld [vmem:[#allocation10 + $0xf8] sm:$0xff]  ;;  %v4866_v35 = vld [vmem:[#allocation10 + $0x130] sm:$0xff] }
 0x83d   :  { %v1566_v52 = vsel %vm1563_vm4, %v1565_v18, %v1561_v58  ;;  %vm1580_vm7 = vmor %vm1578_vm6, %vm1579_vm5  ;;  %v4851_v2 = vld [vmem:[#allocation10 + $0x178] sm:$0xff]  ;;  %v4868_v18 = vld [vmem:[#allocation10 + $0xb0] sm:$0xff] }
 0x83e   :  { %v1575_v11 = vsub.f32 1.0, %v1574_v44  ;;  %v1589_v0 = vmul.f32 %v1588_v40, %v1566_v52  ;;  %1767 = vmatpush.msrb.mxu1 %v4851_v2  ;;  %v4872_v44 = vld [vmem:[#allocation10 + $0x118] sm:$0xff]  ;;  %v1697_v58 = vld [vmem:[#allocation10 + $0x90] sm:$0xff]  ;;  %v4878_v52 = vld [vmem:[#allocation10 + $0x100] sm:$0xff] }
 0x83f   :  { %v4874_v40 = vld [vmem:[#allocation10 + $0x98] sm:$0xff] }
 0x840   :  { %v1576_v15 = vmul.f32 %v3559_v24, %v1575_v11  ;;  %v1590_v14 = vadd.f32 %v1589_v0, %v1437_v8  ;;  %1768 = vmatpush.msrb.mxu1 %v4854_v5  ;;  %v1694_v11 = vld [vmem:[#allocation10 + $0x78] sm:$0xff]  ;;  %v4880_v0 = vld [vmem:[#allocation10 + $0x80] sm:$0xff]  ;;  %v4884_v8 = vld [vmem:[#allocation10 + $0xe8] sm:$0xff] }
 0x842   :  { %v1577_v19 = vadd.f32 %v3559_v24, %v1576_v15  ;;  %3560 = vtanh.f32 %v1590_v14  ;;  %1769 = vmatpush.msrb.mxu1 %v4860_v27  ;;  %v4886_v15 = vld [vmem:[#allocation10 + $0x68] sm:$0xff] }
 0x843   :  { %v1688_v14 = vld [vmem:[#allocation10 + $0x48] sm:$0xff] }
 0x844   :  { %v1581_v31 = vsel %vm1580_vm7, %v3559_v24, %v1577_v19  ;;  %v1700_v24 = vld [vmem:[#allocation10 + $0xa8] sm:$0xff]  ;;  %1770 = vmatpush.msrb.mxu1 %v4866_v35  ;;  %v4892_v19 = vld [vmem:[#allocation10 + $0x50] sm:$0xff] }
 0x845   :  { %v1586_v25 = vsel %vm1583_vm8, %v1585_v30, %v1581_v31  ;;  %v4896_v30 = vld [vmem:[#allocation10 + $0xb8] sm:$0xff]  ;;  %v1685_v31 = vld [vmem:[#allocation10 + $0x30] sm:$0xff] }
 0x846   :  { %v1592_v36 = vsub.f32 1.0, %v1586_v25  ;;  %v1594_v32 = vmul.f32 %v1586_v25, %v4756_v22  ;;  %v1724_v22 = vld [vmem:[#allocation10 + $0x168] sm:$0xff]  ;;  %1771 = vmatpush.msrb.mxu1 %v4872_v44  ;;  %v4898_v25 = vld [vmem:[#allocation10 + $0x38] sm:$0xff] }
 0x847   :  { %1727 = vmatpush.msra.mxu3 %v1724_v22 }
 0x848   :  { %v3561_v62 = vpop.eup %3560  ;;  %1772 = vmatpush.msrb.mxu1 %v4878_v52 }
 0x849   :  { %v1593_v48 = vmul.f32 %v3561_v62, %v1592_v36  ;;  %1728 = vmatpush.msra.mxu3 %v1721_v51  ;;  %v4903_v62 = vld [vmem:[#allocation10 + $0xa0] sm:$0xff] }
 0x84a   :  { %1773 = vmatpush.msrb.mxu1 %v4884_v8 }
 0x84b   :  { %v4823_v33 = vadd.f32 %v1594_v32, %v1593_v48  ;;  %1729 = vmatpush.msra.mxu3 %v1718_v53  ;;  %v1682_v48 = vld [vmem:[#allocation10 + $0x18] sm:$0xff]  ;;  %v4905_v32 = vld [vmem:[#allocation10 + $0x20] sm:$0xff] }
 0x84c   :  { %1774 = vmatpush.msrb.mxu1 %v4890_v7 }
 0x84d   :  { %1628 = vmatmul.f32.vlgmr.msra.gmra.mxu2 %v4823_v33  ;;  %1730 = vmatpush.msra.mxu3 %v1715_v59 }
 0x84e   :  { %2074 = vmatpush.msra.mxu2 %v1724_v22  ;;  %1775 = vmatpush.msrb.mxu1 %v4896_v30  ;;  %v1833_v22 = vld [vmem:[#allocation11 + $0x170] sm:$0xff] }
 0x84f   :  { %1731 = vmatpush.msra.mxu3 %v1712_v4 }
 0x850   :  { %2075 = vmatpush.msra.mxu2 %v1721_v51  ;;  %1776 = vmatpush.msrb.mxu1 %v4903_v62  ;;  %v4919_v51 = vld [vmem:[#allocation11 + $0x178] sm:$0xff] }
 0x851   :  { %1732 = vmatpush.msra.mxu3 %v1709_v13 }
 0x852   :  { %2076 = vmatpush.msra.mxu2 %v1718_v53 }
 0x853   :  { %1733 = vmatpush.msra.mxu3 %v1706_v16 }
 0x854   :  { %2077 = vmatpush.msra.mxu2 %v1715_v59  ;;  %v1830_v59 = vld [vmem:[#allocation11 + $0x158] sm:$0xff] }
 0x855   :  { %1851 = vmatmul.f32.vlgmr.msrb.gmra.mxu2 %v4823_v33  ;;  %1734 = vmatpush.msra.mxu3 %v1703_v49 }
 0x856   :  { %2078 = vmatpush.msra.mxu2 %v1712_v4  ;;  %v4923_v4 = vld [vmem:[#allocation11 + $0x160] sm:$0xff] }
 0x857   :  { %1735 = vmatpush.msra.mxu3 %v1700_v24 }
 0x858   :  { %2079 = vmatpush.msra.mxu2 %v1709_v13  ;;  %v1827_v13 = vld [vmem:[#allocation11 + $0x140] sm:$0xff] }
 0x859   :  { %1736 = vmatpush.msra.mxu3 %v1697_v58 }
 0x85a   :  { %2080 = vmatpush.msra.mxu2 %v1706_v16  ;;  %v1824_v16 = vld [vmem:[#allocation11 + $0x128] sm:$0xff] }
 0x85b   :  { %1737 = vmatpush.msra.mxu3 %v1694_v11 }
 0x85c   :  { %2081 = vmatpush.msra.mxu2 %v1703_v49  ;;  %v4929_v49 = vld [vmem:[#allocation11 + $0x130] sm:$0xff] }
 0x85d   :  { %1738 = vmatpush.msra.mxu3 %v1691_v1 }
 0x85e   :  { %2082 = vmatpush.msra.mxu2 %v1700_v24  ;;  %v1821_v24 = vld [vmem:[#allocation11 + $0x110] sm:$0xff] }
 0x85f   :  { %1739 = vmatpush.msra.mxu3 %v1688_v14 }
 0x860   :  { %2083 = vmatpush.msra.mxu2 %v1697_v58  ;;  %v4932_v58 = vld [vmem:[#allocation11 + $0x118] sm:$0xff] }
 0x861   :  { %1740 = vmatpush.msra.mxu3 %v1685_v31 }
 0x862   :  { %2084 = vmatpush.msra.mxu2 %v1694_v11  ;;  %v1818_v11 = vld [vmem:[#allocation11 + $0xf8] sm:$0xff] }
 0x863   :  { %1741 = vmatpush.msra.mxu3 %v1682_v48 }
 0x864   :  { %2085 = vmatpush.msra.mxu2 %v1691_v1  ;;  %v4935_v1 = vld [vmem:[#allocation11 + $0x100] sm:$0xff] }
 0x866   :  { %2086 = vmatpush.msra.mxu2 %v1688_v14  ;;  %v1815_v14 = vld [vmem:[#allocation11 + $0xe0] sm:$0xff] }
 0x868   :  { %2087 = vmatpush.msra.mxu2 %v1685_v31  ;;  %v4938_v31 = vld [vmem:[#allocation11 + $0xe8] sm:$0xff] }
 0x86a   :  { %2088 = vmatpush.msra.mxu2 %v1682_v48  ;;  %v1812_v48 = vld [vmem:[#allocation11 + $0xc8] sm:$0xff] }
 0x8d0   :  { %v1629_v28 = vpop.f32.mrf.mxu2 }
 0x8d1   :  { %v1630_v23 = vadd.f32 %v4763_v26, %v1629_v28  ;;  %v4838_v26 = vld [vmem:[#allocation10 + $0x158] sm:$0xff]  ;;  %v4909_v28 = vld [vmem:[#allocation10 + $0x88] sm:$0xff] }
 0x8d2   :  { %1748 = vmatpush.msrb.mxu0 %v4838_v26  ;;  %1777 = vmatpush.msrb.mxu1 %v4909_v28 }
 0x8d3   :  { %1633 = vst [vmem:[#allocation14 + $0x8] sm:$0xff] %v1630_v23  ;;  %1634 = vmax.xlane.f32.xlu1 %v1630_v23 }
 0x8d4   :  { %1749 = vmatpush.msrb.mxu0 %v4840_v41 }
 0x8d6   :  { %1750 = vmatpush.msrb.mxu0 %v4843_v3 }
 0x8d8   :  { %1751 = vmatpush.msrb.mxu0 %v4846_v10 }
 0x8da   :  { %1752 = vmatpush.msrb.mxu0 %v4849_v46 }
 0x8dc   :  { %1753 = vmatpush.msrb.mxu0 %v4856_v17 }
 0x8de   :  { %1754 = vmatpush.msrb.mxu0 %v4862_v39 }
 0x8e0   :  { %1755 = vmatpush.msrb.mxu0 %v4868_v18 }
 0x8e2   :  { %1756 = vmatpush.msrb.mxu0 %v4874_v40 }
 0x8e4   :  { %1757 = vmatpush.msrb.mxu0 %v4880_v0 }
 0x8e6   :  { %1758 = vmatpush.msrb.mxu0 %v4886_v15 }
 0x8e8   :  { %1759 = vmatpush.msrb.mxu0 %v4892_v19 }
 0x8ea   :  { %1760 = vmatpush.msrb.mxu0 %v4898_v25 }
 0x8ec   :  { %1761 = vmatpush.msrb.mxu0 %v4905_v32 }
 0x946   :  { %v1635_v34 = vpop.xlane.xlu1 %1634 }
 0x947   :  { %vm1636_vm9 = vcmp.eq.f32.partialorder %v1630_v23, %v1635_v34  ;;  %v1679_v23 = vld [vmem:[#allocation10] sm:$0xff]  ;;  %v4911_v34 = vld [vmem:[#allocation10 + $0x8] sm:$0xff] }
 0x948   :  { %v4829_v37 = vsel %vm1636_vm9, %v5691_v21, 128  ;;  %1742 = vmatpush.msra.mxu3 %v1679_v23  ;;  %1762 = vmatpush.msrb.mxu0 %v4911_v34 }
 0x949   :  { %v1639_v54 = vshra.s32 %v4829_v37, 16  ;;  %v1638_v36 = vand.u32 65535, %v4829_v37  ;;  %2089 = vmatpush.msra.mxu2 %v1679_v23  ;;  %v4944_v23 = vld [vmem:[#allocation11 + $0xd0] sm:$0xff] }
 0x94a   :  { %1855 = vmatpush.msrb.mxu3 %v1833_v22  ;;  %1875 = vmatpush.msra.mxu0 %v4919_v51 }
 0x94b   :  { %v4832_v55 = vcvt.s32.f32 %v1639_v54  ;;  %v1640_v54 = vcvt.s32.f32 %v1638_v36  ;;  %2202 = vmatpush.msrb.mxu2 %v1833_v22  ;;  %v4942_v36 = vld [vmem:[#allocation10 + $0x70] sm:$0xff] }
 0x94c   :  { %1856 = vmatpush.msrb.mxu3 %v1830_v59  ;;  %1876 = vmatpush.msra.mxu0 %v4923_v4  ;;  %v1809_v22 = vld [vmem:[#allocation11 + $0xb0] sm:$0xff] }
 0x94d   :  { %1642 = vmin.xlane.f32.xlu2 %v4832_v55  ;;  %2203 = vmatpush.msrb.mxu2 %v1830_v59  ;;  %v4954_v59 = vld [vmem:[#allocation10 + $0x40] sm:$0xff] }
 0x94e   :  { %1857 = vmatpush.msrb.mxu3 %v1827_v13  ;;  %1778 = vmatpush.msrb.mxu1 %v4942_v36 }
 0x94f   :  { %2204 = vmatpush.msrb.mxu2 %v1827_v13  ;;  %v1806_v13 = vld [vmem:[#allocation11 + $0x98] sm:$0xff] }
 0x950   :  { %1858 = vmatpush.msrb.mxu3 %v1824_v16 }
 0x951   :  { %2205 = vmatpush.msrb.mxu2 %v1824_v16  ;;  %v4956_v16 = vld [vmem:[#allocation11 + $0xa0] sm:$0xff] }
 0x952   :  { %1859 = vmatpush.msrb.mxu3 %v1821_v24 }
 0x953   :  { %2206 = vmatpush.msrb.mxu2 %v1821_v24  ;;  %v4959_v24 = vld [vmem:[#allocation10 + $0x28] sm:$0xff] }
 0x954   :  { %1860 = vmatpush.msrb.mxu3 %v1818_v11 }
 0x955   :  { %2207 = vmatpush.msrb.mxu2 %v1818_v11  ;;  %v1803_v11 = vld [vmem:[#allocation11 + $0x80] sm:$0xff] }
 0x956   :  { %1861 = vmatpush.msrb.mxu3 %v1815_v14 }
 0x957   :  { %2208 = vmatpush.msrb.mxu2 %v1815_v14  ;;  %v4961_v14 = vld [vmem:[#allocation11 + $0x88] sm:$0xff] }
 0x958   :  { %1862 = vmatpush.msrb.mxu3 %v1812_v48 }
 0x959   :  { %2209 = vmatpush.msrb.mxu2 %v1812_v48  ;;  %v4964_v48 = vld [vmem:[#allocation10 + $0x10] sm:$0xff] }
 0x95a   :  { %1863 = vmatpush.msrb.mxu3 %v1809_v22 }
 0x95b   :  { %2210 = vmatpush.msrb.mxu2 %v1809_v22  ;;  %v1797_v22 = vld [vmem:[#allocation11 + $0x50] sm:$0xff] }
 0x95c   :  { %1864 = vmatpush.msrb.mxu3 %v1806_v13 }
 0x95d   :  { %2211 = vmatpush.msrb.mxu2 %v1806_v13  ;;  %v1794_v13 = vld [vmem:[#allocation11 + $0x38] sm:$0xff] }
 0x95e   :  { %1865 = vmatpush.msrb.mxu3 %v1803_v11 }
 0x95f   :  { %2212 = vmatpush.msrb.mxu2 %v1803_v11  ;;  %v1791_v11 = vld [vmem:[#allocation11 + $0x20] sm:$0xff] }
 0x960   :  { %1866 = vmatpush.msrb.mxu3 %v1800_v12 }
 0x961   :  { %2213 = vmatpush.msrb.mxu2 %v1800_v12  ;;  %v4985_v12 = vld [vmem:[#allocation13 + $0x78] sm:$0xff] }
 0x962   :  { %1867 = vmatpush.msrb.mxu3 %v1797_v22 }
 0x963   :  { %2214 = vmatpush.msrb.mxu2 %v1797_v22  ;;  %v1667_v22 = vstv %s3420_s17  ;;  %s2699_s17 = scvt.s32.f32 %s2698_s16 }
 0x964   :  { %1868 = vmatpush.msrb.mxu3 %v1794_v13  ;;  %vm1668_vm12 = vcmp.eq.s32.totalorder %v5691_v21, %v1667_v22 }
 0x965   :  { %2215 = vmatpush.msrb.mxu2 %v1794_v13  ;;  %vm1669_vm14 = vmand %vm1668_vm12, %vm975_vm3  ;;  %s2716_s6 = ssub.f32 1.0, %s2699_s17 }
 0x966   :  { %1869 = vmatpush.msrb.mxu3 %v1791_v11  ;;  %v3421_v29 = vsel %vm1669_vm14, 1.0, %v5693_v38 }
 0x967   :  { %2216 = vmatpush.msrb.mxu2 %v1791_v11  ;;  %v3419_v11 = vsel %vm1662_vm13, 1.0, %v5693_v38 }
 0x968   :  { %1870 = vmatpush.msrb.mxu3 %v1788_v60  ;;  %v1672_v45 = vadd.f32 %v3421_v29, %v3419_v11  ;;  %v1955_v29 = vld [vmem:[#allocation13 + $0x60] sm:$0xff]  ;;  %v5077_v11 = vld [vmem:[%s5494_s7] ss:$0 sm:$0xff] }
 0x969   :  { %2217 = vmatpush.msrb.mxu2 %v1788_v60 }
 0x9c0   :  { %v4914_v37 = vpop.xlane.xlu2 %1642 }
 0x9c1   :  { %vm1644_vm10 = vcmp.eq.f32.partialorder %v4832_v55, %v4914_v37  ;;  %v4926_v55 = vld [vmem:[#allocation11 + $0x148] sm:$0xff]  ;;  %v1649_v13 = vcvt.f32.s32 %v4914_v37  ;;  %v5723_v37 = vld [vmem:[#allocation45_spill] sm:$0xff] }
 0x9c2   :  { %v1645_v53 = vsel %vm1644_vm10, %v1640_v54, inf  ;;  %1877 = vmatpush.msra.mxu0 %v4926_v55  ;;  %v4948_v54 = vld [vmem:[#allocation10 + $0x58] sm:$0xff] }
 0x9c3   :  { %1646 = vmin.xlane.f32.xlu2 %v1645_v53  ;;  %v4950_v53 = vld [vmem:[#allocation11 + $0xb8] sm:$0xff]  ;;  %1779 = vmatpush.msrb.mxu1 %v4948_v54  ;;  %v1650_v56 = vshll.u32 %v1649_v13, 16 }
 0x9c4   :  { %1878 = vmatpush.msra.mxu0 %v4929_v49 }
 0x9c5   :  { %1780 = vmatpush.msrb.mxu1 %v4954_v59 }
 0x9c6   :  { %1879 = vmatpush.msra.mxu0 %v4932_v58 }
 0x9c7   :  { %1781 = vmatpush.msrb.mxu1 %v4959_v24 }
 0x9c8   :  { %1880 = vmatpush.msra.mxu0 %v4935_v1 }
 0x9c9   :  { %1782 = vmatpush.msrb.mxu1 %v4964_v48 }
 0x9ca   :  { %1881 = vmatpush.msra.mxu0 %v4938_v31 }
 0x9cb   :  { %1959 = vmatpush.msra.mxu1 %v4985_v12 }
 0x9cc   :  { %1882 = vmatpush.msra.mxu0 %v4944_v23 }
 0x9ce   :  { %1883 = vmatpush.msra.mxu0 %v4950_v53 }
 0x9d0   :  { %1884 = vmatpush.msra.mxu0 %v4956_v16 }
 0x9d2   :  { %1885 = vmatpush.msra.mxu0 %v4961_v14 }
 0x9d4   :  { %1886 = vmatpush.msra.mxu0 %v4967_v9 }
 0x9d6   :  { %1887 = vmatpush.msra.mxu0 %v4974_v63 }
 0x9d8   :  { %1888 = vmatpush.msra.mxu0 %v4976_v57 }
 0x9da   :  { %1889 = vmatpush.msra.mxu0 %v4979_v47 }
 0x9dc   :  { %1890 = vmatpush.msra.mxu0 %v4982_v61  ;;  %v1674_v61 = vmul.f32 %v1673_v43, %v1672_v45  ;;  %v5712_v43 = vld [vmem:[#allocation20_spill] sm:$0xff]  ;;  %v1957_v45 = vld [vmem:[#allocation13 + $0x70] sm:$0xff] }
 0x9dd   :  { %1960 = vmatpush.msra.mxu1 %v1957_v45 }
 0xa36   :  { %v1647_v60 = vpop.xlane.xlu2 %1646 }
 0xa37   :  { %v1648_v50 = vcvt.f32.s32 %v1647_v60 }
 0xa39   :  { %v1651_v22 = vadd.s32 %v1650_v56, %v1648_v50  ;;  %v1956_v56 = vld [vmem:[#allocation13 + $0x68] sm:$0xff] }
 0xa3a   :  { %1961 = vmatpush.msra.mxu1 %v1956_v56 }
 0xa3b   :  { %vm1652_vm15 = vcmp.eq.s32.totalorder %v5691_v21, %v1651_v22 }
 0xa3c   :  { %v3416_v6 = vsel %vm1652_vm15, 1.0, %v5693_v38  ;;  %1962 = vmatpush.msra.mxu1 %v1955_v29 }
 0xa3d   :  { %v1677_v47 = vmul.f32 %v3416_v6, %v1676_v20  ;;  %v5710_v6 = vld [vmem:[#allocation51_spill] sm:$0xff]  ;;  %v5711_v20 = vld [vmem:[#allocation52_spill] sm:$0xff] }
 0xa3f   :  { %v1678_v57 = vadd.f32 %v1677_v47, %v1674_v61  ;;  %v1954_v61 = vld [vmem:[#allocation13 + $0x58] sm:$0xff]  ;;  %v1953_v47 = vld [vmem:[#allocation13 + $0x50] sm:$0xff] }
 0xa40   :  { %1963 = vmatpush.msra.mxu1 %v1954_v61 }
 0xa41   :  { %1743 = vmatmul.f32.vlgmr.msra.gmra.mxu3 %v1678_v57  ;;  %1763 = vmatmul.f32.vlgmr.msrb.gmra.mxu0 %v1678_v57 }
 0xa42   :  { %1783 = vmatmul.f32.vlgmr.msrb.gmra.mxu1 %v1678_v57  ;;  %2094 = vmatpush.msra.mxu3 %v4835_v42  ;;  %v1952_v57 = vld [vmem:[#allocation13 + $0x48] sm:$0xff]  ;;  %v1949_v42 = vld [vmem:[#allocation13 + $0x30] sm:$0xff] }
 0xa43   :  { %2114 = vmatpush.msrb.mxu0 %v4851_v2  ;;  %1964 = vmatpush.msra.mxu1 %v1953_v47  ;;  %v1943_v2 = vld [vmem:[#allocation13] sm:$0xff] }
 0xa44   :  { %2095 = vmatpush.msra.mxu3 %v4838_v26  ;;  %v1948_v26 = vld [vmem:[#allocation13 + $0x28] sm:$0xff] }
 0xa45   :  { %2115 = vmatpush.msrb.mxu0 %v4854_v5  ;;  %1965 = vmatpush.msra.mxu1 %v1952_v57  ;;  %v5713_v5 = vld [vmem:[#allocation25_spill] sm:$0xff] }
 0xa46   :  { %2096 = vmatpush.msra.mxu3 %v4840_v41  ;;  %v1947_v41 = vld [vmem:[#allocation13 + $0x20] sm:$0xff] }
 0xa47   :  { %2116 = vmatpush.msrb.mxu0 %v4860_v27  ;;  %v5715_v27 = vld [vmem:[#allocation30_spill] sm:$0xff] }
 0xa48   :  { %2097 = vmatpush.msra.mxu3 %v4843_v3  ;;  %v1946_v3 = vld [vmem:[#allocation13 + $0x18] sm:$0xff] }
 0xa49   :  { %1871 = vmatmul.f32.vlgmr.msrb.gmra.mxu3 %v4823_v33  ;;  %1891 = vmatmul.f32.vlgmr.msra.gmra.mxu0 %v4823_v33 }
 0xa4a   :  { %2098 = vmatpush.msra.mxu3 %v4846_v10  ;;  %2117 = vmatpush.msrb.mxu0 %v4866_v35  ;;  %v1945_v10 = vld [vmem:[#allocation13 + $0x10] sm:$0xff]  ;;  %v1852_v35 = vpop.f32.mrf.mxu2 }
 0xa4c   :  { %2099 = vmatpush.msra.mxu3 %v4849_v46  ;;  %2118 = vmatpush.msrb.mxu0 %v4872_v44  ;;  %v1944_v46 = vld [vmem:[#allocation13 + $0x8] sm:$0xff]  ;;  %v5717_v44 = vld [vmem:[#allocation33_spill] sm:$0xff] }
 0xa4e   :  { %2100 = vmatpush.msra.mxu3 %v4856_v17  ;;  %2119 = vmatpush.msrb.mxu0 %v4878_v52  ;;  %v5714_v17 = vld [vmem:[#allocation28_spill] sm:$0xff]  ;;  %v5718_v52 = vld [vmem:[#allocation38_spill] sm:$0xff] }
 0xa50   :  { %2101 = vmatpush.msra.mxu3 %v4862_v39  ;;  %2120 = vmatpush.msrb.mxu0 %v4884_v8  ;;  %v5716_v39 = vld [vmem:[#allocation31_spill] sm:$0xff] }
 0xa51   :  { %v5719_v8 = vld [vmem:[#allocation39_spill] sm:$0xff] }
 0xa52   :  { %2102 = vmatpush.msra.mxu3 %v4868_v18  ;;  %2121 = vmatpush.msrb.mxu0 %v4890_v7 }
 0xa54   :  { %2103 = vmatpush.msra.mxu3 %v4874_v40  ;;  %2122 = vmatpush.msrb.mxu0 %v4896_v30  ;;  %v5721_v30 = vld [vmem:[#allocation42_spill] sm:$0xff] }
 0xa56   :  { %2104 = vmatpush.msra.mxu3 %v4880_v0  ;;  %2123 = vmatpush.msrb.mxu0 %v4903_v62  ;;  %v5722_v62 = vld [vmem:[#allocation44_spill] sm:$0xff] }
 0xa58   :  { %2105 = vmatpush.msra.mxu3 %v4886_v15  ;;  %2124 = vmatpush.msrb.mxu0 %v4909_v28  ;;  %v5720_v15 = vld [vmem:[#allocation41_spill] sm:$0xff] }
 0xa5a   :  { %2106 = vmatpush.msra.mxu3 %v4892_v19  ;;  %2125 = vmatpush.msrb.mxu0 %v4942_v36 }
 0xa5c   :  { %2107 = vmatpush.msra.mxu3 %v4898_v25  ;;  %2126 = vmatpush.msrb.mxu0 %v4948_v54 }
 0xa5e   :  { %2108 = vmatpush.msra.mxu3 %v4905_v32  ;;  %2127 = vmatpush.msrb.mxu0 %v4954_v59 }
 0xa60   :  { %2109 = vmatpush.msra.mxu3 %v4911_v34  ;;  %2128 = vmatpush.msrb.mxu0 %v4959_v24 }
 0xa62   :  { %2222 = vmatpush.msrb.mxu3 %v4919_v51  ;;  %2129 = vmatpush.msrb.mxu0 %v4964_v48  ;;  %v5724_v51 = vld [vmem:[#allocation47_spill] sm:$0xff] }
 0xa64   :  { %2223 = vmatpush.msrb.mxu3 %v4923_v4  ;;  %2306 = vmatpush.msra.mxu0 %v4985_v12  ;;  %v5064_v4 = vld [vmem:[#allocation11 + $0x30] sm:$0xff] }
 0xa66   :  { %2224 = vmatpush.msrb.mxu3 %v4926_v55  ;;  %2307 = vmatpush.msra.mxu0 %v1957_v45  ;;  %v5725_v55 = vld [vmem:[#allocation49_spill] sm:$0xff] }
 0xa68   :  { %2225 = vmatpush.msrb.mxu3 %v4929_v49  ;;  %2308 = vmatpush.msra.mxu0 %v1956_v56  ;;  %v5067_v49 = vld [vmem:[#allocation11 + $0x18] sm:$0xff] }
 0xa6a   :  { %2226 = vmatpush.msrb.mxu3 %v4932_v58  ;;  %2309 = vmatpush.msra.mxu0 %v1955_v29 }
 0xa6c   :  { %2227 = vmatpush.msrb.mxu3 %v4935_v1  ;;  %2310 = vmatpush.msra.mxu0 %v1954_v61  ;;  %v5070_v1 = vld [vmem:[#allocation11] sm:$0xff] }
 0xa6e   :  { %2228 = vmatpush.msrb.mxu3 %v4938_v31  ;;  %2311 = vmatpush.msra.mxu0 %v1953_v47 }
 0xa70   :  { %2229 = vmatpush.msrb.mxu3 %v4944_v23  ;;  %2312 = vmatpush.msra.mxu0 %v1952_v57 }
 0xa72   :  { %2230 = vmatpush.msrb.mxu3 %v4950_v53 }
 0xa74   :  { %2231 = vmatpush.msrb.mxu3 %v4956_v16 }
 0xa76   :  { %2232 = vmatpush.msrb.mxu3 %v4961_v14 }
 0xa78   :  { %2233 = vmatpush.msrb.mxu3 %v4967_v9  ;;  %v1950_v9 = vld [vmem:[#allocation13 + $0x38] sm:$0xff] }
 0xa7a   :  { %2234 = vmatpush.msrb.mxu3 %v4974_v63  ;;  %v1951_v63 = vld [vmem:[#allocation13 + $0x40] sm:$0xff] }
 0xa7b   :  { %1966 = vmatpush.msra.mxu1 %v1951_v63  ;;  %2313 = vmatpush.msra.mxu0 %v1951_v63 }
 0xa7c   :  { %2235 = vmatpush.msrb.mxu3 %v5710_v6 }
 0xa7d   :  { %1967 = vmatpush.msra.mxu1 %v1950_v9  ;;  %2314 = vmatpush.msra.mxu0 %v1950_v9 }
 0xa7e   :  { %2236 = vmatpush.msrb.mxu3 %v5711_v20 }
 0xa7f   :  { %1968 = vmatpush.msra.mxu1 %v1949_v42  ;;  %2315 = vmatpush.msra.mxu0 %v1949_v42 }
 0xa80   :  { %2237 = vmatpush.msrb.mxu3 %v5712_v43 }
 0xa81   :  { %1969 = vmatpush.msra.mxu1 %v1948_v26  ;;  %2316 = vmatpush.msra.mxu0 %v1948_v26 }
 0xa83   :  { %1970 = vmatpush.msra.mxu1 %v1947_v41  ;;  %2317 = vmatpush.msra.mxu0 %v1947_v41 }
 0xa85   :  { %1971 = vmatpush.msra.mxu1 %v1946_v3  ;;  %2318 = vmatpush.msra.mxu0 %v1946_v3 }
 0xa87   :  { %1972 = vmatpush.msra.mxu1 %v1945_v10  ;;  %2319 = vmatpush.msra.mxu0 %v1945_v10 }
 0xa89   :  { %1973 = vmatpush.msra.mxu1 %v1944_v46  ;;  %2320 = vmatpush.msra.mxu0 %v1944_v46 }
 0xa8b   :  { %1974 = vmatpush.msra.mxu1 %v1943_v2  ;;  %2321 = vmatpush.msra.mxu0 %v1943_v2  ;;  %v5088_v2 = vld [vmem:[%s5496_s9] ss:$0 sm:$0xff] }
 0xa8d   :  { %2182 = vmatpush.msrb.mxu1 %v5713_v5 }
 0xa8f   :  { %2183 = vmatpush.msrb.mxu1 %v5714_v17 }
 0xa91   :  { %2184 = vmatpush.msrb.mxu1 %v5715_v27 }
 0xa93   :  { %2185 = vmatpush.msrb.mxu1 %v5716_v39 }
 0xa95   :  { %2186 = vmatpush.msrb.mxu1 %v5717_v44 }
 0xa97   :  { %2187 = vmatpush.msrb.mxu1 %v5718_v52  ;;  %v2007_v52 = vstv %s3426_s8  ;;  %s3373_s8 = sshll.u32 %s3820_s5, 4  ;;  %s3374_s8 = int_to_ptr.vmem [resolvable:$true] %s3373_s8 }
 0xa98   :  { %vm2008_vm12 = vcmp.eq.s32.totalorder %v5691_v21, %v2007_v52 }
 0xa99   :  { %2188 = vmatpush.msrb.mxu1 %v5719_v8  ;;  %vm2009_vm14 = vmand %vm2008_vm12, %vm967_vm1 }
 0xa9b   :  { %2189 = vmatpush.msrb.mxu1 %v5720_v15 }
 0xa9d   :  { %2190 = vmatpush.msrb.mxu1 %v5721_v30 }
 0xa9f   :  { %2191 = vmatpush.msrb.mxu1 %v5722_v62 }
 0xaa1   :  { %2192 = vmatpush.msrb.mxu1 %v5723_v37  ;;  %v2023_v37 = vstv %s2022_s26 }
 0xaa3   :  { %2193 = vmatpush.msrb.mxu1 %v5724_v51 }
 0xaa5   :  { %2194 = vmatpush.msrb.mxu1 %v5725_v55 }
 0xaa7   :  { %2195 = vmatpush.msrb.mxu1 %v5064_v4 }
 0xaa9   :  { %2196 = vmatpush.msrb.mxu1 %v5067_v49 }
 0xaab   :  { %2197 = vmatpush.msrb.mxu1 %v5070_v1 }
 0xabe   :  { %v1764_v7 = vpop.f32.mrf.mxu0 }
 0xabf   :  { %v1784_v43 = vpop.f32.mrf.mxu1 }
 0xac4   :  { %v1744_v18 = vpop.f32.mrf.mxu3 }
 0xac5   :  { %v1895_v40 = vadd.f32 %v1852_v35, %v1744_v18 }
 0xac6   :  { %v1892_v24 = vpop.f32.mrf.mxu0 }
 0xac7   :  { %v3422_v0 = vmul.f32 -1.442695, %v1895_v40  ;;  %v1935_v60 = vadd.f32 %v5077_v11, %v1892_v24 }
 0xac9   :  { %3562 = vpow2.f32 %v3422_v0  ;;  %v2014_v0 = vstv %s3428_s1 }
 0xaca   :  { %vm2015_vm13 = vcmp.eq.s32.totalorder %v5691_v21, %v2014_v0 }
 0xacb   :  { %vm2016_vm15 = vmand %vm2015_vm13, %vm975_vm3 }
 0xacc   :  { %v1872_v19 = vpop.f32.mrf.mxu3 }
 0xacd   :  { %v1915_v25 = vadd.f32 %v1872_v19, %v1764_v7  ;;  %v3427_v7 = vsel %vm2009_vm14, 1.0, %v5693_v38  ;;  %v3429_v19 = vsel %vm2016_vm15, 1.0, %v5693_v38 }
 0xacf   :  { %v3563_v32 = vpop.eup %3562  ;;  %v3423_v28 = vmul.f32 -1.442695, %v1915_v25 }
 0xad0   :  { %v1899_v34 = vadd.f32 1.0, %v3563_v32  ;;  %v2019_v32 = vadd.f32 %v3429_v19, %v3427_v7 }
 0xad1   :  { %3564 = vpow2.f32 %v3423_v28  ;;  %v2020_v28 = vstv %s2005_s25  ;;  %s3375_s25 = sshll.u32 %s5497_s10, 4  ;;  %s3376_s25 = int_to_ptr.hbm [resolvable:$true] %s3375_s25 }
 0xad2   :  { %3566 = vrcp.f32 %v1899_v34  ;;  %v1911_v53 = vand.u32 2147483648, %v1899_v34  ;;  %v1909_v16 = vand.u32 2147483647, %v1899_v34  ;;  %vm1905_vm2 = vweird.f32 %v1899_v34 }
 0xad3   :  { %v2021_v51 = vmul.f32 %v2020_v28, %v2019_v32 }
 0xad4   :  { %v1912_v12 = vor.u32 1.1754944e-38, %v1911_v53  ;;  %vm1910_vm5 = vcmp.eq.f32.partialorder %v1909_v16, 8.507059e+37  ;;  %v5113_v53 = vld [vmem:[#allocation11 + $0x120] sm:$0xff] }
 0xad5   :  { %5730 = vst [vmem:[#allocation23_spill] sm:$0xff] %v5113_v53 }
 0xad7   :  { %v3565_v58 = vpop.eup %3564 }
 0xad8   :  { %v3567_v31 = vpop.eup %3566  ;;  %v1919_v36 = vadd.f32 1.0, %v3565_v58 }
 0xad9   :  { %v1901_v23 = vmul.f32 %v3567_v31, %v1899_v34  ;;  %vm1906_vm0 = vweird.f32 %v3567_v31 }
 0xada   :  { %3568 = vrcp.f32 %v1919_v36  ;;  %vm1907_vm4 = vmor %vm1905_vm2, %vm1906_vm0  ;;  %v1931_v45 = vand.u32 2147483648, %v1919_v36  ;;  %v1929_v61 = vand.u32 2147483647, %v1919_v36  ;;  %vm1925_vm7 = vweird.f32 %v1919_v36 }
 0xadb   :  { %v1902_v54 = vsub.f32 1.0, %v1901_v23  ;;  %v5107_v23 = vld [vmem:[#allocation11 + $0x150] sm:$0xff] }
 0xadc   :  { %v1932_v57 = vor.u32 1.1754944e-38, %v1931_v45  ;;  %vm1930_vm9 = vcmp.eq.f32.partialorder %v1929_v61, 8.507059e+37  ;;  %5728 = vst [vmem:[#allocation26_spill] sm:$0xff] %v5107_v23  ;;  %v5134_v45 = vld [vmem:[#allocation11 + $0x78] sm:$0xff]  ;;  %v5136_v61 = vld [vmem:[#allocation11 + $0x60] sm:$0xff] }
 0xadd   :  { %v1903_v59 = vmul.f32 %v3567_v31, %v1902_v54  ;;  %v5110_v54 = vld [vmem:[#allocation11 + $0x138] sm:$0xff]  ;;  %5737 = vst [vmem:[#allocation40_spill] sm:$0xff] %v5134_v45 }
 0xade   :  { %5729 = vst [vmem:[#allocation22_spill] sm:$0xff] %v5110_v54 }
 0xadf   :  { %v1904_v14 = vadd.f32 %v3567_v31, %v1903_v59  ;;  %v5116_v59 = vld [vmem:[#allocation11 + $0x108] sm:$0xff]  ;;  %5738 = vst [vmem:[#allocation43_spill] sm:$0xff] %v5136_v61 }
 0xae0   :  { %v3569_v48 = vpop.eup %3568  ;;  %5731 = vst [vmem:[#allocation27_spill] sm:$0xff] %v5116_v59 }
 0xae1   :  { %v1908_v13 = vsel %vm1907_vm4, %v3567_v31, %v1904_v14  ;;  %v1921_v50 = vmul.f32 %v3569_v48, %v1919_v36  ;;  %vm1926_vm6 = vweird.f32 %v3569_v48  ;;  %v5104_v36 = vld [vmem:[#allocation11 + $0x168] sm:$0xff] }
 0xae2   :  { %v1913_v22 = vsel %vm1910_vm5, %v1912_v12, %v1908_v13  ;;  %vm1927_vm8 = vmor %vm1925_vm7, %vm1926_vm6  ;;  %5727 = vst [vmem:[#allocation21_spill] sm:$0xff] %v5104_v36  ;;  %v5122_v13 = vld [vmem:[#allocation11 + $0xd8] sm:$0xff] }
 0xae3   :  { %v1936_v6 = vmul.f32 %v1935_v60, %v1913_v22  ;;  %v1922_v20 = vsub.f32 1.0, %v1921_v50  ;;  %5733 = vst [vmem:[#allocation29_spill] sm:$0xff] %v5122_v13  ;;  %v5125_v60 = vld [vmem:[#allocation11 + $0xc0] sm:$0xff]  ;;  %v5128_v50 = vld [vmem:[#allocation11 + $0xa8] sm:$0xff] }
 0xae4   :  { %5734 = vst [vmem:[#allocation32_spill] sm:$0xff] %v5125_v60 }
 0xae5   :  { %v1937_v56 = vadd.f32 %v1936_v6, %v1784_v43  ;;  %v1923_v29 = vmul.f32 %v3569_v48, %v1922_v20  ;;  %5735 = vst [vmem:[#allocation34_spill] sm:$0xff] %v5128_v50  ;;  %v5131_v43 = vld [vmem:[#allocation11 + $0x90] sm:$0xff] }
 0xae6   :  { %5736 = vst [vmem:[#allocation37_spill] sm:$0xff] %v5131_v43 }
 0xae7   :  { %3570 = vtanh.f32 %v1937_v56  ;;  %v1924_v47 = vadd.f32 %v3569_v48, %v1923_v29 }
 0xae9   :  { %v1928_v63 = vsel %vm1927_vm8, %v3569_v48, %v1924_v47  ;;  %v5119_v48 = vld [vmem:[#allocation11 + $0xf0] sm:$0xff] }
 0xaea   :  { %v1933_v9 = vsel %vm1930_vm9, %v1932_v57, %v1928_v63  ;;  %5732 = vst [vmem:[#allocation24_spill] sm:$0xff] %v5119_v48  ;;  %v5140_v57 = vld [vmem:[#allocation11 + $0x48] sm:$0xff] }
 0xaeb   :  { %v1939_v42 = vsub.f32 1.0, %v1933_v9  ;;  %v1941_v3 = vmul.f32 %v1933_v9, %v4823_v33  ;;  %5739 = vst [vmem:[#allocation46_spill] sm:$0xff] %v5140_v57 }
 0xaed   :  { %v3571_v26 = vpop.eup %3570 }
 0xaee   :  { %v1940_v41 = vmul.f32 %v3571_v26, %v1939_v42 }
 0xaf0   :  { %v5081_v10 = vadd.f32 %v1941_v3, %v1940_v41 }
 0xaf2   :  { %1975 = vmatmul.f32.vlgmr.msra.gmra.mxu1 %v5081_v10 }
 0xafa   :  { %2198 = vmatmul.f32.vlgmr.msrb.gmra.mxu1 %v5081_v10 }
 0xb6f   :  { %v1976_v46 = vpop.f32.mrf.mxu1 }
 0xb70   :  { %v1977_v5 = vadd.f32 %v5088_v2, %v1976_v46 }
 0xb72   :  { %1980 = vst [vmem:[#allocation14 + $0x10] sm:$0xff] %v1977_v5  ;;  %1981 = vmax.xlane.f32.xlu0 %v1977_v5 }
 0xb77   :  { %v2199_v16 = vpop.f32.mrf.mxu1 }
 0xbe5   :  { %v1982_v17 = vpop.xlane.xlu0 %1981 }
 0xbe6   :  { %vm1983_vm10 = vcmp.eq.f32.partialorder %v1977_v5, %v1982_v17 }
 0xbe7   :  { %v1984_v33 = vsel %vm1983_vm10, %v5691_v21, 128 }
 0xbe8   :  { %v1986_v27 = vshra.s32 %v1984_v33, 16  ;;  %v1985_v35 = vand.u32 65535, %v1984_v33 }
 0xbea   :  { %v1988_v39 = vcvt.s32.f32 %v1986_v27  ;;  %v1987_v44 = vcvt.s32.f32 %v1985_v35 }
 0xbec   :  { %1989 = vmin.xlane.f32.xlu1 %v1988_v39 }
 0xc5f   :  { %v1990_v18 = vpop.xlane.xlu1 %1989 }
 0xc60   :  { %vm1991_vm11 = vcmp.eq.f32.partialorder %v1988_v39, %v1990_v18  ;;  %v1996_v15 = vcvt.f32.s32 %v1990_v18 }
 0xc61   :  { %v1992_v40 = vsel %vm1991_vm11, %v1987_v44, inf }
 0xc62   :  { %1993 = vmin.xlane.f32.xlu2 %v1992_v40  ;;  %v1997_v25 = vshll.u32 %v1996_v15, 16 }
 0xcd5   :  { %v1994_v30 = vpop.xlane.xlu2 %1993 }
 0xcd6   :  { %v1995_v62 = vcvt.f32.s32 %v1994_v30 }
 0xcd8   :  { %v1998_v34 = vadd.s32 %v1997_v25, %v1995_v62 }
 0xcda   :  { %vm1999_vm0 = vcmp.eq.s32.totalorder %v5691_v21, %v1998_v34 }
 0xcdb   :  { %v3424_v55 = vsel %vm1999_vm0, 1.0, %v5693_v38 }
 0xcdc   :  { %v2024_v58 = vmul.f32 %v3424_v55, %v2023_v37 }
 0xcde   :  { %v2025_v31 = vadd.f32 %v2024_v58, %v2021_v51 }
 0xce0   :  { %2090 = vmatmul.f32.vlgmr.msra.gmra.mxu2 %v2025_v31  ;;  %2110 = vmatmul.f32.vlgmr.msra.gmra.mxu3 %v2025_v31 }
 0xce1   :  { %2130 = vmatmul.f32.vlgmr.msrb.gmra.mxu0 %v2025_v31 }
 0xce2   :  { %2529 = vmatpush.msrb.mxu0 %v5104_v36 }
 0xce4   :  { %2530 = vmatpush.msrb.mxu0 %v5107_v23 }
 0xce6   :  { %2531 = vmatpush.msrb.mxu0 %v5110_v54 }
 0xce8   :  { %2218 = vmatmul.f32.vlgmr.msrb.gmra.mxu2 %v5081_v10  ;;  %2238 = vmatmul.f32.vlgmr.msrb.gmra.mxu3 %v5081_v10 }
 0xce9   :  { %2532 = vmatpush.msrb.mxu0 %v5113_v53  ;;  %v5320_v53 = vld [vmem:[#allocation13 + $0x68] sm:$0xff] }
 0xceb   :  { %2533 = vmatpush.msrb.mxu0 %v5116_v59  ;;  %v2361_v59 = vstv %s3436_s28 }
 0xcec   :  { %vm2362_vm14 = vcmp.eq.s32.totalorder %v5691_v21, %v2361_v59 }
 0xced   :  { %2534 = vmatpush.msrb.mxu0 %v5119_v48  ;;  %v5314_v48 = vld [vmem:[#allocation13 + $0x70] sm:$0xff]  ;;  %vm2363_vm0 = vmand %vm2362_vm14, %vm975_vm3 }
 0xcef   :  { %2535 = vmatpush.msrb.mxu0 %v5122_v13  ;;  %v5309_v13 = vld [vmem:[#allocation11 + $0x10] sm:$0xff] }
 0xcf0   :  { %5745 = vst [vmem:[#allocation20_spill] sm:$0xff] %v5309_v13 }
 0xcf1   :  { %2536 = vmatpush.msrb.mxu0 %v5125_v60  ;;  %v2482_v60 = vld [vmem:[#allocation11 + $0x8] sm:$0xff] }
 0xcf3   :  { %2537 = vmatpush.msrb.mxu0 %v5128_v50  ;;  %v5306_v50 = vld [vmem:[#allocation11 + $0x28] sm:$0xff] }
 0xcf4   :  { %5744 = vst [vmem:[#allocation52_spill] sm:$0xff] %v5306_v50 }
 0xcf5   :  { %2538 = vmatpush.msrb.mxu0 %v5131_v43  ;;  %v5303_v43 = vld [vmem:[#allocation11 + $0x40] sm:$0xff] }
 0xcf6   :  { %5743 = vst [vmem:[#allocation51_spill] sm:$0xff] %v5303_v43 }
 0xcf7   :  { %2539 = vmatpush.msrb.mxu0 %v5134_v45  ;;  %v5301_v45 = vld [vmem:[#allocation11 + $0x58] sm:$0xff] }
 0xcf8   :  { %5742 = vst [vmem:[#allocation35_spill] sm:$0xff] %v5301_v45 }
 0xcf9   :  { %2540 = vmatpush.msrb.mxu0 %v5136_v61  ;;  %v5292_v61 = vld [vmem:[#allocation11 + $0x70] sm:$0xff] }
 0xcfa   :  { %5741 = vst [vmem:[#allocation50_spill] sm:$0xff] %v5292_v61 }
 0xcfb   :  { %2541 = vmatpush.msrb.mxu0 %v5140_v57  ;;  %v2494_v57 = vld [vmem:[#allocation11 + $0x68] sm:$0xff] }
 0xcfd   :  { %2542 = vmatpush.msrb.mxu0 %v5064_v4 }
 0xcff   :  { %2543 = vmatpush.msrb.mxu0 %v5067_v49 }
 0xd01   :  { %2544 = vmatpush.msrb.mxu0 %v5070_v1 }
 0xd5e   :  { %v2131_v1 = vpop.f32.mrf.mxu0 }
 0xd63   :  { %v2091_v24 = vpop.f32.mrf.mxu2  ;;  %v2111_v22 = vpop.f32.mrf.mxu3 }
 0xd64   :  { %v2242_v14 = vadd.f32 %v2199_v16, %v2091_v24 }
 0xd66   :  { %v3430_v12 = vmul.f32 -1.442695, %v2242_v14  ;;  %v5160_v14 = vld [vmem:[#allocation10 + $0x170] sm:$0xff] }
 0xd67   :  { %2441 = vmatpush.msra.mxu2 %v5160_v14 }
 0xd68   :  { %3572 = vpow2.f32 %v3430_v12  ;;  %v2415_v12 = vld [vmem:[#allocation10 + $0x150] sm:$0xff] }
 0xd6b   :  { %v2219_v6 = vpop.f32.mrf.mxu2  ;;  %v2239_v17 = vpop.f32.mrf.mxu3 }
 0xd6c   :  { %v2262_v20 = vadd.f32 %v2219_v6, %v2111_v22  ;;  %v2282_v49 = vadd.f32 %v5077_v11, %v2239_v17  ;;  %v2412_v22 = vld [vmem:[#allocation10 + $0x138] sm:$0xff]  ;;  %v5165_v6 = vld [vmem:[#allocation10 + $0x140] sm:$0xff]  ;;  %v5187_v17 = vld [vmem:[#allocation10 + $0xc8] sm:$0xff] }
 0xd6e   :  { %v3573_v56 = vpop.eup %3572  ;;  %v3431_v29 = vmul.f32 -1.442695, %v2262_v20  ;;  %v2409_v20 = vld [vmem:[#allocation10 + $0x120] sm:$0xff] }
 0xd6f   :  { %v2246_v47 = vadd.f32 1.0, %v3573_v56  ;;  %v5168_v56 = vld [vmem:[#allocation10 + $0x128] sm:$0xff] }
 0xd70   :  { %3574 = vpow2.f32 %v3431_v29  ;;  %v2406_v29 = vld [vmem:[#allocation10 + $0x108] sm:$0xff] }
 0xd71   :  { %3576 = vrcp.f32 %v2246_v47  ;;  %v2258_v3 = vand.u32 2147483648, %v2246_v47  ;;  %v2256_v5 = vand.u32 2147483647, %v2246_v47  ;;  %vm2252_vm4 = vweird.f32 %v2246_v47 }
 0xd73   :  { %v2259_v4 = vor.u32 1.1754944e-38, %v2258_v3  ;;  %vm2257_vm6 = vcmp.eq.f32.partialorder %v2256_v5, 8.507059e+37  ;;  %v5181_v3 = vld [vmem:[#allocation10 + $0xe0] sm:$0xff] }
 0xd74   :  { %v2397_v5 = vld [vmem:[#allocation10 + $0xc0] sm:$0xff] }
 0xd76   :  { %v3575_v63 = vpop.eup %3574 }
 0xd77   :  { %v3577_v9 = vpop.eup %3576  ;;  %v2266_v42 = vadd.f32 1.0, %v3575_v63  ;;  %v2403_v63 = vld [vmem:[#allocation10 + $0xf0] sm:$0xff] }
 0xd78   :  { %v2248_v26 = vmul.f32 %v3577_v9, %v2246_v47  ;;  %vm2253_vm2 = vweird.f32 %v3577_v9  ;;  %v5171_v47 = vld [vmem:[#allocation10 + $0x110] sm:$0xff] }
 0xd79   :  { %3578 = vrcp.f32 %v2266_v42  ;;  %vm2254_vm5 = vmor %vm2252_vm4, %vm2253_vm2  ;;  %v2278_v52 = vand.u32 2147483648, %v2266_v42  ;;  %v2276_v15 = vand.u32 2147483647, %v2266_v42  ;;  %vm2272_vm8 = vweird.f32 %v2266_v42 }
 0xd7a   :  { %v2249_v41 = vsub.f32 1.0, %v2248_v26  ;;  %v5179_v26 = vld [vmem:[#allocation10 + $0x160] sm:$0xff] }
 0xd7b   :  { %v2279_v30 = vor.u32 1.1754944e-38, %v2278_v52  ;;  %vm2277_vm10 = vcmp.eq.f32.partialorder %v2276_v15, 8.507059e+37  ;;  %v2385_v52 = vld [vmem:[#allocation10 + $0x60] sm:$0xff]  ;;  %v5215_v15 = vld [vmem:[#allocation10 + $0xd0] sm:$0xff] }
 0xd7c   :  { %v2250_v46 = vmul.f32 %v3577_v9, %v2249_v41  ;;  %v2400_v41 = vld [vmem:[#allocation10 + $0xd8] sm:$0xff] }
 0xd7e   :  { %v2251_v33 = vadd.f32 %v3577_v9, %v2250_v46  ;;  %v5185_v46 = vld [vmem:[#allocation10 + $0x148] sm:$0xff] }
 0xd7f   :  { %v3579_v27 = vpop.eup %3578 }
 0xd80   :  { %v2268_v39 = vmul.f32 %v3579_v27, %v2266_v42  ;;  %v2255_v35 = vsel %vm2254_vm5, %v3577_v9, %v2251_v33  ;;  %vm2273_vm7 = vweird.f32 %v3579_v27  ;;  %v5174_v9 = vld [vmem:[#allocation10 + $0xf8] sm:$0xff]  ;;  %v5191_v33 = vld [vmem:[#allocation10 + $0x130] sm:$0xff] }
 0xd81   :  { %v2260_v18 = vsel %vm2257_vm6, %v2259_v4, %v2255_v35  ;;  %vm2274_vm9 = vmor %vm2272_vm8, %vm2273_vm7  ;;  %v5176_v42 = vld [vmem:[#allocation10 + $0x178] sm:$0xff]  ;;  %v5193_v4 = vld [vmem:[#allocation10 + $0xb0] sm:$0xff] }
 0xd82   :  { %v2269_v44 = vsub.f32 1.0, %v2268_v39  ;;  %v2283_v40 = vmul.f32 %v2282_v49, %v2260_v18  ;;  %2461 = vmatpush.msra.mxu3 %v5176_v42  ;;  %v5197_v39 = vld [vmem:[#allocation10 + $0x118] sm:$0xff]  ;;  %v2391_v35 = vld [vmem:[#allocation10 + $0x90] sm:$0xff]  ;;  %v5203_v18 = vld [vmem:[#allocation10 + $0x100] sm:$0xff] }
 0xd83   :  { %v5199_v49 = vld [vmem:[#allocation10 + $0x98] sm:$0xff] }
 0xd84   :  { %v2270_v0 = vmul.f32 %v3579_v27, %v2269_v44  ;;  %v2284_v7 = vadd.f32 %v2283_v40, %v2131_v1  ;;  %2462 = vmatpush.msra.mxu3 %v5179_v26  ;;  %v2388_v44 = vld [vmem:[#allocation10 + $0x78] sm:$0xff]  ;;  %v5205_v40 = vld [vmem:[#allocation10 + $0x80] sm:$0xff]  ;;  %v5209_v1 = vld [vmem:[#allocation10 + $0xe8] sm:$0xff] }
 0xd86   :  { %v2271_v19 = vadd.f32 %v3579_v27, %v2270_v0  ;;  %3580 = vtanh.f32 %v2284_v7  ;;  %2463 = vmatpush.msra.mxu3 %v5185_v46  ;;  %v5211_v0 = vld [vmem:[#allocation10 + $0x68] sm:$0xff] }
 0xd87   :  { %v2382_v7 = vld [vmem:[#allocation10 + $0x48] sm:$0xff] }
 0xd88   :  { %v2275_v25 = vsel %vm2274_vm9, %v3579_v27, %v2271_v19  ;;  %v2394_v27 = vld [vmem:[#allocation10 + $0xa8] sm:$0xff]  ;;  %2464 = vmatpush.msra.mxu3 %v5191_v33  ;;  %v5217_v19 = vld [vmem:[#allocation10 + $0x50] sm:$0xff] }
 0xd89   :  { %v2280_v62 = vsel %vm2277_vm10, %v2279_v30, %v2275_v25  ;;  %v5221_v30 = vld [vmem:[#allocation10 + $0xb8] sm:$0xff]  ;;  %v2379_v25 = vld [vmem:[#allocation10 + $0x30] sm:$0xff] }
 0xd8a   :  { %v2286_v32 = vsub.f32 1.0, %v2280_v62  ;;  %v2288_v34 = vmul.f32 %v2280_v62, %v5081_v10  ;;  %v2418_v10 = vld [vmem:[#allocation10 + $0x168] sm:$0xff]  ;;  %2465 = vmatpush.msra.mxu3 %v5197_v39  ;;  %v5223_v62 = vld [vmem:[#allocation10 + $0x38] sm:$0xff] }
 0xd8b   :  { %2421 = vmatpush.msra.mxu1 %v2418_v10 }
 0xd8c   :  { %v3581_v28 = vpop.eup %3580  ;;  %2466 = vmatpush.msra.mxu3 %v5203_v18 }
 0xd8d   :  { %v2287_v11 = vmul.f32 %v3581_v28, %v2286_v32  ;;  %2422 = vmatpush.msra.mxu1 %v2415_v12  ;;  %v5228_v28 = vld [vmem:[#allocation10 + $0xa0] sm:$0xff] }
 0xd8e   :  { %2467 = vmatpush.msra.mxu3 %v5209_v1 }
 0xd8f   :  { %v5148_v37 = vadd.f32 %v2288_v34, %v2287_v11  ;;  %2423 = vmatpush.msra.mxu1 %v2412_v22  ;;  %v2376_v11 = vld [vmem:[#allocation10 + $0x18] sm:$0xff]  ;;  %v5230_v34 = vld [vmem:[#allocation10 + $0x20] sm:$0xff] }
 0xd90   :  { %2468 = vmatpush.msra.mxu3 %v5215_v15 }
 0xd91   :  { %2322 = vmatmul.f32.vlgmr.msra.gmra.mxu0 %v5148_v37  ;;  %2424 = vmatpush.msra.mxu1 %v2409_v20 }
 0xd92   :  { %2768 = vmatpush.msra.mxu0 %v2418_v10  ;;  %2469 = vmatpush.msra.mxu3 %v5221_v30  ;;  %v2527_v10 = vld [vmem:[#allocation11 + $0x170] sm:$0xff] }
 0xd93   :  { %2425 = vmatpush.msra.mxu1 %v2406_v29 }
 0xd94   :  { %2769 = vmatpush.msra.mxu0 %v2415_v12  ;;  %2470 = vmatpush.msra.mxu3 %v5228_v28  ;;  %v5244_v12 = vld [vmem:[#allocation11 + $0x178] sm:$0xff] }
 0xd95   :  { %2426 = vmatpush.msra.mxu1 %v2403_v63 }
 0xd96   :  { %2770 = vmatpush.msra.mxu0 %v2412_v22 }
 0xd97   :  { %2427 = vmatpush.msra.mxu1 %v2400_v41 }
 0xd98   :  { %2771 = vmatpush.msra.mxu0 %v2409_v20  ;;  %v2524_v20 = vld [vmem:[#allocation11 + $0x158] sm:$0xff] }
 0xd99   :  { %2545 = vmatmul.f32.vlgmr.msrb.gmra.mxu0 %v5148_v37  ;;  %2428 = vmatpush.msra.mxu1 %v2397_v5 }
 0xd9a   :  { %2772 = vmatpush.msra.mxu0 %v2406_v29  ;;  %v5248_v29 = vld [vmem:[#allocation11 + $0x160] sm:$0xff] }
 0xd9b   :  { %2429 = vmatpush.msra.mxu1 %v2394_v27 }
 0xd9c   :  { %2773 = vmatpush.msra.mxu0 %v2403_v63  ;;  %v2521_v63 = vld [vmem:[#allocation11 + $0x140] sm:$0xff] }
 0xd9d   :  { %2430 = vmatpush.msra.mxu1 %v2391_v35 }
 0xd9e   :  { %2774 = vmatpush.msra.mxu0 %v2400_v41  ;;  %v2518_v41 = vld [vmem:[#allocation11 + $0x128] sm:$0xff] }
 0xd9f   :  { %2431 = vmatpush.msra.mxu1 %v2388_v44 }
 0xda0   :  { %2775 = vmatpush.msra.mxu0 %v2397_v5  ;;  %v5254_v5 = vld [vmem:[#allocation11 + $0x130] sm:$0xff] }
 0xda1   :  { %2432 = vmatpush.msra.mxu1 %v2385_v52 }
 0xda2   :  { %2776 = vmatpush.msra.mxu0 %v2394_v27  ;;  %v2515_v27 = vld [vmem:[#allocation11 + $0x110] sm:$0xff] }
 0xda3   :  { %2433 = vmatpush.msra.mxu1 %v2382_v7 }
 0xda4   :  { %2777 = vmatpush.msra.mxu0 %v2391_v35  ;;  %v5257_v35 = vld [vmem:[#allocation11 + $0x118] sm:$0xff] }
 0xda5   :  { %2434 = vmatpush.msra.mxu1 %v2379_v25 }
 0xda6   :  { %2778 = vmatpush.msra.mxu0 %v2388_v44  ;;  %v2512_v44 = vld [vmem:[#allocation11 + $0xf8] sm:$0xff] }
 0xda7   :  { %2435 = vmatpush.msra.mxu1 %v2376_v11 }
 0xda8   :  { %2779 = vmatpush.msra.mxu0 %v2385_v52  ;;  %v5260_v52 = vld [vmem:[#allocation11 + $0x100] sm:$0xff] }
 0xdaa   :  { %2780 = vmatpush.msra.mxu0 %v2382_v7  ;;  %v2509_v7 = vld [vmem:[#allocation11 + $0xe0] sm:$0xff] }
 0xdac   :  { %2781 = vmatpush.msra.mxu0 %v2379_v25  ;;  %v5263_v25 = vld [vmem:[#allocation11 + $0xe8] sm:$0xff] }
 0xdae   :  { %2782 = vmatpush.msra.mxu0 %v2376_v11  ;;  %v2506_v11 = vld [vmem:[#allocation11 + $0xc8] sm:$0xff] }
 0xe0e   :  { %v2323_v51 = vpop.f32.mrf.mxu0 }
 0xe0f   :  { %v2324_v55 = vadd.f32 %v5088_v2, %v2323_v51  ;;  %v5163_v2 = vld [vmem:[#allocation10 + $0x158] sm:$0xff]  ;;  %v5234_v51 = vld [vmem:[#allocation10 + $0x88] sm:$0xff] }
 0xe10   :  { %2442 = vmatpush.msra.mxu2 %v5163_v2  ;;  %2471 = vmatpush.msra.mxu3 %v5234_v51 }
 0xe11   :  { %2327 = vst [vmem:[#allocation14 + $0x18] sm:$0xff] %v2324_v55  ;;  %2328 = vmax.xlane.f32.xlu0 %v2324_v55 }
 0xe12   :  { %2443 = vmatpush.msra.mxu2 %v5165_v6 }
 0xe14   :  { %2444 = vmatpush.msra.mxu2 %v5168_v56 }
 0xe16   :  { %2445 = vmatpush.msra.mxu2 %v5171_v47 }
 0xe18   :  { %2446 = vmatpush.msra.mxu2 %v5174_v9 }
 0xe1a   :  { %2447 = vmatpush.msra.mxu2 %v5181_v3 }
 0xe1c   :  { %2448 = vmatpush.msra.mxu2 %v5187_v17 }
 0xe1e   :  { %2449 = vmatpush.msra.mxu2 %v5193_v4 }
 0xe20   :  { %2450 = vmatpush.msra.mxu2 %v5199_v49 }
 0xe22   :  { %2451 = vmatpush.msra.mxu2 %v5205_v40 }
 0xe24   :  { %2452 = vmatpush.msra.mxu2 %v5211_v0 }
 0xe26   :  { %2453 = vmatpush.msra.mxu2 %v5217_v19 }
 0xe28   :  { %2454 = vmatpush.msra.mxu2 %v5223_v62 }
 0xe2a   :  { %2455 = vmatpush.msra.mxu2 %v5230_v34 }
 0xe84   :  { %v2329_v58 = vpop.xlane.xlu0 %2328 }
 0xe85   :  { %vm2330_vm11 = vcmp.eq.f32.partialorder %v2324_v55, %v2329_v58  ;;  %v2373_v55 = vld [vmem:[#allocation10] sm:$0xff]  ;;  %v5236_v58 = vld [vmem:[#allocation10 + $0x8] sm:$0xff] }
 0xe86   :  { %v5154_v31 = vsel %vm2330_vm11, %v5691_v21, 128  ;;  %2436 = vmatpush.msra.mxu1 %v2373_v55  ;;  %2456 = vmatpush.msra.mxu2 %v5236_v58 }
 0xe87   :  { %v2333_v16 = vshra.s32 %v5154_v31, 16  ;;  %v2332_v32 = vand.u32 65535, %v5154_v31  ;;  %2783 = vmatpush.msra.mxu0 %v2373_v55  ;;  %v5269_v55 = vld [vmem:[#allocation11 + $0xd0] sm:$0xff] }
 0xe88   :  { %2549 = vmatpush.msrb.mxu1 %v2527_v10  ;;  %2569 = vmatpush.msrb.mxu2 %v5244_v12 }
 0xe89   :  { %v5157_v24 = vcvt.s32.f32 %v2333_v16  ;;  %v2334_v16 = vcvt.s32.f32 %v2332_v32  ;;  %2896 = vmatpush.msrb.mxu0 %v2527_v10  ;;  %v5267_v32 = vld [vmem:[#allocation10 + $0x70] sm:$0xff] }
 0xe8a   :  { %2550 = vmatpush.msrb.mxu1 %v2524_v20  ;;  %2570 = vmatpush.msrb.mxu2 %v5248_v29  ;;  %v2503_v10 = vld [vmem:[#allocation11 + $0xb0] sm:$0xff] }
 0xe8b   :  { %2336 = vmin.xlane.f32.xlu1 %v5157_v24  ;;  %2897 = vmatpush.msrb.mxu0 %v2524_v20  ;;  %v5279_v20 = vld [vmem:[#allocation10 + $0x40] sm:$0xff] }
 0xe8c   :  { %2551 = vmatpush.msrb.mxu1 %v2521_v63  ;;  %2472 = vmatpush.msra.mxu3 %v5267_v32 }
 0xe8d   :  { %2898 = vmatpush.msrb.mxu0 %v2521_v63  ;;  %v2500_v63 = vld [vmem:[#allocation11 + $0x98] sm:$0xff] }
 0xe8e   :  { %2552 = vmatpush.msrb.mxu1 %v2518_v41 }
 0xe8f   :  { %2899 = vmatpush.msrb.mxu0 %v2518_v41  ;;  %v5281_v41 = vld [vmem:[#allocation11 + $0xa0] sm:$0xff] }
 0xe90   :  { %2553 = vmatpush.msrb.mxu1 %v2515_v27 }
 0xe91   :  { %2900 = vmatpush.msrb.mxu0 %v2515_v27  ;;  %v5284_v27 = vld [vmem:[#allocation10 + $0x28] sm:$0xff] }
 0xe92   :  { %2554 = vmatpush.msrb.mxu1 %v2512_v44 }
 0xe93   :  { %2901 = vmatpush.msrb.mxu0 %v2512_v44  ;;  %v2497_v44 = vld [vmem:[#allocation11 + $0x80] sm:$0xff] }
 0xe94   :  { %2555 = vmatpush.msrb.mxu1 %v2509_v7 }
 0xe95   :  { %2902 = vmatpush.msrb.mxu0 %v2509_v7  ;;  %v5286_v7 = vld [vmem:[#allocation11 + $0x88] sm:$0xff] }
 0xe96   :  { %2556 = vmatpush.msrb.mxu1 %v2506_v11  ;;  %5740 = vst [vmem:[#allocation48_spill] sm:$0xff] %v5286_v7 }
 0xe97   :  { %2903 = vmatpush.msrb.mxu0 %v2506_v11  ;;  %v5289_v11 = vld [vmem:[#allocation10 + $0x10] sm:$0xff] }
 0xe98   :  { %2557 = vmatpush.msrb.mxu1 %v2503_v10 }
 0xe99   :  { %2904 = vmatpush.msrb.mxu0 %v2503_v10  ;;  %v2491_v10 = vld [vmem:[#allocation11 + $0x50] sm:$0xff] }
 0xe9a   :  { %2558 = vmatpush.msrb.mxu1 %v2500_v63 }
 0xe9b   :  { %2905 = vmatpush.msrb.mxu0 %v2500_v63  ;;  %v2488_v63 = vld [vmem:[#allocation11 + $0x38] sm:$0xff] }
 0xe9c   :  { %2559 = vmatpush.msrb.mxu1 %v2497_v44 }
 0xe9d   :  { %2906 = vmatpush.msrb.mxu0 %v2497_v44  ;;  %v2485_v44 = vld [vmem:[#allocation11 + $0x20] sm:$0xff] }
 0xe9e   :  { %2560 = vmatpush.msrb.mxu1 %v2494_v57 }
 0xe9f   :  { %2907 = vmatpush.msrb.mxu0 %v2494_v57  ;;  %v5312_v57 = vld [vmem:[#allocation13 + $0x78] sm:$0xff] }
 0xea0   :  { %2561 = vmatpush.msrb.mxu1 %v2491_v10 }
 0xea1   :  { %2908 = vmatpush.msrb.mxu0 %v2491_v10  ;;  %v2354_v10 = vstv %s5299_s27 }
 0xea2   :  { %2562 = vmatpush.msrb.mxu1 %v2488_v63  ;;  %vm2355_vm13 = vcmp.eq.s32.totalorder %v5691_v21, %v2354_v10  ;;  %v3437_v10 = vsel %vm2363_vm0, 1.0, %v5693_v38 }
 0xea3   :  { %2909 = vmatpush.msrb.mxu0 %v2488_v63  ;;  %v5324_v63 = vld [vmem:[#allocation13 + $0x60] sm:$0xff]  ;;  %vm2356_vm15 = vmand %vm2355_vm13, %vm967_vm1 }
 0xea4   :  { %2563 = vmatpush.msrb.mxu1 %v2485_v44 }
 0xea5   :  { %2910 = vmatpush.msrb.mxu0 %v2485_v44  ;;  %v3435_v44 = vsel %vm2356_vm15, 1.0, %v5693_v38 }
 0xea6   :  { %2564 = vmatpush.msrb.mxu1 %v2482_v60  ;;  %v2366_v36 = vadd.f32 %v3437_v10, %v3435_v44  ;;  %v5417_v44 = vld [vmem:[%s5494_s7] ss:$0 sm:$0xff] }
 0xea7   :  { %2911 = vmatpush.msrb.mxu0 %v2482_v60 }
 0xefe   :  { %v5239_v31 = vpop.xlane.xlu1 %2336 }
 0xeff   :  { %vm2338_vm12 = vcmp.eq.f32.partialorder %v5157_v24, %v5239_v31  ;;  %v5251_v24 = vld [vmem:[#allocation11 + $0x148] sm:$0xff]  ;;  %v2343_v60 = vcvt.f32.s32 %v5239_v31  ;;  %v5762_v31 = vld [vmem:[#allocation40_spill] sm:$0xff] }
 0xf00   :  { %v2339_v22 = vsel %vm2338_vm12, %v2334_v16, inf  ;;  %2571 = vmatpush.msrb.mxu2 %v5251_v24  ;;  %v5273_v16 = vld [vmem:[#allocation10 + $0x58] sm:$0xff] }
 0xf01   :  { %2340 = vmin.xlane.f32.xlu2 %v2339_v22  ;;  %v5275_v22 = vld [vmem:[#allocation11 + $0xb8] sm:$0xff]  ;;  %2473 = vmatpush.msra.mxu3 %v5273_v16  ;;  %v2344_v59 = vshll.u32 %v2343_v60, 16 }
 0xf02   :  { %2572 = vmatpush.msrb.mxu2 %v5254_v5 }
 0xf03   :  { %2474 = vmatpush.msra.mxu3 %v5279_v20 }
 0xf04   :  { %2573 = vmatpush.msrb.mxu2 %v5257_v35 }
 0xf05   :  { %2475 = vmatpush.msra.mxu3 %v5284_v27 }
 0xf06   :  { %2574 = vmatpush.msrb.mxu2 %v5260_v52 }
 0xf07   :  { %2476 = vmatpush.msra.mxu3 %v5289_v11 }
 0xf08   :  { %2575 = vmatpush.msrb.mxu2 %v5263_v25 }
 0xf09   :  { %2653 = vmatpush.msrb.mxu3 %v5312_v57 }
 0xf0a   :  { %2576 = vmatpush.msrb.mxu2 %v5269_v55 }
 0xf0b   :  { %2654 = vmatpush.msrb.mxu3 %v5314_v48 }
 0xf0c   :  { %2577 = vmatpush.msrb.mxu2 %v5275_v22 }
 0xf0d   :  { %2655 = vmatpush.msrb.mxu3 %v5320_v53 }
 0xf0e   :  { %2578 = vmatpush.msrb.mxu2 %v5281_v41 }
 0xf0f   :  { %2656 = vmatpush.msrb.mxu3 %v5324_v63 }
 0xf10   :  { %2579 = vmatpush.msrb.mxu2 %v5286_v7 }
 0xf12   :  { %2580 = vmatpush.msrb.mxu2 %v5292_v61 }
 0xf14   :  { %2581 = vmatpush.msrb.mxu2 %v5301_v45 }
 0xf16   :  { %2582 = vmatpush.msrb.mxu2 %v5303_v43  ;;  %v2370_v43 = vstv %s2369_s11 }
 0xf18   :  { %2583 = vmatpush.msrb.mxu2 %v5306_v50 }
 0xf1a   :  { %2584 = vmatpush.msrb.mxu2 %v5309_v13  ;;  %v2367_v13 = vstv %s2352_s30 }
 0xf1b   :  { %v2368_v45 = vmul.f32 %v2367_v13, %v2366_v36  ;;  %v5747_v36 = vld [vmem:[#allocation50_spill] sm:$0xff]  ;;  %v2648_v13 = vld [vmem:[#allocation13 + $0x58] sm:$0xff] }
 0xf1c   :  { %2657 = vmatpush.msrb.mxu3 %v2648_v13 }
 0xf74   :  { %v2341_v54 = vpop.xlane.xlu2 %2340 }
 0xf75   :  { %v2342_v23 = vcvt.f32.s32 %v2341_v54  ;;  %v5749_v54 = vld [vmem:[#allocation51_spill] sm:$0xff] }
 0xf77   :  { %v2345_v50 = vadd.s32 %v2344_v59, %v2342_v23  ;;  %v5748_v23 = vld [vmem:[#allocation35_spill] sm:$0xff] }
 0xf79   :  { %vm2346_vm2 = vcmp.eq.s32.totalorder %v5691_v21, %v2345_v50  ;;  %v2647_v50 = vld [vmem:[#allocation13 + $0x50] sm:$0xff] }
 0xf7a   :  { %v3432_v8 = vsel %vm2346_vm2, 1.0, %v5693_v38  ;;  %2658 = vmatpush.msrb.mxu3 %v2647_v50 }
 0xf7b   :  { %v2371_v61 = vmul.f32 %v3432_v8, %v2370_v43  ;;  %v5746_v8 = vld [vmem:[#allocation48_spill] sm:$0xff]  ;;  %v2646_v43 = vld [vmem:[#allocation13 + $0x48] sm:$0xff] }
 0xf7c   :  { %2659 = vmatpush.msrb.mxu3 %v2646_v43 }
 0xf7d   :  { %v2372_v7 = vadd.f32 %v2371_v61, %v2368_v45  ;;  %v2645_v45 = vld [vmem:[#allocation13 + $0x40] sm:$0xff]  ;;  %v2644_v61 = vld [vmem:[#allocation13 + $0x38] sm:$0xff] }
 0xf7e   :  { %2660 = vmatpush.msrb.mxu3 %v2645_v45 }
 0xf7f   :  { %2437 = vmatmul.f32.vlgmr.msra.gmra.mxu1 %v2372_v7  ;;  %2457 = vmatmul.f32.vlgmr.msra.gmra.mxu2 %v2372_v7 }
 0xf80   :  { %2477 = vmatmul.f32.vlgmr.msra.gmra.mxu3 %v2372_v7  ;;  %2788 = vmatpush.msra.mxu1 %v5160_v14  ;;  %v2643_v14 = vld [vmem:[#allocation13 + $0x30] sm:$0xff] }
 0xf81   :  { %2808 = vmatpush.msra.mxu2 %v5176_v42  ;;  %2661 = vmatpush.msrb.mxu3 %v2644_v61  ;;  %v2637_v42 = vld [vmem:[#allocation13] sm:$0xff] }
 0xf82   :  { %2789 = vmatpush.msra.mxu1 %v5163_v2  ;;  %v2642_v2 = vld [vmem:[#allocation13 + $0x28] sm:$0xff] }
 0xf83   :  { %2809 = vmatpush.msra.mxu2 %v5179_v26  ;;  %2662 = vmatpush.msrb.mxu3 %v2643_v14  ;;  %v5752_v26 = vld [vmem:[#allocation21_spill] sm:$0xff] }
 0xf84   :  { %2790 = vmatpush.msra.mxu1 %v5165_v6  ;;  %v2641_v6 = vld [vmem:[#allocation13 + $0x20] sm:$0xff] }
 0xf85   :  { %2810 = vmatpush.msra.mxu2 %v5185_v46  ;;  %2663 = vmatpush.msrb.mxu3 %v2642_v2  ;;  %v5754_v46 = vld [vmem:[#allocation22_spill] sm:$0xff] }
 0xf86   :  { %2791 = vmatpush.msra.mxu1 %v5168_v56  ;;  %v2640_v56 = vld [vmem:[#allocation13 + $0x18] sm:$0xff] }
 0xf87   :  { %2565 = vmatmul.f32.vlgmr.msrb.gmra.mxu1 %v5148_v37  ;;  %2585 = vmatmul.f32.vlgmr.msrb.gmra.mxu2 %v5148_v37 }
 0xf88   :  { %2792 = vmatpush.msra.mxu1 %v5171_v47  ;;  %2811 = vmatpush.msra.mxu2 %v5191_v33  ;;  %v2639_v47 = vld [vmem:[#allocation13 + $0x10] sm:$0xff]  ;;  %v2546_v33 = vpop.f32.mrf.mxu0 }
 0xf89   :  { %2664 = vmatpush.msrb.mxu3 %v2641_v6 }
 0xf8a   :  { %2793 = vmatpush.msra.mxu1 %v5174_v9  ;;  %2812 = vmatpush.msra.mxu2 %v5197_v39  ;;  %v2638_v9 = vld [vmem:[#allocation13 + $0x8] sm:$0xff]  ;;  %v5756_v39 = vld [vmem:[#allocation27_spill] sm:$0xff] }
 0xf8b   :  { %2665 = vmatpush.msrb.mxu3 %v2640_v56 }
 0xf8c   :  { %2794 = vmatpush.msra.mxu1 %v5181_v3  ;;  %2813 = vmatpush.msra.mxu2 %v5203_v18  ;;  %v5753_v3 = vld [vmem:[#allocation26_spill] sm:$0xff]  ;;  %v5757_v18 = vld [vmem:[#allocation24_spill] sm:$0xff] }
 0xf8d   :  { %2666 = vmatpush.msrb.mxu3 %v2639_v47 }
 0xf8e   :  { %2795 = vmatpush.msra.mxu1 %v5187_v17  ;;  %2814 = vmatpush.msra.mxu2 %v5209_v1  ;;  %v5755_v17 = vld [vmem:[#allocation23_spill] sm:$0xff]  ;;  %v5758_v1 = vld [vmem:[#allocation29_spill] sm:$0xff] }
 0xf8f   :  { %2667 = vmatpush.msrb.mxu3 %v2638_v9 }
 0xf90   :  { %2796 = vmatpush.msra.mxu1 %v5193_v4  ;;  %2815 = vmatpush.msra.mxu2 %v5215_v15 }
 0xf91   :  { %2668 = vmatpush.msrb.mxu3 %v2637_v42 }
 0xf92   :  { %2797 = vmatpush.msra.mxu1 %v5199_v49  ;;  %2816 = vmatpush.msra.mxu2 %v5221_v30  ;;  %v5760_v30 = vld [vmem:[#allocation34_spill] sm:$0xff] }
 0xf93   :  { %2876 = vmatpush.msra.mxu3 %v5752_v26 }
 0xf94   :  { %2798 = vmatpush.msra.mxu1 %v5205_v40  ;;  %2817 = vmatpush.msra.mxu2 %v5228_v28  ;;  %v5761_v28 = vld [vmem:[#allocation37_spill] sm:$0xff] }
 0xf95   :  { %2877 = vmatpush.msra.mxu3 %v5753_v3 }
 0xf96   :  { %2799 = vmatpush.msra.mxu1 %v5211_v0  ;;  %2818 = vmatpush.msra.mxu2 %v5234_v51  ;;  %v5759_v0 = vld [vmem:[#allocation32_spill] sm:$0xff] }
 0xf97   :  { %2878 = vmatpush.msra.mxu3 %v5754_v46 }
 0xf98   :  { %2800 = vmatpush.msra.mxu1 %v5217_v19  ;;  %2819 = vmatpush.msra.mxu2 %v5267_v32 }
 0xf99   :  { %2879 = vmatpush.msra.mxu3 %v5755_v17 }
 0xf9a   :  { %2801 = vmatpush.msra.mxu1 %v5223_v62  ;;  %2820 = vmatpush.msra.mxu2 %v5273_v16 }
 0xf9b   :  { %2880 = vmatpush.msra.mxu3 %v5756_v39 }
 0xf9c   :  { %2802 = vmatpush.msra.mxu1 %v5230_v34  ;;  %2821 = vmatpush.msra.mxu2 %v5279_v20 }
 0xf9d   :  { %2881 = vmatpush.msra.mxu3 %v5757_v18 }
 0xf9e   :  { %2803 = vmatpush.msra.mxu1 %v5236_v58  ;;  %2822 = vmatpush.msra.mxu2 %v5284_v27 }
 0xf9f   :  { %2882 = vmatpush.msra.mxu3 %v5758_v1 }
 0xfa0   :  { %2916 = vmatpush.msrb.mxu1 %v5244_v12  ;;  %2823 = vmatpush.msra.mxu2 %v5289_v11  ;;  %v5763_v12 = vld [vmem:[#allocation43_spill] sm:$0xff] }
 0xfa1   :  { %2883 = vmatpush.msra.mxu3 %v5759_v0 }
 0xfa2   :  { %2917 = vmatpush.msrb.mxu1 %v5248_v29  ;;  %3000 = vmatpush.msrb.mxu2 %v5312_v57  ;;  %v5404_v29 = vld [vmem:[#allocation11 + $0x30] sm:$0xff] }
 0xfa3   :  { %2884 = vmatpush.msra.mxu3 %v5760_v30 }
 0xfa4   :  { %2918 = vmatpush.msrb.mxu1 %v5251_v24  ;;  %3001 = vmatpush.msrb.mxu2 %v5314_v48  ;;  %v5751_v48 = vld [vmem:[#allocation20_spill] sm:$0xff]  ;;  %v5764_v24 = vld [vmem:[#allocation46_spill] sm:$0xff] }
 0xfa5   :  { %2885 = vmatpush.msra.mxu3 %v5761_v28 }
 0xfa6   :  { %2919 = vmatpush.msrb.mxu1 %v5254_v5  ;;  %3002 = vmatpush.msrb.mxu2 %v5320_v53  ;;  %v5750_v53 = vld [vmem:[#allocation52_spill] sm:$0xff] }
 0xfa7   :  { %2886 = vmatpush.msra.mxu3 %v5762_v31  ;;  %v5407_v5 = vld [vmem:[#allocation11 + $0x18] sm:$0xff]  ;;  %v2717_v31 = vstv %s2716_s6 }
 0xfa8   :  { %2920 = vmatpush.msrb.mxu1 %v5257_v35  ;;  %3003 = vmatpush.msrb.mxu2 %v5324_v63 }
 0xfa9   :  { %2887 = vmatpush.msra.mxu3 %v5763_v12 }
 0xfaa   :  { %2921 = vmatpush.msrb.mxu1 %v5260_v52  ;;  %3004 = vmatpush.msrb.mxu2 %v2648_v13  ;;  %v5410_v52 = vld [vmem:[#allocation11] sm:$0xff] }
 0xfab   :  { %2888 = vmatpush.msra.mxu3 %v5764_v24 }
 0xfac   :  { %2922 = vmatpush.msrb.mxu1 %v5263_v25  ;;  %3005 = vmatpush.msrb.mxu2 %v2647_v50 }
 0xfad   :  { %2889 = vmatpush.msra.mxu3 %v5404_v29 }
 0xfae   :  { %2923 = vmatpush.msrb.mxu1 %v5269_v55  ;;  %3006 = vmatpush.msrb.mxu2 %v2646_v43 }
 0xfaf   :  { %2890 = vmatpush.msra.mxu3 %v5407_v5 }
 0xfb0   :  { %2924 = vmatpush.msrb.mxu1 %v5275_v22  ;;  %3007 = vmatpush.msrb.mxu2 %v2645_v45 }
 0xfb1   :  { %2891 = vmatpush.msra.mxu3 %v5410_v52 }
 0xfb2   :  { %2925 = vmatpush.msrb.mxu1 %v5281_v41  ;;  %3008 = vmatpush.msrb.mxu2 %v2644_v61 }
 0xfb4   :  { %2926 = vmatpush.msrb.mxu1 %v5746_v8  ;;  %3009 = vmatpush.msrb.mxu2 %v2643_v14 }
 0xfb6   :  { %2927 = vmatpush.msrb.mxu1 %v5747_v36  ;;  %3010 = vmatpush.msrb.mxu2 %v2642_v2 }
 0xfb8   :  { %2928 = vmatpush.msrb.mxu1 %v5748_v23  ;;  %3011 = vmatpush.msrb.mxu2 %v2641_v6 }
 0xfba   :  { %2929 = vmatpush.msrb.mxu1 %v5749_v54  ;;  %3012 = vmatpush.msrb.mxu2 %v2640_v56 }
 0xfbc   :  { %2930 = vmatpush.msrb.mxu1 %v5750_v53  ;;  %3013 = vmatpush.msrb.mxu2 %v2639_v47 }
 0xfbe   :  { %2931 = vmatpush.msrb.mxu1 %v5751_v48  ;;  %3014 = vmatpush.msrb.mxu2 %v2638_v9 }
 0xfc0   :  { %3015 = vmatpush.msrb.mxu2 %v2637_v42  ;;  %v5428_v42 = vld [vmem:[%s5496_s9] ss:$0 sm:$0xff]  ;;  %s3442_s9 = sld [smem:[#allocation4 + $0xa]] }
 0xfc6   :  { %v2701_v18 = vstv %s3442_s9 }
 0xfc7   :  { %vm2702_vm14 = vcmp.eq.s32.totalorder %v5691_v21, %v2701_v18 }
 0xfc8   :  { %vm2703_vm0 = vmand %vm2702_vm14, %vm967_vm1 }
 0xffc   :  { %v2438_v4 = vpop.f32.mrf.mxu1 }
 0xffd   :  { %v2589_v49 = vadd.f32 %v2546_v33, %v2438_v4 }
 0xfff   :  { %v3438_v40 = vmul.f32 -1.442695, %v2589_v49 }
0x1001   :  { %3582 = vpow2.f32 %v3438_v40  ;;  %v2708_v40 = vstv %s3444_s15 }
0x1002   :  { %v2458_v15 = vpop.f32.mrf.mxu2  ;;  %vm2709_vm15 = vcmp.eq.s32.totalorder %v5691_v21, %v2708_v40 }
0x1003   :  { %v2478_v23 = vpop.f32.mrf.mxu3  ;;  %vm2710_vm2 = vmand %vm2709_vm15, %vm975_vm3 }
0x1004   :  { %v2566_v19 = vpop.f32.mrf.mxu1 }
0x1005   :  { %v2609_v62 = vadd.f32 %v2566_v19, %v2458_v15  ;;  %v3443_v15 = vsel %vm2703_vm0, 1.0, %v5693_v38  ;;  %v3445_v19 = vsel %vm2710_vm2, 1.0, %v5693_v38 }
0x1007   :  { %v3583_v34 = vpop.eup %3582  ;;  %v3439_v51 = vmul.f32 -1.442695, %v2609_v62 }
0x1008   :  { %v2593_v58 = vadd.f32 1.0, %v3583_v34  ;;  %v2713_v34 = vadd.f32 %v3445_v19, %v3443_v15 }
0x1009   :  { %3584 = vpow2.f32 %v3439_v51  ;;  %v2714_v51 = vstv %s2699_s17 }
0x100a   :  { %3586 = vrcp.f32 %v2593_v58  ;;  %v2605_v22 = vand.u32 2147483648, %v2593_v58  ;;  %v2603_v41 = vand.u32 2147483647, %v2593_v58  ;;  %v2586_v27 = vpop.f32.mrf.mxu2  ;;  %vm2599_vm5 = vweird.f32 %v2593_v58 }
0x100b   :  { %v2629_v10 = vadd.f32 %v5417_v44, %v2586_v27  ;;  %v2715_v12 = vmul.f32 %v2714_v51, %v2713_v34 }
0x100c   :  { %v2606_v57 = vor.u32 1.1754944e-38, %v2605_v22  ;;  %vm2604_vm7 = vcmp.eq.f32.partialorder %v2603_v41, 8.507059e+37  ;;  %v3211_v22 = vld [vmem:[#allocation11 + $0x120] sm:$0xff] }
0x100f   :  { %v3585_v35 = vpop.eup %3584 }
0x1010   :  { %v3587_v25 = vpop.eup %3586  ;;  %v2613_v32 = vadd.f32 1.0, %v3585_v35 }
0x1011   :  { %v2595_v55 = vmul.f32 %v3587_v25, %v2593_v58  ;;  %vm2600_vm4 = vweird.f32 %v3587_v25 }
0x1012   :  { %3588 = vrcp.f32 %v2613_v32  ;;  %vm2601_vm6 = vmor %vm2599_vm5, %vm2600_vm4  ;;  %v2625_v54 = vand.u32 2147483648, %v2613_v32  ;;  %v2623_v48 = vand.u32 2147483647, %v2613_v32  ;;  %vm2619_vm9 = vweird.f32 %v2613_v32 }
0x1013   :  { %v2596_v16 = vsub.f32 1.0, %v2595_v55  ;;  %v3217_v55 = vld [vmem:[#allocation11 + $0x150] sm:$0xff] }
0x1014   :  { %v2626_v43 = vor.u32 1.1754944e-38, %v2625_v54  ;;  %vm2624_vm11 = vcmp.eq.f32.partialorder %v2623_v48, 8.507059e+37  ;;  %v3190_v54 = vld [vmem:[#allocation11 + $0x78] sm:$0xff] }
0x1015   :  { %v2597_v20 = vmul.f32 %v3587_v25, %v2596_v16  ;;  %v3214_v16 = vld [vmem:[#allocation11 + $0x138] sm:$0xff] }
0x1017   :  { %v2598_v7 = vadd.f32 %v3587_v25, %v2597_v20  ;;  %v3208_v20 = vld [vmem:[#allocation11 + $0x108] sm:$0xff] }
0x1018   :  { %v3589_v11 = vpop.eup %3588 }
0x1019   :  { %v2615_v63 = vmul.f32 %v3589_v11, %v2613_v32  ;;  %v2602_v60 = vsel %vm2601_vm6, %v3587_v25, %v2598_v7  ;;  %vm2620_vm8 = vweird.f32 %v3589_v11  ;;  %v3220_v32 = vld [vmem:[#allocation11 + $0x168] sm:$0xff] }
0x101a   :  { %v2607_v59 = vsel %vm2604_vm7, %v2606_v57, %v2602_v60  ;;  %vm2621_vm10 = vmor %vm2619_vm9, %vm2620_vm8  ;;  %v3199_v60 = vld [vmem:[#allocation11 + $0xc0] sm:$0xff] }
0x101b   :  { %v2616_v8 = vsub.f32 1.0, %v2615_v63  ;;  %v2630_v36 = vmul.f32 %v2629_v10, %v2607_v59  ;;  %v3202_v63 = vld [vmem:[#allocation11 + $0xd8] sm:$0xff]  ;;  %v3196_v10 = vld [vmem:[#allocation11 + $0xa8] sm:$0xff] }
0x101d   :  { %v2617_v53 = vmul.f32 %v3589_v11, %v2616_v8  ;;  %v2631_v13 = vadd.f32 %v2630_v36, %v2478_v23  ;;  %v3193_v23 = vld [vmem:[#allocation11 + $0x90] sm:$0xff] }
0x101f   :  { %v2618_v50 = vadd.f32 %v3589_v11, %v2617_v53  ;;  %3590 = vtanh.f32 %v2631_v13  ;;  %v3187_v13 = vld [vmem:[#allocation11 + $0x60] sm:$0xff] }
0x1021   :  { %v2622_v45 = vsel %vm2621_vm10, %v3589_v11, %v2618_v50  ;;  %v3205_v11 = vld [vmem:[#allocation11 + $0xf0] sm:$0xff] }
0x1022   :  { %v2627_v61 = vsel %vm2624_vm11, %v2626_v43, %v2622_v45  ;;  %v3184_v43 = vld [vmem:[#allocation11 + $0x48] sm:$0xff] }
0x1023   :  { %v2633_v14 = vsub.f32 1.0, %v2627_v61  ;;  %v2635_v56 = vmul.f32 %v2627_v61, %v5148_v37 }
0x1025   :  { %v3591_v2 = vpop.eup %3590 }
0x1026   :  { %v2634_v6 = vmul.f32 %v3591_v2, %v2633_v14 }
0x1028   :  { %v5421_v47 = vadd.f32 %v2635_v56, %v2634_v6 }
0x102a   :  { %2669 = vmatmul.f32.vlgmr.msrb.gmra.mxu3 %v5421_v47 }
0x1032   :  { %2892 = vmatmul.f32.vlgmr.msra.gmra.mxu3 %v5421_v47 }
0x10ad   :  { %v2670_v9 = vpop.f32.mrf.mxu3 }
0x10ae   :  { %v2671_v26 = vadd.f32 %v5428_v42, %v2670_v9 }
0x10b0   :  { %2674 = vst [vmem:[#allocation14 + $0x20] sm:$0xff] %v2671_v26  ;;  %2675 = vmax.xlane.f32.xlu0 %v2671_v26 }
0x10b5   :  { %v2893_v41 = vpop.f32.mrf.mxu3 }
0x1123   :  { %v2676_v3 = vpop.xlane.xlu0 %2675 }
0x1124   :  { %vm2677_vm12 = vcmp.eq.f32.partialorder %v2671_v26, %v2676_v3 }
0x1125   :  { %v2678_v37 = vsel %vm2677_vm12, %v5691_v21, 128 }
0x1126   :  { %v2680_v46 = vshra.s32 %v2678_v37, 16  ;;  %v2679_v33 = vand.u32 65535, %v2678_v37 }
0x1128   :  { %v2682_v17 = vcvt.s32.f32 %v2680_v46  ;;  %v2681_v39 = vcvt.s32.f32 %v2679_v33 }
0x112a   :  { %2683 = vmin.xlane.f32.xlu1 %v2682_v17 }
0x119d   :  { %v2684_v4 = vpop.xlane.xlu1 %2683 }
0x119e   :  { %vm2685_vm13 = vcmp.eq.f32.partialorder %v2682_v17, %v2684_v4  ;;  %v2690_v0 = vcvt.f32.s32 %v2684_v4 }
0x119f   :  { %v2686_v49 = vsel %vm2685_vm13, %v2681_v39, inf }
0x11a0   :  { %2687 = vmin.xlane.f32.xlu2 %v2686_v49  ;;  %v2691_v62 = vshll.u32 %v2690_v0, 16 }
0x1213   :  { %v2688_v30 = vpop.xlane.xlu2 %2687 }
0x1214   :  { %v2689_v28 = vcvt.f32.s32 %v2688_v30 }
0x1216   :  { %v2692_v58 = vadd.s32 %v2691_v62, %v2689_v28 }
0x1218   :  { %vm2693_vm4 = vcmp.eq.s32.totalorder %v5691_v21, %v2692_v58 }
0x1219   :  { %v3440_v24 = vsel %vm2693_vm4, 1.0, %v5693_v38 }
0x121a   :  { %v2718_v35 = vmul.f32 %v3440_v24, %v2717_v31 }
0x121c   :  { %v2719_v25 = vadd.f32 %v2718_v35, %v2715_v12 }
0x121e   :  { %2784 = vmatmul.f32.vlgmr.msra.gmra.mxu0 %v2719_v25  ;;  %2804 = vmatmul.f32.vlgmr.msra.gmra.mxu1 %v2719_v25 }
0x121f   :  { %2824 = vmatmul.f32.vlgmr.msra.gmra.mxu2 %v2719_v25 }
0x1220   :  { %3223 = vmatpush.msra.mxu2 %v3220_v32 }
0x1222   :  { %3224 = vmatpush.msra.mxu2 %v3217_v55 }
0x1224   :  { %3225 = vmatpush.msra.mxu2 %v3214_v16 }
0x1226   :  { %2912 = vmatmul.f32.vlgmr.msrb.gmra.mxu0 %v5421_v47  ;;  %2932 = vmatmul.f32.vlgmr.msrb.gmra.mxu1 %v5421_v47 }
0x1227   :  { %3226 = vmatpush.msra.mxu2 %v3211_v22  ;;  %v3113_v22 = vld [vmem:[#allocation10 + $0x170] sm:$0xff] }
0x1228   :  { %3135 = vmatpush.msra.mxu0 %v3113_v22  ;;  %v3203_v22 = vld [vmem:[#allocation11 + $0xe0] sm:$0xff] }
0x1229   :  { %3227 = vmatpush.msra.mxu2 %v3208_v20  ;;  %v3109_v20 = vld [vmem:[#allocation10 + $0x150] sm:$0xff] }
0x122b   :  { %3228 = vmatpush.msra.mxu2 %v3205_v11  ;;  %v3103_v11 = vld [vmem:[#allocation10 + $0x120] sm:$0xff] }
0x122d   :  { %3229 = vmatpush.msra.mxu2 %v3202_v63  ;;  %v3100_v63 = vld [vmem:[#allocation10 + $0x108] sm:$0xff] }
0x122f   :  { %3230 = vmatpush.msra.mxu2 %v3199_v60  ;;  %v3101_v60 = vld [vmem:[#allocation10 + $0x110] sm:$0xff] }
0x1231   :  { %3231 = vmatpush.msra.mxu2 %v3196_v10  ;;  %v3097_v10 = vld [vmem:[#allocation10 + $0xf0] sm:$0xff] }
0x1233   :  { %3232 = vmatpush.msra.mxu2 %v3193_v23  ;;  %v3094_v23 = vld [vmem:[#allocation10 + $0xd8] sm:$0xff] }
0x1235   :  { %3233 = vmatpush.msra.mxu2 %v3190_v54  ;;  %v3095_v54 = vld [vmem:[#allocation10 + $0xe0] sm:$0xff] }
0x1237   :  { %3234 = vmatpush.msra.mxu2 %v3187_v13  ;;  %v3092_v13 = vld [vmem:[#allocation10 + $0xc8] sm:$0xff] }
0x1239   :  { %3235 = vmatpush.msra.mxu2 %v3184_v43  ;;  %v3088_v43 = vld [vmem:[#allocation10 + $0xa8] sm:$0xff] }
0x123b   :  { %3236 = vmatpush.msra.mxu2 %v5404_v29 }
0x123d   :  { %3237 = vmatpush.msra.mxu2 %v5407_v5 }
0x123f   :  { %3238 = vmatpush.msra.mxu2 %v5410_v52 }
0x129b   :  { %v2785_v27 = vpop.f32.mrf.mxu0  ;;  %v2805_v59 = vpop.f32.mrf.mxu1 }
0x129c   :  { %v2936_v7 = vadd.f32 %v2893_v41, %v2785_v27  ;;  %v3110_v41 = vld [vmem:[#allocation10 + $0x158] sm:$0xff] }
0x129d   :  { %v3106_v27 = vld [vmem:[#allocation10 + $0x138] sm:$0xff]  ;;  %3136 = vmatpush.msra.mxu0 %v3110_v41  ;;  %v3081_v41 = vld [vmem:[#allocation10 + $0x70] sm:$0xff] }
0x129e   :  { %v3446_v57 = vmul.f32 -1.442695, %v2936_v7  ;;  %v3107_v7 = vld [vmem:[#allocation10 + $0x140] sm:$0xff] }
0x129f   :  { %3137 = vmatpush.msra.mxu0 %v3107_v7  ;;  %v3201_v7 = vld [vmem:[#allocation11 + $0xd0] sm:$0xff] }
0x12a0   :  { %3592 = vpow2.f32 %v3446_v57  ;;  %v3104_v57 = vld [vmem:[#allocation10 + $0x128] sm:$0xff] }
0x12a1   :  { %3138 = vmatpush.msra.mxu0 %v3104_v57  ;;  %v3197_v57 = vld [vmem:[#allocation11 + $0xb0] sm:$0xff] }
0x12a2   :  { %v2825_v52 = vpop.f32.mrf.mxu2 }
0x12a3   :  { %v2913_v8 = vpop.f32.mrf.mxu0  ;;  %v2933_v3 = vpop.f32.mrf.mxu1  ;;  %3139 = vmatpush.msra.mxu0 %v3101_v60  ;;  %v3075_v60 = vld [vmem:[#allocation10 + $0x40] sm:$0xff] }
0x12a4   :  { %v2956_v36 = vadd.f32 %v2913_v8, %v2805_v59  ;;  %v2976_v5 = vadd.f32 %v5417_v44, %v2933_v3  ;;  %v3098_v59 = vld [vmem:[#allocation10 + $0xf8] sm:$0xff]  ;;  %v3079_v3 = vld [vmem:[#allocation10 + $0x60] sm:$0xff] }
0x12a5   :  { %v3114_v8 = vld [vmem:[#allocation10 + $0x178] sm:$0xff]  ;;  %3140 = vmatpush.msra.mxu0 %v3098_v59  ;;  %v3195_v59 = vld [vmem:[#allocation11 + $0xa0] sm:$0xff] }
0x12a6   :  { %v3593_v53 = vpop.eup %3592  ;;  %v3447_v48 = vmul.f32 -1.442695, %v2956_v36  ;;  %v3111_v36 = vld [vmem:[#allocation10 + $0x160] sm:$0xff]  ;;  %3155 = vmatpush.msra.mxu1 %v3114_v8  ;;  %v3072_v8 = vld [vmem:[#allocation10 + $0x28] sm:$0xff] }
0x12a7   :  { %v2940_v50 = vadd.f32 1.0, %v3593_v53  ;;  %v3108_v53 = vld [vmem:[#allocation10 + $0x148] sm:$0xff]  ;;  %3141 = vmatpush.msra.mxu0 %v3095_v54  ;;  %v3069_v54 = vld [vmem:[#allocation10 + $0x10] sm:$0xff] }
0x12a8   :  { %3594 = vpow2.f32 %v3447_v48  ;;  %v3091_v48 = vld [vmem:[#allocation10 + $0xc0] sm:$0xff]  ;;  %3156 = vmatpush.msra.mxu1 %v3111_v36 }
0x12a9   :  { %3596 = vrcp.f32 %v2940_v50  ;;  %v2952_v56 = vand.u32 2147483648, %v2940_v50  ;;  %v2950_v26 = vand.u32 2147483647, %v2940_v50  ;;  %vm2946_vm6 = vweird.f32 %v2940_v50  ;;  %3142 = vmatpush.msra.mxu0 %v3092_v13  ;;  %v3191_v36 = vld [vmem:[#allocation11 + $0x80] sm:$0xff]  ;;  %v3185_v13 = vld [vmem:[#allocation11 + $0x50] sm:$0xff] }
0x12aa   :  { %3157 = vmatpush.msra.mxu1 %v3108_v53  ;;  %v3188_v53 = vld [vmem:[#allocation11 + $0x68] sm:$0xff] }
0x12ab   :  { %v2953_v29 = vor.u32 1.1754944e-38, %v2952_v56  ;;  %vm2951_vm8 = vcmp.eq.f32.partialorder %v2950_v26, 8.507059e+37  ;;  %v3082_v56 = vld [vmem:[#allocation10 + $0x78] sm:$0xff]  ;;  %v3096_v26 = vld [vmem:[#allocation10 + $0xe8] sm:$0xff] }
0x12ae   :  { %v3595_v45 = vpop.eup %3594 }
0x12af   :  { %v3597_v61 = vpop.eup %3596  ;;  %v2960_v14 = vadd.f32 1.0, %v3595_v45  ;;  %v3089_v45 = vld [vmem:[#allocation10 + $0xb0] sm:$0xff] }
0x12b0   :  { %v2942_v2 = vmul.f32 %v3597_v61, %v2940_v50  ;;  %vm2947_vm5 = vweird.f32 %v3597_v61  ;;  %v3105_v50 = vld [vmem:[#allocation10 + $0x130] sm:$0xff]  ;;  %3143 = vmatpush.msra.mxu0 %v3089_v45  ;;  %v3183_v45 = vld [vmem:[#allocation11 + $0x40] sm:$0xff] }
0x12b1   :  { %3598 = vrcp.f32 %v2960_v14  ;;  %vm2948_vm7 = vmor %vm2946_vm6, %vm2947_vm5  ;;  %v2972_v18 = vand.u32 2147483648, %v2960_v14  ;;  %v2970_v0 = vand.u32 2147483647, %v2960_v14  ;;  %vm2966_vm10 = vweird.f32 %v2960_v14  ;;  %3158 = vmatpush.msra.mxu1 %v3105_v50  ;;  %v3186_v50 = vld [vmem:[#allocation11 + $0x58] sm:$0xff] }
0x12b2   :  { %v2943_v6 = vsub.f32 1.0, %v2942_v2  ;;  %v3086_v2 = vld [vmem:[#allocation10 + $0x98] sm:$0xff] }
0x12b3   :  { %v2973_v30 = vor.u32 1.1754944e-38, %v2972_v18  ;;  %vm2971_vm12 = vcmp.eq.f32.partialorder %v2970_v0, 8.507059e+37  ;;  %3144 = vmatpush.msra.mxu0 %v3086_v2  ;;  %v3071_v18 = vld [vmem:[#allocation10 + $0x20] sm:$0xff]  ;;  %v3176_v2 = vld [vmem:[#allocation11 + $0x8] sm:$0xff] }
0x12b4   :  { %v2944_v9 = vmul.f32 %v3597_v61, %v2943_v6  ;;  %v3099_v6 = vld [vmem:[#allocation10 + $0x100] sm:$0xff] }
0x12b5   :  { %v3067_v0 = vld [vmem:[#allocation10] sm:$0xff] }
0x12b6   :  { %v2945_v37 = vadd.f32 %v3597_v61, %v2944_v9  ;;  %v3083_v9 = vld [vmem:[#allocation10 + $0x80] sm:$0xff] }
0x12b7   :  { %v3599_v46 = vpop.eup %3598  ;;  %3145 = vmatpush.msra.mxu0 %v3083_v9  ;;  %v3055_v9 = vstv %s3452_s20 }
0x12b8   :  { %v2962_v17 = vmul.f32 %v3599_v46, %v2960_v14  ;;  %v2949_v33 = vsel %vm2948_vm7, %v3597_v61, %v2945_v37  ;;  %vm2967_vm9 = vweird.f32 %v3599_v46  ;;  %v3102_v61 = vld [vmem:[#allocation10 + $0x118] sm:$0xff]  ;;  %v3085_v14 = vld [vmem:[#allocation10 + $0x90] sm:$0xff]  ;;  %v3080_v37 = vld [vmem:[#allocation10 + $0x68] sm:$0xff]  ;;  %vm3056_vm0 = vcmp.eq.s32.totalorder %v5691_v21, %v3055_v9 }
0x12b9   :  { %v2954_v4 = vsel %vm2951_vm8, %v2953_v29, %v2949_v33  ;;  %vm2968_vm11 = vmor %vm2966_vm10, %vm2967_vm9  ;;  %3159 = vmatpush.msra.mxu1 %v3102_v61  ;;  %v3076_v29 = vld [vmem:[#allocation10 + $0x48] sm:$0xff]  ;;  %3146 = vmatpush.msra.mxu0 %v3080_v37  ;;  %v3090_v33 = vld [vmem:[#allocation10 + $0xb8] sm:$0xff] }
0x12ba   :  { %v2963_v39 = vsub.f32 1.0, %v2962_v17  ;;  %v2977_v49 = vmul.f32 %v2976_v5, %v2954_v4  ;;  %v3077_v17 = vld [vmem:[#allocation10 + $0x50] sm:$0xff]  ;;  %v3074_v4 = vld [vmem:[#allocation10 + $0x38] sm:$0xff]  ;;  %v3179_v61 = vld [vmem:[#allocation11 + $0x20] sm:$0xff] }
0x12bb   :  { %3160 = vmatpush.msra.mxu1 %v3099_v6  ;;  %v3073_v5 = vld [vmem:[#allocation10 + $0x30] sm:$0xff]  ;;  %3147 = vmatpush.msra.mxu0 %v3077_v17  ;;  %vm3057_vm4 = vmand %vm3056_vm0, %vm975_vm3 }
0x12bc   :  { %v2964_v40 = vmul.f32 %v3599_v46, %v2963_v39  ;;  %v2978_v15 = vadd.f32 %v2977_v49, %v2825_v52  ;;  %v3087_v49 = vld [vmem:[#allocation10 + $0xa0] sm:$0xff]  ;;  %v3070_v52 = vld [vmem:[#allocation10 + $0x18] sm:$0xff]  ;;  %v3177_v6 = vld [vmem:[#allocation11 + $0x10] sm:$0xff]  ;;  %v3453_v37 = vsel %vm3057_vm4, 1.0, %v5693_v38 }
0x12bd   :  { %3161 = vmatpush.msra.mxu1 %v3096_v26  ;;  %3148 = vmatpush.msra.mxu0 %v3074_v4 }
0x12be   :  { %v2965_v19 = vadd.f32 %v3599_v46, %v2964_v40  ;;  %3600 = vtanh.f32 %v2978_v15  ;;  %v3084_v40 = vld [vmem:[#allocation10 + $0x88] sm:$0xff] }
0x12bf   :  { %v3068_v15 = vld [vmem:[#allocation10 + $0x8] sm:$0xff]  ;;  %3149 = vmatpush.msra.mxu0 %v3071_v18 }
0x12c0   :  { %v2969_v62 = vsel %vm2968_vm11, %v3599_v46, %v2965_v19  ;;  %v3093_v46 = vld [vmem:[#allocation10 + $0xd0] sm:$0xff] }
0x12c1   :  { %v2974_v28 = vsel %vm2971_vm12, %v2973_v30, %v2969_v62  ;;  %3162 = vmatpush.msra.mxu1 %v3093_v46  ;;  %v3221_v62 = vld [vmem:[#allocation11 + $0x170] sm:$0xff]  ;;  %3150 = vmatpush.msra.mxu0 %v3068_v15  ;;  %v3344_v15 = vld [vmem:[#allocation13 + $0x68] sm:$0xff] }
0x12c2   :  { %v2980_v34 = vsub.f32 1.0, %v2974_v28  ;;  %v2982_v31 = vmul.f32 %v2974_v28, %v5421_v47  ;;  %v3112_v47 = vld [vmem:[#allocation10 + $0x168] sm:$0xff]  ;;  %v3222_v28 = vld [vmem:[#allocation11 + $0x178] sm:$0xff] }
0x12c3   :  { %3115 = vmatpush.msrb.mxu3 %v3112_v47  ;;  %3163 = vmatpush.msra.mxu1 %v3090_v33  ;;  %v3207_v47 = vld [vmem:[#allocation11 + $0x100] sm:$0xff] }
0x12c4   :  { %v3601_v51 = vpop.eup %3600  ;;  %3263 = vmatpush.msrb.mxu0 %v3222_v28  ;;  %v3338_v28 = vld [vmem:[#allocation13 + $0x38] sm:$0xff] }
0x12c5   :  { %v2981_v58 = vmul.f32 %v3601_v51, %v2980_v34  ;;  %3116 = vmatpush.msrb.mxu3 %v3109_v20  ;;  %3164 = vmatpush.msra.mxu1 %v3087_v49  ;;  %v3218_v51 = vld [vmem:[#allocation11 + $0x158] sm:$0xff]  ;;  %v3204_v20 = vld [vmem:[#allocation11 + $0xe8] sm:$0xff] }
0x12c7   :  { %v5449_v12 = vadd.f32 %v2982_v31, %v2981_v58  ;;  %3117 = vmatpush.msrb.mxu3 %v3106_v27  ;;  %3165 = vmatpush.msra.mxu1 %v3084_v40  ;;  %v3219_v58 = vld [vmem:[#allocation11 + $0x160] sm:$0xff]  ;;  %v3200_v27 = vld [vmem:[#allocation11 + $0xc8] sm:$0xff]  ;;  %v3346_v40 = vld [vmem:[#allocation13 + $0x78] sm:$0xff] }
0x12c8   :  { %v3215_v31 = vld [vmem:[#allocation11 + $0x140] sm:$0xff]  ;;  %3264 = vmatpush.msrb.mxu0 %v3219_v58 }
0x12c9   :  { %3016 = vmatmul.f32.vlgmr.msrb.gmra.mxu2 %v5449_v12  ;;  %3118 = vmatpush.msrb.mxu3 %v3103_v11  ;;  %v3078_v11 = vld [vmem:[#allocation10 + $0x58] sm:$0xff] }
0x12ca   :  { %3166 = vmatpush.msra.mxu1 %v3081_v41 }
0x12cb   :  { %3119 = vmatpush.msrb.mxu3 %v3100_v63  ;;  %v3198_v63 = vld [vmem:[#allocation11 + $0xb8] sm:$0xff] }
0x12cc   :  { %3167 = vmatpush.msra.mxu1 %v3078_v11 }
0x12cd   :  { %3120 = vmatpush.msrb.mxu3 %v3097_v10  ;;  %v3194_v10 = vld [vmem:[#allocation11 + $0x98] sm:$0xff] }
0x12ce   :  { %3168 = vmatpush.msra.mxu1 %v3075_v60 }
0x12cf   :  { %3121 = vmatpush.msrb.mxu3 %v3094_v23  ;;  %v3192_v23 = vld [vmem:[#allocation11 + $0x88] sm:$0xff] }
0x12d0   :  { %3169 = vmatpush.msra.mxu1 %v3072_v8 }
0x12d1   :  { %3239 = vmatmul.f32.vlgmr.msra.gmra.mxu2 %v5449_v12  ;;  %3122 = vmatpush.msrb.mxu3 %v3091_v48  ;;  %v3189_v48 = vld [vmem:[#allocation11 + $0x70] sm:$0xff] }
0x12d2   :  { %3170 = vmatpush.msra.mxu1 %v3069_v54 }
0x12d3   :  { %3123 = vmatpush.msrb.mxu3 %v3088_v43  ;;  %v3182_v43 = vld [vmem:[#allocation11 + $0x38] sm:$0xff] }
0x12d4   :  { %3347 = vmatpush.msrb.mxu1 %v3346_v40 }
0x12d5   :  { %3124 = vmatpush.msrb.mxu3 %v3085_v14  ;;  %v3180_v14 = vld [vmem:[#allocation11 + $0x28] sm:$0xff] }
0x12d7   :  { %3125 = vmatpush.msrb.mxu3 %v3082_v56  ;;  %v3048_v56 = vstv %s3450_s19 }
0x12d8   :  { %vm3049_vm15 = vcmp.eq.s32.totalorder %v5691_v21, %v3048_v56 }
0x12d9   :  { %3126 = vmatpush.msrb.mxu3 %v3079_v3  ;;  %vm3050_vm2 = vmand %vm3049_vm15, %vm967_vm1 }
0x12da   :  { %v3451_v3 = vsel %vm3050_vm2, 1.0, %v5693_v38 }
0x12db   :  { %3127 = vmatpush.msrb.mxu3 %v3076_v29  ;;  %v3060_v33 = vadd.f32 %v3453_v37, %v3451_v3 }
0x12dd   :  { %3128 = vmatpush.msrb.mxu3 %v3073_v5  ;;  %v3061_v5 = vstv %s3046_s2 }
0x12de   :  { %v3062_v49 = vmul.f32 %v3061_v5, %v3060_v33 }
0x12df   :  { %3129 = vmatpush.msrb.mxu3 %v3070_v52 }
0x12e1   :  { %3130 = vmatpush.msrb.mxu3 %v3067_v0  ;;  %v3345_v0 = vld [vmem:[#allocation13 + $0x70] sm:$0xff] }
0x12e2   :  { %3348 = vmatpush.msrb.mxu1 %v3345_v0 }
0x12e3   :  { %3243 = vmatpush.msra.mxu3 %v3221_v62  ;;  %v3339_v62 = vld [vmem:[#allocation13 + $0x40] sm:$0xff] }
0x12e4   :  { %3349 = vmatpush.msrb.mxu1 %v3344_v15 }
0x12e5   :  { %3244 = vmatpush.msra.mxu3 %v3218_v51 }
0x12e7   :  { %3245 = vmatpush.msra.mxu3 %v3215_v31  ;;  %v3337_v31 = vld [vmem:[#allocation13 + $0x30] sm:$0xff] }
0x134c   :  { %v3017_v24 = vpop.f32.mrf.mxu2 }
0x134d   :  { %v3018_v35 = vadd.f32 %v5428_v42, %v3017_v24  ;;  %v3216_v24 = vld [vmem:[#allocation11 + $0x148] sm:$0xff] }
0x134e   :  { %3265 = vmatpush.msrb.mxu0 %v3216_v24 }
0x134f   :  { %3021 = vst [vmem:[#allocation14 + $0x28] sm:$0xff] %v3018_v35  ;;  %3022 = vmax.xlane.f32.xlu0 %v3018_v35 }
0x13c2   :  { %v3023_v25 = vpop.xlane.xlu0 %3022 }
0x13c3   :  { %vm3024_vm13 = vcmp.eq.f32.partialorder %v3018_v35, %v3023_v25  ;;  %v3212_v35 = vld [vmem:[#allocation11 + $0x128] sm:$0xff]  ;;  %v3213_v25 = vld [vmem:[#allocation11 + $0x130] sm:$0xff] }
0x13c4   :  { %v5455_v32 = vsel %vm3024_vm13, %v5691_v21, 128  ;;  %3246 = vmatpush.msra.mxu3 %v3212_v35  ;;  %3266 = vmatpush.msrb.mxu0 %v3213_v25  ;;  %v3336_v35 = vld [vmem:[#allocation13 + $0x28] sm:$0xff]  ;;  %v3335_v25 = vld [vmem:[#allocation13 + $0x20] sm:$0xff] }
0x13c5   :  { %v3027_v55 = vshra.s32 %v5455_v32, 16  ;;  %v3026_v39 = vand.u32 65535, %v5455_v32  ;;  %v3209_v32 = vld [vmem:[#allocation11 + $0x110] sm:$0xff] }
0x13c6   :  { %3247 = vmatpush.msra.mxu3 %v3209_v32  ;;  %v3334_v32 = vld [vmem:[#allocation13 + $0x18] sm:$0xff] }
0x13c7   :  { %v5458_v16 = vcvt.s32.f32 %v3027_v55  ;;  %v3028_v30 = vcvt.s32.f32 %v3026_v39  ;;  %v3210_v55 = vld [vmem:[#allocation11 + $0x118] sm:$0xff]  ;;  %v3064_v39 = vstv %s3063_s22 }
0x13c8   :  { %3267 = vmatpush.msrb.mxu0 %v3210_v55  ;;  %v3333_v55 = vld [vmem:[#allocation13 + $0x10] sm:$0xff] }
0x13c9   :  { %3030 = vmin.xlane.f32.xlu1 %v5458_v16 }
0x13ca   :  { %3268 = vmatpush.msrb.mxu0 %v3207_v47 }
0x13cc   :  { %3269 = vmatpush.msrb.mxu0 %v3204_v20  ;;  %v3332_v20 = vld [vmem:[#allocation13 + $0x8] sm:$0xff] }
0x13ce   :  { %3270 = vmatpush.msrb.mxu0 %v3201_v7  ;;  %v3331_v7 = vld [vmem:[#allocation13] sm:$0xff] }
0x13d0   :  { %3271 = vmatpush.msrb.mxu0 %v3198_v63 }
0x13d2   :  { %3272 = vmatpush.msrb.mxu0 %v3195_v59 }
0x13d4   :  { %3273 = vmatpush.msrb.mxu0 %v3192_v23 }
0x13d6   :  { %3274 = vmatpush.msrb.mxu0 %v3189_v48 }
0x13d8   :  { %3275 = vmatpush.msrb.mxu0 %v3186_v50 }
0x13da   :  { %3276 = vmatpush.msrb.mxu0 %v3183_v45 }
0x13dc   :  { %3277 = vmatpush.msrb.mxu0 %v3180_v14 }
0x13de   :  { %3278 = vmatpush.msrb.mxu0 %v3177_v6 }
0x143c   :  { %v5462_v19 = vpop.xlane.xlu1 %3030 }
0x143d   :  { %vm3032_vm14 = vcmp.eq.f32.partialorder %v5458_v16, %v5462_v19  ;;  %v3206_v16 = vld [vmem:[#allocation11 + $0xf8] sm:$0xff]  ;;  %v3037_v26 = vcvt.f32.s32 %v5462_v19  ;;  %v3343_v19 = vld [vmem:[#allocation13 + $0x60] sm:$0xff] }
0x143e   :  { %v3033_v34 = vsel %vm3032_vm14, %v3028_v30, inf  ;;  %3248 = vmatpush.msra.mxu3 %v3206_v16  ;;  %3350 = vmatpush.msrb.mxu1 %v3343_v19  ;;  %v3340_v30 = vld [vmem:[#allocation13 + $0x48] sm:$0xff] }
0x143f   :  { %3034 = vmin.xlane.f32.xlu2 %v3033_v34  ;;  %v3038_v29 = vshll.u32 %v3037_v26, 16  ;;  %v3240_v34 = vpop.f32.mrf.mxu2 }
0x1440   :  { %3249 = vmatpush.msra.mxu3 %v3203_v22 }
0x1442   :  { %3250 = vmatpush.msra.mxu3 %v3200_v27 }
0x1444   :  { %3251 = vmatpush.msra.mxu3 %v3197_v57 }
0x1446   :  { %3252 = vmatpush.msra.mxu3 %v3194_v10 }
0x1448   :  { %3253 = vmatpush.msra.mxu3 %v3191_v36 }
0x144a   :  { %3254 = vmatpush.msra.mxu3 %v3188_v53 }
0x144c   :  { %3255 = vmatpush.msra.mxu3 %v3185_v13 }
0x144e   :  { %3256 = vmatpush.msra.mxu3 %v3182_v43 }
0x1450   :  { %3257 = vmatpush.msra.mxu3 %v3179_v61 }
0x1452   :  { %3258 = vmatpush.msra.mxu3 %v3176_v2 }
0x14b2   :  { %v3035_v46 = vpop.xlane.xlu2 %3034 }
0x14b3   :  { %v3036_v17 = vcvt.f32.s32 %v3035_v46 }
0x14b5   :  { %v3039_v4 = vadd.s32 %v3038_v29, %v3036_v17 }
0x14b7   :  { %vm3040_vm1 = vcmp.eq.s32.totalorder %v5691_v21, %v3039_v4  ;;  %v3342_v21 = vld [vmem:[#allocation13 + $0x58] sm:$0xff] }
0x14b8   :  { %v3448_v1 = vsel %vm3040_vm1, 1.0, %v5693_v38  ;;  %3351 = vmatpush.msrb.mxu1 %v3342_v21  ;;  %v3341_v38 = vld [vmem:[#allocation13 + $0x50] sm:$0xff] }
0x14b9   :  { %v3065_v52 = vmul.f32 %v3448_v1, %v3064_v39 }
0x14ba   :  { %3352 = vmatpush.msrb.mxu1 %v3341_v38 }
0x14bb   :  { %v3066_v18 = vadd.f32 %v3065_v52, %v3062_v49 }
0x14bc   :  { %3353 = vmatpush.msrb.mxu1 %v3340_v30 }
0x14bd   :  { %3131 = vmatmul.f32.vlgmr.msrb.gmra.mxu3 %v3066_v18  ;;  %3151 = vmatmul.f32.vlgmr.msra.gmra.mxu0 %v3066_v18 }
0x14be   :  { %3171 = vmatmul.f32.vlgmr.msra.gmra.mxu1 %v3066_v18 }
0x14bf   :  { %3354 = vmatpush.msrb.mxu1 %v3339_v62 }
0x14c1   :  { %3355 = vmatpush.msrb.mxu1 %v3338_v28 }
0x14c3   :  { %3356 = vmatpush.msrb.mxu1 %v3337_v31 }
0x14c5   :  { %3259 = vmatmul.f32.vlgmr.msra.gmra.mxu3 %v5449_v12  ;;  %3279 = vmatmul.f32.vlgmr.msrb.gmra.mxu0 %v5449_v12 }
0x14c6   :  { %3357 = vmatpush.msrb.mxu1 %v3336_v35 }
0x14c8   :  { %3358 = vmatpush.msrb.mxu1 %v3335_v25 }
0x14ca   :  { %3359 = vmatpush.msrb.mxu1 %v3334_v32 }
0x14cc   :  { %3360 = vmatpush.msrb.mxu1 %v3333_v55 }
0x14ce   :  { %3361 = vmatpush.msrb.mxu1 %v3332_v20 }
0x14d0   :  { %3362 = vmatpush.msrb.mxu1 %v3331_v7 }
0x153a   :  { %v3152_v16 = vpop.f32.mrf.mxu0 }
0x153b   :  { %v3172_v6 = vpop.f32.mrf.mxu1 }
0x1540   :  { %v3132_v51 = vpop.f32.mrf.mxu3 }
0x1541   :  { %v3283_v58 = vadd.f32 %v3240_v34, %v3132_v51 }
0x1542   :  { %v3280_v54 = vpop.f32.mrf.mxu0 }
0x1543   :  { %v3454_v24 = vmul.f32 -1.442695, %v3283_v58  ;;  %v3323_v43 = vadd.f32 %v5417_v44, %v3280_v54 }
0x1545   :  { %3602 = vpow2.f32 %v3454_v24 }
0x1548   :  { %v3260_v47 = vpop.f32.mrf.mxu3 }
0x1549   :  { %v3303_v22 = vadd.f32 %v3260_v47, %v3152_v16 }
0x154b   :  { %v3603_v41 = vpop.eup %3602  ;;  %v3455_v27 = vmul.f32 -1.442695, %v3303_v22 }
0x154c   :  { %v3287_v11 = vadd.f32 1.0, %v3603_v41 }
0x154d   :  { %3604 = vpow2.f32 %v3455_v27 }
0x154e   :  { %3606 = vrcp.f32 %v3287_v11  ;;  %v3299_v8 = vand.u32 2147483648, %v3287_v11  ;;  %v3297_v23 = vand.u32 2147483647, %v3287_v11  ;;  %vm3293_vm5 = vweird.f32 %v3287_v11 }
0x1550   :  { %v3300_v13 = vor.u32 1.1754944e-38, %v3299_v8  ;;  %vm3298_vm7 = vcmp.eq.f32.partialorder %v3297_v23, 8.507059e+37 }
0x1553   :  { %v3605_v57 = vpop.eup %3604 }
0x1554   :  { %v3607_v63 = vpop.eup %3606  ;;  %v3307_v60 = vadd.f32 1.0, %v3605_v57 }
0x1555   :  { %v3289_v10 = vmul.f32 %v3607_v63, %v3287_v11  ;;  %vm3294_vm3 = vweird.f32 %v3607_v63 }
0x1556   :  { %3608 = vrcp.f32 %v3307_v60  ;;  %vm3295_vm6 = vmor %vm3293_vm5, %vm3294_vm3  ;;  %v3319_v56 = vand.u32 2147483648, %v3307_v60  ;;  %v3317_v3 = vand.u32 2147483647, %v3307_v60  ;;  %vm3313_vm9 = vweird.f32 %v3307_v60 }
0x1557   :  { %v3290_v59 = vsub.f32 1.0, %v3289_v10 }
0x1558   :  { %v3320_v46 = vor.u32 1.1754944e-38, %v3319_v56  ;;  %vm3318_vm11 = vcmp.eq.f32.partialorder %v3317_v3, 8.507059e+37 }
0x1559   :  { %v3291_v36 = vmul.f32 %v3607_v63, %v3290_v59 }
0x155b   :  { %v3292_v53 = vadd.f32 %v3607_v63, %v3291_v36 }
0x155c   :  { %v3609_v48 = vpop.eup %3608 }
0x155d   :  { %v3296_v50 = vsel %vm3295_vm6, %v3607_v63, %v3292_v53  ;;  %v3309_v45 = vmul.f32 %v3609_v48, %v3307_v60  ;;  %vm3314_vm8 = vweird.f32 %v3609_v48 }
0x155e   :  { %v3301_v61 = vsel %vm3298_vm7, %v3300_v13, %v3296_v50  ;;  %vm3315_vm10 = vmor %vm3313_vm9, %vm3314_vm8 }
0x155f   :  { %v3324_v14 = vmul.f32 %v3323_v43, %v3301_v61  ;;  %v3310_v2 = vsub.f32 1.0, %v3309_v45 }
0x1561   :  { %v3325_v9 = vadd.f32 %v3324_v14, %v3172_v6  ;;  %v3311_v26 = vmul.f32 %v3609_v48, %v3310_v2 }
0x1563   :  { %3610 = vtanh.f32 %v3325_v9  ;;  %v3312_v37 = vadd.f32 %v3609_v48, %v3311_v26 }
0x1565   :  { %v3316_v29 = vsel %vm3315_vm10, %v3609_v48, %v3312_v37 }
0x1566   :  { %v3321_v17 = vsel %vm3318_vm11, %v3320_v46, %v3316_v29 }
0x1567   :  { %v3327_v33 = vsub.f32 1.0, %v3321_v17  ;;  %v3329_v4 = vmul.f32 %v3321_v17, %v5449_v12 }
0x1569   :  { %v3611_v44 = vpop.eup %3610 }
0x156a   :  { %v3328_v5 = vmul.f32 %v3611_v44, %v3327_v33 }
0x156c   :  { %v3330_v39 = vadd.f32 %v3329_v4, %v3328_v5 }
0x156e   :  { %3363 = vmatmul.f32.vlgmr.msrb.gmra.mxu1 %v3330_v39 }
0x15eb   :  { %v3364_v49 = vpop.f32.mrf.mxu1 }
0x15ec   :  { %v3365_v1 = vadd.f32 %v5428_v42, %v3364_v49 }
0x15ee   :  { %3368 = vst [vmem:[#allocation14 + $0x30] sm:$0xff] %v3365_v1 }
0x15ef   :  { %3381 = dma.vmem_to_hbm [thread:$0]  %s3374_s8, 896, %s3376_s25, [#allocation7], %s3817_s0, %s3817_s0, %s3818_s23  }
0x15f0   :  { %3806 = dma.done.wait [#allocation7], 896  }
0x15f1   :  { %3807 = vsyncadd [#allocation7], 4294966400 }
0x15f2   :  { %3386 = vsyncpa [#allocation6], 1 }
0x15f3   :  { %3387 = vsyncpa [#allocation9], 1 }
0x15f4   :  { %3388 = vsyncpa [#allocation12], 1 }
0x15f5   :  { %3389 = vsyncpa [#allocation7], 1 }

</bundles_post_ra>
